<compile_context>
chip_gen: v7x
topology: tpu7x:2x2x1
jax: 0.10.0
libtpu: 0.0.40
codegen_flags: <defaults>
</compile_context>

<pallas_src>
import jax
import jax.numpy as jnp
from jax.experimental import pallas as pl
from jax.experimental.pallas import tpu as pltpu

_VMEM = pl.BlockSpec(memory_space=pltpu.MemorySpace.VMEM)


# ----------------------------- Pallas kernels ------------------------------

def _conv_relu_pool_kernel(p_ref, w_ref, b_ref, o_ref):
    """Fused conv (as im2col matmul) + bias + ReLU + 2x2 max-pool.

    p: (4, Mq, K)  im2col patches, pre-split into the four 2x2-pool quadrants
                   (quadrant q = (dh, dw), rows within a quadrant ordered
                   (b, oh_pooled, ow_pooled)).
    w: (K, N)      flattened conv weights, feature order (C_in, kh, kw).
    b: (1, N)      bias.
    o: (Mq, N)     pooled activation, rows ordered (b, oh_pooled, ow_pooled).
    """
    w = w_ref[...]
    b = b_ref[...]

    def quadrant(q):
        acc = jnp.dot(p_ref[q], w, preferred_element_type=jnp.float32)
        return jnp.maximum(acc + b, 0.0)          # conv + bias + ReLU

    pooled = jnp.maximum(jnp.maximum(quadrant(0), quadrant(1)),
                         jnp.maximum(quadrant(2), quadrant(3)))
    o_ref[...] = pooled.astype(o_ref.dtype)


def _fc_head_kernel(x_ref, w1_ref, b1_ref, w2_ref, b2_ref, w3_ref, b3_ref, o_ref):
    """Fused fc1+ReLU -> fc2+ReLU -> fc3.  All intermediates stay in VMEM/vregs."""
    h = jnp.dot(x_ref[...], w1_ref[...], preferred_element_type=jnp.float32) + b1_ref[...]
    h = jnp.maximum(h, 0.0)
    h = jnp.dot(h, w2_ref[...], preferred_element_type=jnp.float32) + b2_ref[...]
    h = jnp.maximum(h, 0.0)
    out = jnp.dot(h, w3_ref[...], preferred_element_type=jnp.float32) + b3_ref[...]
    o_ref[...] = out.astype(o_ref.dtype)


# ------------------------------ kernel wrappers -----------------------------

def conv_relu_pool(patches, w_mat, b_row):
    """patches: (4, Mq, K) -> (Mq, N) pooled activation."""
    _, mq, _ = patches.shape
    n = w_mat.shape[1]
    return pl.pallas_call(
        _conv_relu_pool_kernel,
        out_shape=jax.ShapeDtypeStruct((mq, n), jnp.float32),
        in_specs=[_VMEM, _VMEM, _VMEM],
        out_specs=_VMEM,
    )(patches, w_mat, b_row)


def fc_head(flat, prep):
    """flat: (B, 400) -> logits (B, 10), single kernel for the whole FC stack."""
    B = flat.shape[0]
    n_out = prep["fw3"].shape[1]
    return pl.pallas_call(
        _fc_head_kernel,
        out_shape=jax.ShapeDtypeStruct((B, n_out), jnp.float32),
        in_specs=[_VMEM] * 7,
        out_specs=_VMEM,
    )(flat, prep["fw1"], prep["fb1"], prep["fw2"], prep["fb2"],
      prep["fw3"], prep["fb3"])


# ------------------------------ glue helpers -------------------------------

def pool_quadrant_patches(x, k, lhs_spec):
    """Single fused XLA patch-extraction op, pre-split into the 4 pool quadrants.

    Returns (4, B*OHp*OWp, C*k*k) float32.  Feature order of the last axis is
    (C_in, kh, kw) -- exactly PyTorch's conv-weight flatten order -- so the
    flattened PyTorch weights can be used directly.  lhs_spec lets the
    NCHW->NHWC layout change of the network input be folded into this op.
    """
    p = jax.lax.conv_general_dilated_patches(
        x, filter_shape=(k, k), window_strides=(1, 1), padding="VALID",
        dimension_numbers=(lhs_spec, "HWIO", "NHWC"))            # (B, OH, OW, C*k*k)
    B, OH, OW, F = p.shape
    ohp, owp = OH // 2, OW // 2
    quads = [p[:, dh:dh + 2 * ohp:2, dw:dw + 2 * owp:2, :].reshape(B * ohp * owp, F)
             for dh in (0, 1) for dw in (0, 1)]
    return jnp.stack(quads, axis=0)                               # (4, B*OHp*OWp, F)


# -------------------------------- parameters --------------------------------

def init_params(key):
    """Parameters in PyTorch-native shapes (same init scheme as nn.Conv2d/Linear)."""
    def uniform(key, shape, fan_in):
        bound = 1.0 / jnp.sqrt(float(fan_in))
        return jax.random.uniform(key, shape, jnp.float32, -bound, bound)

    keys = jax.random.split(key, 10)
    return {
        "conv1_w": uniform(keys[0], (6, 3, 5, 5), 3 * 5 * 5),
        "conv1_b": uniform(keys[1], (6,), 3 * 5 * 5),
        "conv2_w": uniform(keys[2], (16, 6, 5, 5), 6 * 5 * 5),
        "conv2_b": uniform(keys[3], (16,), 6 * 5 * 5),
        "fc1_w": uniform(keys[4], (120, 16 * 5 * 5), 16 * 5 * 5),
        "fc1_b": uniform(keys[5], (120,), 16 * 5 * 5),
        "fc2_w": uniform(keys[6], (84, 120), 120),
        "fc2_b": uniform(keys[7], (84,), 120),
        "fc3_w": uniform(keys[8], (10, 84), 84),
        "fc3_b": uniform(keys[9], (10,), 84),
    }


def prepare_params(params):
    """One-time (outside jit) layout prep: flatten/permute/transpose all weights
    so the jitted forward contains zero layout ops on parameters."""
    return {
        # conv weights flattened to (C_in*k*k, C_out); feature order (C_in,kh,kw)
        # matches the patch extraction above.
        "w1": params["conv1_w"].reshape(6, 75).T,                            # (75, 6)
        "b1": params["conv1_b"].reshape(1, 6),
        "w2": params["conv2_w"].reshape(16, 150).T,                          # (150, 16)
        "b2": params["conv2_b"].reshape(1, 16),
        # fc1 consumes the NHWC flatten (h, w, c); permute PyTorch's (c, h, w)
        # ordered weight once to match.
        "fw1": params["fc1_w"].reshape(120, 16, 5, 5)
                              .transpose(0, 2, 3, 1).reshape(120, 400).T,    # (400, 120)
        "fb1": params["fc1_b"].reshape(1, 120),
        "fw2": params["fc2_w"].T,                                            # (120, 84)
        "fb2": params["fc2_b"].reshape(1, 84),
        "fw3": params["fc3_w"].T,                                            # (84, 10)
        "fb3": params["fc3_b"].reshape(1, 10),
    }


# -------------------------------- the model --------------------------------

def mynet_forward(x_nchw, prep):
    B = x_nchw.shape[0]

    # conv1 (3->6, k5) + ReLU + 2x2 maxpool : 32x32 -> 28x28 -> 14x14
    p1 = pool_quadrant_patches(x_nchw, k=5, lhs_spec="NCHW")    # (4, B*14*14, 75)
    y1 = conv_relu_pool(p1, prep["w1"], prep["b1"])             # (B*14*14, 6)
    y1 = y1.reshape(B, 14, 14, 6)                               # NHWC, no transpose

    # conv2 (6->16, k5) + ReLU + 2x2 maxpool : 14x14 -> 10x10 -> 5x5
    p2 = pool_quadrant_patches(y1, k=5, lhs_spec="NHWC")        # (4, B*5*5, 150)
    y2 = conv_relu_pool(p2, prep["w2"], prep["b2"])             # (B*5*5, 16)

    # flatten in (h, w, c) order; fc1 weight was permuted once to match
    # PyTorch's x.view(-1, 16*5*5) semantics.
    flat = y2.reshape(B, 5 * 5 * 16)                            # (B, 400)

    # fused FC head: fc1+ReLU, fc2+ReLU, fc3 in one kernel.
    return fc_head(flat, prep)                                  # (B, 10)


if __name__ == "__main__":
    key = jax.random.PRNGKey(0)
    k_param, k_x = jax.random.split(key)

    params = init_params(k_param)        # PyTorch-native shapes
    prep = prepare_params(params)        # one-time layout prep, outside jit

    # architecture fixes channels=3, spatial=32 (because of fc1 = 16*5*5); batch 2
    x = jax.random.normal(k_x, (2, 3, 32, 32), jnp.float32)     # NCHW like PyTorch

    logits = jax.jit(mynet_forward)(x, prep)
    jax.block_until_ready(logits)

    assert logits.shape == (2, 10)
    assert logits.dtype == jnp.float32
    print("KERNEL_OK")
</pallas_src>

<mosaic_0001>
module attributes {stable_mosaic.version = 11 : i64} {
  func.func @_conv_relu_pool_kernel(%arg0: memref<4x392x75xf32, #tpu.memory_space<vmem>>, %arg1: memref<75x6xf32, #tpu.memory_space<vmem>>, %arg2: memref<1x6xf32, #tpu.memory_space<vmem>>, %arg3: memref<392x6xf32, #tpu.memory_space<vmem>>) attributes {dimension_semantics = [], scalar_prefetch = 0 : i64, scratch_operands = 0 : i64, tpu.core_type = #tpu.core_type<tc>} {
    %c0 = arith.constant 0 : index
    %c0_0 = arith.constant 0 : index
    %0 = vector.load %arg1[%c0, %c0_0] : memref<75x6xf32, #tpu.memory_space<vmem>>, vector<75x6xf32>
    %c0_1 = arith.constant 0 : index
    %c0_2 = arith.constant 0 : index
    %1 = vector.load %arg2[%c0_1, %c0_2] : memref<1x6xf32, #tpu.memory_space<vmem>>, vector<1x6xf32>
    %c0_3 = arith.constant 0 : index
    %c0_4 = arith.constant 0 : index
    %c0_5 = arith.constant 0 : index
    %2 = vector.load %arg0[%c0_3, %c0_4, %c0_5] : memref<4x392x75xf32, #tpu.memory_space<vmem>>, vector<1x392x75xf32>
    %3 = vector.shape_cast %2 : vector<1x392x75xf32> to vector<392x75xf32>
    %cst = arith.constant dense<0.000000e+00> : vector<392x6xf32>
    %4 = tpu.matmul %3, %0, %cst {dimension_numbers = #tpu.dot_dimension_numbers<[1], [0], [0], [1], [0, 0, 1, 1], [], []>} : vector<392x75xf32>, vector<75x6xf32>, vector<392x6xf32> -> vector<392x6xf32>
    %5 = vector.broadcast %1 : vector<1x6xf32> to vector<392x6xf32>
    %6 = arith.addf %4, %5 : vector<392x6xf32>
    %cst_6 = arith.constant 0.000000e+00 : f32
    %7 = vector.broadcast %cst_6 : f32 to vector<392x6xf32>
    %8 = arith.maximumf %6, %7 : vector<392x6xf32>
    %c1 = arith.constant 1 : index
    %c0_7 = arith.constant 0 : index
    %c0_8 = arith.constant 0 : index
    %9 = vector.load %arg0[%c1, %c0_7, %c0_8] : memref<4x392x75xf32, #tpu.memory_space<vmem>>, vector<1x392x75xf32>
    %10 = vector.shape_cast %9 : vector<1x392x75xf32> to vector<392x75xf32>
    %cst_9 = arith.constant dense<0.000000e+00> : vector<392x6xf32>
    %11 = tpu.matmul %10, %0, %cst_9 {dimension_numbers = #tpu.dot_dimension_numbers<[1], [0], [0], [1], [0, 0, 1, 1], [], []>} : vector<392x75xf32>, vector<75x6xf32>, vector<392x6xf32> -> vector<392x6xf32>
    %12 = vector.broadcast %1 : vector<1x6xf32> to vector<392x6xf32>
    %13 = arith.addf %11, %12 : vector<392x6xf32>
    %cst_10 = arith.constant 0.000000e+00 : f32
    %14 = vector.broadcast %cst_10 : f32 to vector<392x6xf32>
    %15 = arith.maximumf %13, %14 : vector<392x6xf32>
    %16 = arith.maximumf %8, %15 : vector<392x6xf32>
    %c2 = arith.constant 2 : index
    %c0_11 = arith.constant 0 : index
    %c0_12 = arith.constant 0 : index
    %17 = vector.load %arg0[%c2, %c0_11, %c0_12] : memref<4x392x75xf32, #tpu.memory_space<vmem>>, vector<1x392x75xf32>
    %18 = vector.shape_cast %17 : vector<1x392x75xf32> to vector<392x75xf32>
    %cst_13 = arith.constant dense<0.000000e+00> : vector<392x6xf32>
    %19 = tpu.matmul %18, %0, %cst_13 {dimension_numbers = #tpu.dot_dimension_numbers<[1], [0], [0], [1], [0, 0, 1, 1], [], []>} : vector<392x75xf32>, vector<75x6xf32>, vector<392x6xf32> -> vector<392x6xf32>
    %20 = vector.broadcast %1 : vector<1x6xf32> to vector<392x6xf32>
    %21 = arith.addf %19, %20 : vector<392x6xf32>
    %cst_14 = arith.constant 0.000000e+00 : f32
    %22 = vector.broadcast %cst_14 : f32 to vector<392x6xf32>
    %23 = arith.maximumf %21, %22 : vector<392x6xf32>
    %c3 = arith.constant 3 : index
    %c0_15 = arith.constant 0 : index
    %c0_16 = arith.constant 0 : index
    %24 = vector.load %arg0[%c3, %c0_15, %c0_16] : memref<4x392x75xf32, #tpu.memory_space<vmem>>, vector<1x392x75xf32>
    %25 = vector.shape_cast %24 : vector<1x392x75xf32> to vector<392x75xf32>
    %cst_17 = arith.constant dense<0.000000e+00> : vector<392x6xf32>
    %26 = tpu.matmul %25, %0, %cst_17 {dimension_numbers = #tpu.dot_dimension_numbers<[1], [0], [0], [1], [0, 0, 1, 1], [], []>} : vector<392x75xf32>, vector<75x6xf32>, vector<392x6xf32> -> vector<392x6xf32>
    %27 = vector.broadcast %1 : vector<1x6xf32> to vector<392x6xf32>
    %28 = arith.addf %26, %27 : vector<392x6xf32>
    %cst_18 = arith.constant 0.000000e+00 : f32
    %29 = vector.broadcast %cst_18 : f32 to vector<392x6xf32>
    %30 = arith.maximumf %28, %29 : vector<392x6xf32>
    %31 = arith.maximumf %23, %30 : vector<392x6xf32>
    %32 = arith.maximumf %16, %31 : vector<392x6xf32>
    %c0_19 = arith.constant 0 : index
    %c0_20 = arith.constant 0 : index
    %33 = vector.load %arg3[%c0_19, %c0_20] : memref<392x6xf32, #tpu.memory_space<vmem>>, vector<392x6xf32>
    tpu.vector_store %arg3[%c0_19, %c0_20], %32 {strides = array<i32>} : memref<392x6xf32, #tpu.memory_space<vmem>>, vector<392x6xf32>,
    return
  }
}

module attributes {stable_mosaic.version = 11 : i64} {
  func.func @_conv_relu_pool_kernel(%arg0: memref<4x50x150xf32, #tpu.memory_space<vmem>>, %arg1: memref<150x16xf32, #tpu.memory_space<vmem>>, %arg2: memref<1x16xf32, #tpu.memory_space<vmem>>, %arg3: memref<50x16xf32, #tpu.memory_space<vmem>>) attributes {dimension_semantics = [], scalar_prefetch = 0 : i64, scratch_operands = 0 : i64, tpu.core_type = #tpu.core_type<tc>} {
    %c0 = arith.constant 0 : index
    %c0_0 = arith.constant 0 : index
    %0 = vector.load %arg1[%c0, %c0_0] : memref<150x16xf32, #tpu.memory_space<vmem>>, vector<150x16xf32>
    %c0_1 = arith.constant 0 : index
    %c0_2 = arith.constant 0 : index
    %1 = vector.load %arg2[%c0_1, %c0_2] : memref<1x16xf32, #tpu.memory_space<vmem>>, vector<1x16xf32>
    %c0_3 = arith.constant 0 : index
    %c0_4 = arith.constant 0 : index
    %c0_5 = arith.constant 0 : index
    %2 = vector.load %arg0[%c0_3, %c0_4, %c0_5] : memref<4x50x150xf32, #tpu.memory_space<vmem>>, vector<1x50x150xf32>
    %3 = vector.shape_cast %2 : vector<1x50x150xf32> to vector<50x150xf32>
    %cst = arith.constant dense<0.000000e+00> : vector<50x16xf32>
    %4 = tpu.matmul %3, %0, %cst {dimension_numbers = #tpu.dot_dimension_numbers<[1], [0], [0], [1], [0, 0, 1, 1], [], []>} : vector<50x150xf32>, vector<150x16xf32>, vector<50x16xf32> -> vector<50x16xf32>
    %5 = vector.broadcast %1 : vector<1x16xf32> to vector<50x16xf32>
    %6 = arith.addf %4, %5 : vector<50x16xf32>
    %cst_6 = arith.constant 0.000000e+00 : f32
    %7 = vector.broadcast %cst_6 : f32 to vector<50x16xf32>
    %8 = arith.maximumf %6, %7 : vector<50x16xf32>
    %c1 = arith.constant 1 : index
    %c0_7 = arith.constant 0 : index
    %c0_8 = arith.constant 0 : index
    %9 = vector.load %arg0[%c1, %c0_7, %c0_8] : memref<4x50x150xf32, #tpu.memory_space<vmem>>, vector<1x50x150xf32>
    %10 = vector.shape_cast %9 : vector<1x50x150xf32> to vector<50x150xf32>
    %cst_9 = arith.constant dense<0.000000e+00> : vector<50x16xf32>
    %11 = tpu.matmul %10, %0, %cst_9 {dimension_numbers = #tpu.dot_dimension_numbers<[1], [0], [0], [1], [0, 0, 1, 1], [], []>} : vector<50x150xf32>, vector<150x16xf32>, vector<50x16xf32> -> vector<50x16xf32>
    %12 = vector.broadcast %1 : vector<1x16xf32> to vector<50x16xf32>
    %13 = arith.addf %11, %12 : vector<50x16xf32>
    %cst_10 = arith.constant 0.000000e+00 : f32
    %14 = vector.broadcast %cst_10 : f32 to vector<50x16xf32>
    %15 = arith.maximumf %13, %14 : vector<50x16xf32>
    %16 = arith.maximumf %8, %15 : vector<50x16xf32>
    %c2 = arith.constant 2 : index
    %c0_11 = arith.constant 0 : index
    %c0_12 = arith.constant 0 : index
    %17 = vector.load %arg0[%c2, %c0_11, %c0_12] : memref<4x50x150xf32, #tpu.memory_space<vmem>>, vector<1x50x150xf32>
    %18 = vector.shape_cast %17 : vector<1x50x150xf32> to vector<50x150xf32>
    %cst_13 = arith.constant dense<0.000000e+00> : vector<50x16xf32>
    %19 = tpu.matmul %18, %0, %cst_13 {dimension_numbers = #tpu.dot_dimension_numbers<[1], [0], [0], [1], [0, 0, 1, 1], [], []>} : vector<50x150xf32>, vector<150x16xf32>, vector<50x16xf32> -> vector<50x16xf32>
    %20 = vector.broadcast %1 : vector<1x16xf32> to vector<50x16xf32>
    %21 = arith.addf %19, %20 : vector<50x16xf32>
    %cst_14 = arith.constant 0.000000e+00 : f32
    %22 = vector.broadcast %cst_14 : f32 to vector<50x16xf32>
    %23 = arith.maximumf %21, %22 : vector<50x16xf32>
    %c3 = arith.constant 3 : index
    %c0_15 = arith.constant 0 : index
    %c0_16 = arith.constant 0 : index
    %24 = vector.load %arg0[%c3, %c0_15, %c0_16] : memref<4x50x150xf32, #tpu.memory_space<vmem>>, vector<1x50x150xf32>
    %25 = vector.shape_cast %24 : vector<1x50x150xf32> to vector<50x150xf32>
    %cst_17 = arith.constant dense<0.000000e+00> : vector<50x16xf32>
    %26 = tpu.matmul %25, %0, %cst_17 {dimension_numbers = #tpu.dot_dimension_numbers<[1], [0], [0], [1], [0, 0, 1, 1], [], []>} : vector<50x150xf32>, vector<150x16xf32>, vector<50x16xf32> -> vector<50x16xf32>
    %27 = vector.broadcast %1 : vector<1x16xf32> to vector<50x16xf32>
    %28 = arith.addf %26, %27 : vector<50x16xf32>
    %cst_18 = arith.constant 0.000000e+00 : f32
    %29 = vector.broadcast %cst_18 : f32 to vector<50x16xf32>
    %30 = arith.maximumf %28, %29 : vector<50x16xf32>
    %31 = arith.maximumf %23, %30 : vector<50x16xf32>
    %32 = arith.maximumf %16, %31 : vector<50x16xf32>
    %c0_19 = arith.constant 0 : index
    %c0_20 = arith.constant 0 : index
    %33 = vector.load %arg3[%c0_19, %c0_20] : memref<50x16xf32, #tpu.memory_space<vmem>>, vector<50x16xf32>
    tpu.vector_store %arg3[%c0_19, %c0_20], %32 {strides = array<i32>} : memref<50x16xf32, #tpu.memory_space<vmem>>, vector<50x16xf32>,
    return
  }
}

module attributes {stable_mosaic.version = 11 : i64} {
  func.func @_fc_head_kernel(%arg0: memref<2x400xf32, #tpu.memory_space<vmem>>, %arg1: memref<400x120xf32, #tpu.memory_space<vmem>>, %arg2: memref<1x120xf32, #tpu.memory_space<vmem>>, %arg3: memref<120x84xf32, #tpu.memory_space<vmem>>, %arg4: memref<1x84xf32, #tpu.memory_space<vmem>>, %arg5: memref<84x10xf32, #tpu.memory_space<vmem>>, %arg6: memref<1x10xf32, #tpu.memory_space<vmem>>, %arg7: memref<2x10xf32, #tpu.memory_space<vmem>>) attributes {dimension_semantics = [], scalar_prefetch = 0 : i64, scratch_operands = 0 : i64, tpu.core_type = #tpu.core_type<tc>} {
    %c0 = arith.constant 0 : index
    %c0_0 = arith.constant 0 : index
    %0 = vector.load %arg0[%c0, %c0_0] : memref<2x400xf32, #tpu.memory_space<vmem>>, vector<2x400xf32>
    %c0_1 = arith.constant 0 : index
    %c0_2 = arith.constant 0 : index
    %1 = vector.load %arg1[%c0_1, %c0_2] : memref<400x120xf32, #tpu.memory_space<vmem>>, vector<400x120xf32>
    %cst = arith.constant dense<0.000000e+00> : vector<2x120xf32>
    %2 = tpu.matmul %0, %1, %cst {dimension_numbers = #tpu.dot_dimension_numbers<[1], [0], [0], [1], [0, 0, 1, 1], [], []>} : vector<2x400xf32>, vector<400x120xf32>, vector<2x120xf32> -> vector<2x120xf32>
    %c0_3 = arith.constant 0 : index
    %c0_4 = arith.constant 0 : index
    %3 = vector.load %arg2[%c0_3, %c0_4] : memref<1x120xf32, #tpu.memory_space<vmem>>, vector<1x120xf32>
    %4 = vector.broadcast %3 : vector<1x120xf32> to vector<2x120xf32>
    %5 = arith.addf %2, %4 : vector<2x120xf32>
    %cst_5 = arith.constant 0.000000e+00 : f32
    %6 = vector.broadcast %cst_5 : f32 to vector<2x120xf32>
    %7 = arith.maximumf %5, %6 : vector<2x120xf32>
    %c0_6 = arith.constant 0 : index
    %c0_7 = arith.constant 0 : index
    %8 = vector.load %arg3[%c0_6, %c0_7] : memref<120x84xf32, #tpu.memory_space<vmem>>, vector<120x84xf32>
    %cst_8 = arith.constant dense<0.000000e+00> : vector<2x84xf32>
    %9 = tpu.matmul %7, %8, %cst_8 {dimension_numbers = #tpu.dot_dimension_numbers<[1], [0], [0], [1], [0, 0, 1, 1], [], []>} : vector<2x120xf32>, vector<120x84xf32>, vector<2x84xf32> -> vector<2x84xf32>
    %c0_9 = arith.constant 0 : index
    %c0_10 = arith.constant 0 : index
    %10 = vector.load %arg4[%c0_9, %c0_10] : memref<1x84xf32, #tpu.memory_space<vmem>>, vector<1x84xf32>
    %11 = vector.broadcast %10 : vector<1x84xf32> to vector<2x84xf32>
    %12 = arith.addf %9, %11 : vector<2x84xf32>
    %cst_11 = arith.constant 0.000000e+00 : f32
    %13 = vector.broadcast %cst_11 : f32 to vector<2x84xf32>
    %14 = arith.maximumf %12, %13 : vector<2x84xf32>
    %c0_12 = arith.constant 0 : index
    %c0_13 = arith.constant 0 : index
    %15 = vector.load %arg5[%c0_12, %c0_13] : memref<84x10xf32, #tpu.memory_space<vmem>>, vector<84x10xf32>
    %cst_14 = arith.constant dense<0.000000e+00> : vector<2x10xf32>
    %16 = tpu.matmul %14, %15, %cst_14 {dimension_numbers = #tpu.dot_dimension_numbers<[1], [0], [0], [1], [0, 0, 1, 1], [], []>} : vector<2x84xf32>, vector<84x10xf32>, vector<2x10xf32> -> vector<2x10xf32>
    %c0_15 = arith.constant 0 : index
    %c0_16 = arith.constant 0 : index
    %17 = vector.load %arg6[%c0_15, %c0_16] : memref<1x10xf32, #tpu.memory_space<vmem>>, vector<1x10xf32>
    %18 = vector.broadcast %17 : vector<1x10xf32> to vector<2x10xf32>
    %19 = arith.addf %16, %18 : vector<2x10xf32>
    %c0_17 = arith.constant 0 : index
    %c0_18 = arith.constant 0 : index
    %20 = vector.load %arg7[%c0_17, %c0_18] : memref<2x10xf32, #tpu.memory_space<vmem>>, vector<2x10xf32>
    tpu.vector_store %arg7[%c0_17, %c0_18], %19 {strides = array<i32>} : memref<2x10xf32, #tpu.memory_space<vmem>>, vector<2x10xf32>,
    return
  }
}

</mosaic_0001>

<bundles_post_ra>
// kernel: mynet_forward.3
= control target key start
LH: loop header
LB: loop body
LE: loop exit
PB: predicated region body
PF: predicated region fallthrough
CT: control target
= control target key end

     0   :  { %v3782_v0 = vmov 0.0|0.0   ;;  %vm3783_vm0 = vmmov 0   ;;  %v3784_v6 = vmov 0.0   ;;  %vm228_vm1 = vcmask 1042432   ;;  %s5598_s1 = inlined_call_operand.vmem [shape: f32[75,6], index: 1, kind: input, shape index: {}]   ;;  %s5599_s0 = inlined_call_operand.vmem [shape: f32[4,392,75], index: 0, kind: input, shape index: {}]   ;;  %s5600_s2 = inlined_call_operand.vmem [shape: f32[1,6], index: 2, kind: input, shape index: {}]   ;;  %s5601_s3 = inlined_call_operand.vmem [shape: f32[392,6], index: 3, kind: output, shape index: {}]  }
   0x1   :  { %3712 = vmatprep.subr.bf16.mxu0 %v3782_v0  ;;  %3728 = vmatprep.subr.bf16.mxu1 %v3782_v0  ;;  %v14_v1 = vld [vmem:[%s5598_s1] sm:$0xff]  ;;  %v15_v2 = vld [vmem:[%s5598_s1 + $0x8] sm:$0xff]  ;;  %v16_v3 = vld [vmem:[%s5598_s1 + $0x10] sm:$0xff]  ;;  %vm3785_vm2 = vmmov 1   ;;  %vm80_vm4 = vcmask 613376   ;;  %vm2406_vm5 = vcmask 48128  }
   0x2   :  { %v3713_v4 = vpack.c.bf16 %v15_v2, %v14_v1  ;;  %v17_v5 = vld [vmem:[%s5598_s1 + $0x18] sm:$0xff]  ;;  %3064 = vmatprep.mubr.msk.f32.mxu0 %vm3783_vm0, %v3784_v6  ;;  %3231 = vmatprep.mubr.msk.f32.mxu1 %vm3783_vm0, %v3784_v6  ;;  %v18_v8 = vld [vmem:[%s5598_s1 + $0x20] sm:$0xff]  ;;  %v19_v9 = vld [vmem:[%s5598_s1 + $0x28] sm:$0xff] }
   0x3   :  { %v3716_v7 = vpack.c.bf16 %v17_v5, %v16_v3  ;;  %v3719_v10 = vpack.c.bf16 %v19_v9, %v18_v8  ;;  %v20_v11 = vld [vmem:[%s5598_s1 + $0x30] sm:$0xff]  ;;  %v21_v12 = vld [vmem:[%s5598_s1 + $0x38] sm:$0xff]  ;;  %v22_v14 = vld [vmem:[%s5598_s1 + $0x40] sm:$0xff] }
   0x4   :  { %3714 = vmatpush3.bf16.msra.mxu0 %v3713_v4  ;;  %3730 = vmatpush3.bf16.msra.mxu1 %v3713_v4  ;;  %v3722_v13 = vpack.c.bf16 %v21_v12, %v20_v11  ;;  %v23_v15 = vld [vmem:[%s5598_s1 + $0x48] sm:$0x7]  ;;  %vm3850_vm3 = vmpackc.low %vm228_vm1, %vm3785_vm2  ;;  %v25_v18 = vld [vmem:[%s5599_s0] sm:$0xff] }
   0x5   :  { %3715 = vmatprep.subr.bf16.mxu0 %v3782_v0  ;;  %3731 = vmatprep.subr.bf16.mxu1 %v3782_v0  ;;  %v3725_v16 = vpack.c.bf16 %v23_v15, %v22_v14  ;;  %v2511_v19 = vld [vmem:[%s5599_s0 + $0x188] sm:$0xff]  ;;  %v2512_v21 = vld [vmem:[%s5599_s0 + $0x190] sm:$0xff]  ;;  %v2513_v23 = vld [vmem:[%s5599_s0 + $0x198] sm:$0xff] }
   0x6   :  { %v26_v20 = vld [vmem:[%s5599_s0 + $0x8] sm:$0xff]  ;;  %v27_v22 = vld [vmem:[%s5599_s0 + $0x10] sm:$0xff]  ;;  %v28_v24 = vld [vmem:[%s5599_s0 + $0x18] sm:$0xff] }
   0x7   :  { %v2514_v25 = vld [vmem:[%s5599_s0 + $0x1a0] sm:$0xff]  ;;  %v2515_v27 = vld [vmem:[%s5599_s0 + $0x1a8] sm:$0xff]  ;;  %v2516_v29 = vld [vmem:[%s5599_s0 + $0x1b0] sm:$0xff] }
   0x8   :  { %3717 = vmatpush3.bf16.msra.mxu0 %v3716_v7  ;;  %3733 = vmatpush3.bf16.msra.mxu1 %v3716_v7  ;;  %v29_v26 = vld [vmem:[%s5599_s0 + $0x20] sm:$0xff]  ;;  %v30_v28 = vld [vmem:[%s5599_s0 + $0x28] sm:$0xff]  ;;  %v31_v30 = vld [vmem:[%s5599_s0 + $0x30] sm:$0xff] }
   0x9   :  { %3718 = vmatprep.subr.bf16.mxu0 %v3782_v0  ;;  %3734 = vmatprep.subr.bf16.mxu1 %v3782_v0  ;;  %v2517_v31 = vld [vmem:[%s5599_s0 + $0x1b8] sm:$0xff]  ;;  %v2518_v33 = vld [vmem:[%s5599_s0 + $0x1c0] sm:$0xff]  ;;  %v2519_v35 = vld [vmem:[%s5599_s0 + $0x1c8] sm:$0xff] }
   0xa   :  { %v32_v32 = vld [vmem:[%s5599_s0 + $0x38] sm:$0xff]  ;;  %v33_v34 = vld [vmem:[%s5599_s0 + $0x40] sm:$0xff]  ;;  %v34_v36 = vld [vmem:[%s5599_s0 + $0x48] sm:$0xff] }
   0xb   :  { %v2520_v37 = vld [vmem:[%s5599_s0 + $0x1d0] sm:$0xff]  ;;  %v2521_v39 = vld [vmem:[%s5599_s0 + $0x1d8] sm:$0xff]  ;;  %v2522_v41 = vld [vmem:[%s5599_s0 + $0x1e0] sm:$0xff] }
   0xc   :  { %3720 = vmatpush3.bf16.msra.mxu0 %v3719_v10  ;;  %3736 = vmatpush3.bf16.msra.mxu1 %v3719_v10  ;;  %v35_v38 = vld [vmem:[%s5599_s0 + $0x50] sm:$0xff]  ;;  %v36_v40 = vld [vmem:[%s5599_s0 + $0x58] sm:$0xff]  ;;  %v37_v42 = vld [vmem:[%s5599_s0 + $0x60] sm:$0xff] }
   0xd   :  { %3721 = vmatprep.subr.bf16.mxu0 %v3782_v0  ;;  %3737 = vmatprep.subr.bf16.mxu1 %v3782_v0  ;;  %v2523_v43 = vld [vmem:[%s5599_s0 + $0x1e8] sm:$0xff]  ;;  %v2524_v45 = vld [vmem:[%s5599_s0 + $0x1f0] sm:$0xff]  ;;  %v2525_v47 = vld [vmem:[%s5599_s0 + $0x1f8] sm:$0xff] }
   0xe   :  { %v38_v44 = vld [vmem:[%s5599_s0 + $0x68] sm:$0xff]  ;;  %v39_v46 = vld [vmem:[%s5599_s0 + $0x70] sm:$0xff]  ;;  %v40_v48 = vld [vmem:[%s5599_s0 + $0x78] sm:$0xff] }
   0xf   :  { %v2526_v49 = vld [vmem:[%s5599_s0 + $0x200] sm:$0xff]  ;;  %v2527_v51 = vld [vmem:[%s5599_s0 + $0x208] sm:$0xff]  ;;  %v2528_v53 = vld [vmem:[%s5599_s0 + $0x210] sm:$0xff] }
  0x10   :  { %3723 = vmatpush3.bf16.msra.mxu0 %v3722_v13  ;;  %3739 = vmatpush3.bf16.msra.mxu1 %v3722_v13  ;;  %v41_v50 = vld [vmem:[%s5599_s0 + $0x80] sm:$0xff]  ;;  %v42_v52 = vld [vmem:[%s5599_s0 + $0x88] sm:$0xff]  ;;  %v43_v54 = vld [vmem:[%s5599_s0 + $0x90] sm:$0xff] }
  0x11   :  { %3724 = vmatprep.subr.bf16.mxu0 %v3782_v0  ;;  %3740 = vmatprep.subr.bf16.mxu1 %v3782_v0  ;;  %v2529_v55 = vld [vmem:[%s5599_s0 + $0x218] sm:$0xff]  ;;  %v2530_v57 = vld [vmem:[%s5599_s0 + $0x220] sm:$0xff]  ;;  %v2531_v59 = vld [vmem:[%s5599_s0 + $0x228] sm:$0xff] }
  0x12   :  { %v44_v56 = vld [vmem:[%s5599_s0 + $0x98] sm:$0xff]  ;;  %v45_v58 = vld [vmem:[%s5599_s0 + $0xa0] sm:$0xff]  ;;  %v46_v60 = vld [vmem:[%s5599_s0 + $0xa8] sm:$0xff] }
  0x13   :  { %v2532_v61 = vld [vmem:[%s5599_s0 + $0x230] sm:$0xff]  ;;  %v2533_v63 = vld [vmem:[%s5599_s0 + $0x238] sm:$0xff]  ;;  %v2534_v1 = vld [vmem:[%s5599_s0 + $0x240] sm:$0xff] }
  0x14   :  { %3727 = vmatpush3.bf16.msk.msra.mxu0 %vm3850_vm3, %v3725_v16  ;;  %3743 = vmatpush3.bf16.msk.msra.mxu1 %vm3850_vm3, %v3725_v16  ;;  %v47_v62 = vld [vmem:[%s5599_s0 + $0xb0] sm:$0xff]  ;;  %v49_v2 = vld [vmem:[%s5599_s0 + $0xc0] sm:$0xff]  ;;  %v2535_v3 = vld [vmem:[%s5599_s0 + $0x248] sm:$0xff] }
  0x15   :  { %3744 = vmatprep.subr.bf16.mxu0 %v3782_v0  ;;  %3760 = vmatprep.subr.bf16.mxu1 %v3782_v0  ;;  %v2536_v5 = vld [vmem:[%s5599_s0 + $0x250] sm:$0xff]  ;;  %v2537_v8 = vld [vmem:[%s5599_s0 + $0x258] sm:$0xff]  ;;  %v53_v11 = vld [vmem:[%s5599_s0 + $0xe0] sm:$0xff] }
  0x16   :  { %v52_v9 = vld [vmem:[%s5599_s0 + $0xd8] sm:$0xff]  ;;  %v2539_v12 = vld [vmem:[%s5599_s0 + $0x268] sm:$0xff]  ;;  %v2540_v14 = vld [vmem:[%s5599_s0 + $0x270] sm:$0xff] }
  0x17   :  { %3065 = vmatmul.mubr.msk.f32.vlgmr.msra.gmra.mrb[0].mxu0 %vm80_vm4, %v25_v18  ;;  %3232 = vmatmul.mubr.msk.f32.vlgmr.msra.gmra.mrb[0].mxu1 %vm80_vm4, %v2511_v19  ;;  %v55_v15 = vld [vmem:[%s5599_s0 + $0xf0] sm:$0xff]  ;;  %v56_v17 = vld [vmem:[%s5599_s0 + $0xf8] sm:$0xff]  ;;  %v2542_v18 = vld [vmem:[%s5599_s0 + $0x280] sm:$0xff] }
  0x18   :  { %3746 = vmatpush3.bf16.msra.mxu0 %v3713_v4  ;;  %3762 = vmatpush3.bf16.msra.mxu1 %v3713_v4  ;;  %v50_v4 = vld [vmem:[%s5599_s0 + $0xc8] sm:$0xff]  ;;  %v57_v19 = vld [vmem:[%s5599_s0 + $0x100] sm:$0xff] }
  0x19   :  { %3067 = vmatprep.mubr.msk.f32.mxu0 %vm3783_vm0, %v3784_v6  ;;  %3234 = vmatprep.mubr.msk.f32.mxu1 %vm3783_vm0, %v3784_v6 }
  0x1a   :  { %3747 = vmatprep.subr.bf16.mxu0 %v3782_v0  ;;  %3763 = vmatprep.subr.bf16.mxu1 %v3782_v0 }
  0x1b   :  { %3068 = vmatmul.mubr.msk.f32.gmra.mrb[2].mxu0 %vm80_vm4, %v26_v20  ;;  %3235 = vmatmul.mubr.msk.f32.gmra.mrb[2].mxu1 %vm80_vm4, %v2512_v21  ;;  %v2543_v20 = vld [vmem:[%s5599_s0 + $0x288] sm:$0xff] }
  0x1c   :  { %3070 = vmatprep.mubr.msk.f32.mxu0 %vm3783_vm0, %v3784_v6  ;;  %3237 = vmatprep.mubr.msk.f32.mxu1 %vm3783_vm0, %v3784_v6  ;;  %v58_v21 = vld [vmem:[%s5599_s0 + $0x108] sm:$0xff] }
  0x1d   :  { %3749 = vmatpush3.bf16.msra.mxu0 %v3716_v7  ;;  %3765 = vmatpush3.bf16.msra.mxu1 %v3716_v7  ;;  %v51_v7 = vld [vmem:[%s5599_s0 + $0xd0] sm:$0xff] }
  0x1e   :  { %3750 = vmatprep.subr.bf16.mxu0 %v3782_v0  ;;  %3766 = vmatprep.subr.bf16.mxu1 %v3782_v0 }
  0x1f   :  { %3071 = vmatmul.mubr.msk.f32.gmra.mrb[4].mxu0 %vm80_vm4, %v27_v22  ;;  %3238 = vmatmul.mubr.msk.f32.gmra.mrb[4].mxu1 %vm80_vm4, %v2513_v23  ;;  %v2544_v22 = vld [vmem:[%s5599_s0 + $0x290] sm:$0xff] }
  0x20   :  { %3073 = vmatprep.mubr.msk.f32.mxu0 %vm3783_vm0, %v3784_v6  ;;  %3240 = vmatprep.mubr.msk.f32.mxu1 %vm3783_vm0, %v3784_v6  ;;  %v59_v23 = vld [vmem:[%s5599_s0 + $0x110] sm:$0xff] }
  0x21   :  { %3752 = vmatpush3.bf16.msra.mxu0 %v3719_v10  ;;  %3768 = vmatpush3.bf16.msra.mxu1 %v3719_v10  ;;  %v2538_v10 = vld [vmem:[%s5599_s0 + $0x260] sm:$0xff] }
  0x22   :  { %3753 = vmatprep.subr.bf16.mxu0 %v3782_v0  ;;  %3769 = vmatprep.subr.bf16.mxu1 %v3782_v0 }
  0x23   :  { %3074 = vmatmul.mubr.msk.f32.gmra.mrb[6].mxu0 %vm80_vm4, %v28_v24  ;;  %3241 = vmatmul.mubr.msk.f32.gmra.mrb[6].mxu1 %vm80_vm4, %v2514_v25  ;;  %v2545_v24 = vld [vmem:[%s5599_s0 + $0x298] sm:$0xff] }
  0x24   :  { %3076 = vmatprep.mubr.msk.f32.mxu0 %vm3783_vm0, %v3784_v6  ;;  %3243 = vmatprep.mubr.msk.f32.mxu1 %vm3783_vm0, %v3784_v6  ;;  %v60_v25 = vld [vmem:[%s5599_s0 + $0x118] sm:$0xff] }
  0x25   :  { %3755 = vmatpush3.bf16.msra.mxu0 %v3722_v13  ;;  %3771 = vmatpush3.bf16.msra.mxu1 %v3722_v13  ;;  %v54_v13 = vld [vmem:[%s5599_s0 + $0xe8] sm:$0xff] }
  0x26   :  { %3756 = vmatprep.subr.bf16.mxu0 %v3782_v0  ;;  %3772 = vmatprep.subr.bf16.mxu1 %v3782_v0  ;;  %v48_v0 = vld [vmem:[%s5599_s0 + $0xb8] sm:$0xff] }
  0x27   :  { %3077 = vmatmul.mubr.msk.f32.gmra.mrb[8].mxu0 %vm80_vm4, %v29_v26  ;;  %3244 = vmatmul.mubr.msk.f32.gmra.mrb[8].mxu1 %vm80_vm4, %v2515_v27  ;;  %v2546_v26 = vld [vmem:[%s5599_s0 + $0x2a0] sm:$0xff] }
  0x28   :  { %3079 = vmatprep.mubr.msk.f32.mxu0 %vm3783_vm0, %v3784_v6  ;;  %3246 = vmatprep.mubr.msk.f32.mxu1 %vm3783_vm0, %v3784_v6  ;;  %v61_v27 = vld [vmem:[%s5599_s0 + $0x120] sm:$0xff] }
  0x29   :  { %3759 = vmatpush3.bf16.msk.msra.mxu0 %vm3850_vm3, %v3725_v16  ;;  %3775 = vmatpush3.bf16.msk.msra.mxu1 %vm3850_vm3, %v3725_v16  ;;  %v2541_v16 = vld [vmem:[%s5599_s0 + $0x278] sm:$0xff] }
  0x2b   :  { %3080 = vmatmul.mubr.msk.f32.gmra.mrb[10].mxu0 %vm80_vm4, %v30_v28  ;;  %3247 = vmatmul.mubr.msk.f32.gmra.mrb[10].mxu1 %vm80_vm4, %v2516_v29  ;;  %v2547_v28 = vld [vmem:[%s5599_s0 + $0x2a8] sm:$0xff] }
  0x2c   :  { %3082 = vmatprep.mubr.msk.f32.mxu0 %vm3783_vm0, %v3784_v6  ;;  %3249 = vmatprep.mubr.msk.f32.mxu1 %vm3783_vm0, %v3784_v6  ;;  %v62_v29 = vld [vmem:[%s5599_s0 + $0x128] sm:$0xff] }
  0x2f   :  { %3083 = vmatmul.mubr.msk.f32.gmra.mrb[12].mxu0 %vm80_vm4, %v31_v30  ;;  %3250 = vmatmul.mubr.msk.f32.gmra.mrb[12].mxu1 %vm80_vm4, %v2517_v31  ;;  %v2548_v30 = vld [vmem:[%s5599_s0 + $0x2b0] sm:$0xff] }
  0x30   :  { %3085 = vmatprep.mubr.msk.f32.mxu0 %vm3783_vm0, %v3784_v6  ;;  %3252 = vmatprep.mubr.msk.f32.mxu1 %vm3783_vm0, %v3784_v6  ;;  %v63_v31 = vld [vmem:[%s5599_s0 + $0x130] sm:$0xff] }
  0x33   :  { %3086 = vmatmul.mubr.msk.f32.gmra.mrb[14].mxu0 %vm80_vm4, %v32_v32  ;;  %3253 = vmatmul.mubr.msk.f32.gmra.mrb[14].mxu1 %vm80_vm4, %v2518_v33  ;;  %v2549_v32 = vld [vmem:[%s5599_s0 + $0x2b8] sm:$0xff] }
  0x34   :  { %3088 = vmatprep.mubr.msk.f32.mxu0 %vm3783_vm0, %v3784_v6  ;;  %3255 = vmatprep.mubr.msk.f32.mxu1 %vm3783_vm0, %v3784_v6  ;;  %v64_v33 = vld [vmem:[%s5599_s0 + $0x138] sm:$0xff] }
  0x37   :  { %3089 = vmatmul.mubr.msk.f32.gmra.mrb[16].mxu0 %vm80_vm4, %v33_v34  ;;  %3256 = vmatmul.mubr.msk.f32.gmra.mrb[16].mxu1 %vm80_vm4, %v2519_v35  ;;  %v2550_v34 = vld [vmem:[%s5599_s0 + $0x2c0] sm:$0xff] }
  0x38   :  { %3091 = vmatprep.mubr.msk.f32.mxu0 %vm3783_vm0, %v3784_v6  ;;  %3258 = vmatprep.mubr.msk.f32.mxu1 %vm3783_vm0, %v3784_v6  ;;  %v65_v35 = vld [vmem:[%s5599_s0 + $0x140] sm:$0xff] }
  0x3b   :  { %3092 = vmatmul.mubr.msk.f32.gmra.mrb[18].mxu0 %vm80_vm4, %v34_v36  ;;  %3259 = vmatmul.mubr.msk.f32.gmra.mrb[18].mxu1 %vm80_vm4, %v2520_v37  ;;  %v2551_v36 = vld [vmem:[%s5599_s0 + $0x2c8] sm:$0xff] }
  0x3c   :  { %3094 = vmatprep.mubr.msk.f32.mxu0 %vm3783_vm0, %v3784_v6  ;;  %3261 = vmatprep.mubr.msk.f32.mxu1 %vm3783_vm0, %v3784_v6  ;;  %v66_v37 = vld [vmem:[%s5599_s0 + $0x148] sm:$0xff] }
  0x3f   :  { %3095 = vmatmul.mubr.msk.f32.gmra.mrb[20].mxu0 %vm80_vm4, %v35_v38  ;;  %3262 = vmatmul.mubr.msk.f32.gmra.mrb[20].mxu1 %vm80_vm4, %v2521_v39  ;;  %v2552_v38 = vld [vmem:[%s5599_s0 + $0x2d0] sm:$0xff] }
  0x40   :  { %3097 = vmatprep.mubr.msk.f32.mxu0 %vm3783_vm0, %v3784_v6  ;;  %3264 = vmatprep.mubr.msk.f32.mxu1 %vm3783_vm0, %v3784_v6  ;;  %v67_v39 = vld [vmem:[%s5599_s0 + $0x150] sm:$0xff] }
  0x43   :  { %3098 = vmatmul.mubr.msk.f32.gmra.mrb[22].mxu0 %vm80_vm4, %v36_v40  ;;  %3265 = vmatmul.mubr.msk.f32.gmra.mrb[22].mxu1 %vm80_vm4, %v2522_v41  ;;  %v2553_v40 = vld [vmem:[%s5599_s0 + $0x2d8] sm:$0xff] }
  0x44   :  { %3100 = vmatprep.mubr.msk.f32.mxu0 %vm3783_vm0, %v3784_v6  ;;  %3267 = vmatprep.mubr.msk.f32.mxu1 %vm3783_vm0, %v3784_v6  ;;  %v68_v41 = vld [vmem:[%s5599_s0 + $0x158] sm:$0xff] }
  0x47   :  { %3101 = vmatmul.mubr.msk.f32.gmra.mrb[24].mxu0 %vm80_vm4, %v37_v42  ;;  %3268 = vmatmul.mubr.msk.f32.gmra.mrb[24].mxu1 %vm80_vm4, %v2523_v43  ;;  %v2554_v42 = vld [vmem:[%s5599_s0 + $0x2e0] sm:$0xff] }
  0x48   :  { %3103 = vmatprep.mubr.msk.f32.mxu0 %vm3783_vm0, %v3784_v6  ;;  %3270 = vmatprep.mubr.msk.f32.mxu1 %vm3783_vm0, %v3784_v6  ;;  %v69_v43 = vld [vmem:[%s5599_s0 + $0x160] sm:$0xff] }
  0x4b   :  { %3104 = vmatmul.mubr.msk.f32.gmra.mrb[26].mxu0 %vm80_vm4, %v38_v44  ;;  %3271 = vmatmul.mubr.msk.f32.gmra.mrb[26].mxu1 %vm80_vm4, %v2524_v45  ;;  %v2555_v44 = vld [vmem:[%s5599_s0 + $0x2e8] sm:$0xff] }
  0x4c   :  { %3106 = vmatprep.mubr.msk.f32.mxu0 %vm3783_vm0, %v3784_v6  ;;  %3273 = vmatprep.mubr.msk.f32.mxu1 %vm3783_vm0, %v3784_v6  ;;  %v70_v45 = vld [vmem:[%s5599_s0 + $0x168] sm:$0xff] }
  0x4f   :  { %3107 = vmatmul.mubr.msk.f32.gmra.mrb[28].mxu0 %vm80_vm4, %v39_v46  ;;  %3274 = vmatmul.mubr.msk.f32.gmra.mrb[28].mxu1 %vm80_vm4, %v2525_v47  ;;  %v2556_v46 = vld [vmem:[%s5599_s0 + $0x2f0] sm:$0xff] }
  0x50   :  { %3109 = vmatprep.mubr.msk.f32.mxu0 %vm3783_vm0, %v3784_v6  ;;  %3276 = vmatprep.mubr.msk.f32.mxu1 %vm3783_vm0, %v3784_v6  ;;  %v71_v47 = vld [vmem:[%s5599_s0 + $0x170] sm:$0xff] }
  0x53   :  { %3110 = vmatmul.mubr.msk.f32.gmra.mrb[30].mxu0 %vm80_vm4, %v40_v48  ;;  %3277 = vmatmul.mubr.msk.f32.gmra.mrb[30].mxu1 %vm80_vm4, %v2526_v49  ;;  %v2557_v48 = vld [vmem:[%s5599_s0 + $0x2f8] sm:$0xff] }
  0x54   :  { %3112 = vmatprep.mubr.msk.f32.mxu0 %vm3783_vm0, %v3784_v6  ;;  %3279 = vmatprep.mubr.msk.f32.mxu1 %vm3783_vm0, %v3784_v6  ;;  %v72_v49 = vld [vmem:[%s5599_s0 + $0x178] sm:$0xff] }
  0x57   :  { %3113 = vmatmul.mubr.msk.f32.gmra.mrb[32].mxu0 %vm80_vm4, %v41_v50  ;;  %3280 = vmatmul.mubr.msk.f32.gmra.mrb[32].mxu1 %vm80_vm4, %v2527_v51  ;;  %v2558_v50 = vld [vmem:[%s5599_s0 + $0x300] sm:$0xff] }
  0x58   :  { %3115 = vmatprep.mubr.msk.f32.mxu0 %vm3783_vm0, %v3784_v6  ;;  %3282 = vmatprep.mubr.msk.f32.mxu1 %vm3783_vm0, %v3784_v6  ;;  %v73_v51 = vld [vmem:[%s5599_s0 + $0x180] sm:$0xff] }
  0x5b   :  { %3116 = vmatmul.mubr.msk.f32.gmra.mrb[34].mxu0 %vm80_vm4, %v42_v52  ;;  %3283 = vmatmul.mubr.msk.f32.gmra.mrb[34].mxu1 %vm80_vm4, %v2528_v53  ;;  %v2559_v52 = vld [vmem:[%s5599_s0 + $0x308] sm:$0xff]  ;;  %v2610_v53 = vld [vmem:[%s5599_s0 + $0x310] sm:$0xff] }
  0x5c   :  { %3118 = vmatprep.mubr.msk.f32.mxu0 %vm3783_vm0, %v3784_v6  ;;  %3285 = vmatprep.mubr.msk.f32.mxu1 %vm3783_vm0, %v3784_v6 }
  0x5f   :  { %3119 = vmatmul.mubr.msk.f32.gmra.mrb[36].mxu0 %vm80_vm4, %v43_v54  ;;  %3286 = vmatmul.mubr.msk.f32.gmra.mrb[36].mxu1 %vm80_vm4, %v2529_v55  ;;  %v2709_v54 = vld [vmem:[%s5599_s0 + $0x498] sm:$0xff] }
  0x60   :  { %3121 = vmatprep.mubr.msk.f32.mxu0 %vm3783_vm0, %v3784_v6  ;;  %3288 = vmatprep.mubr.msk.f32.mxu1 %vm3783_vm0, %v3784_v6  ;;  %v2611_v55 = vld [vmem:[%s5599_s0 + $0x318] sm:$0xff] }
  0x63   :  { %3122 = vmatmul.mubr.msk.f32.gmra.mrb[38].mxu0 %vm80_vm4, %v44_v56  ;;  %3289 = vmatmul.mubr.msk.f32.gmra.mrb[38].mxu1 %vm80_vm4, %v2530_v57  ;;  %v2710_v56 = vld [vmem:[%s5599_s0 + $0x4a0] sm:$0xff] }
  0x64   :  { %3124 = vmatprep.mubr.msk.f32.mxu0 %vm3783_vm0, %v3784_v6  ;;  %3291 = vmatprep.mubr.msk.f32.mxu1 %vm3783_vm0, %v3784_v6  ;;  %v2612_v57 = vld [vmem:[%s5599_s0 + $0x320] sm:$0xff] }
  0x67   :  { %3125 = vmatmul.mubr.msk.f32.gmra.mrb[40].mxu0 %vm80_vm4, %v45_v58  ;;  %3292 = vmatmul.mubr.msk.f32.gmra.mrb[40].mxu1 %vm80_vm4, %v2531_v59  ;;  %v2711_v58 = vld [vmem:[%s5599_s0 + $0x4a8] sm:$0xff] }
  0x68   :  { %3127 = vmatprep.mubr.msk.f32.mxu0 %vm3783_vm0, %v3784_v6  ;;  %3294 = vmatprep.mubr.msk.f32.mxu1 %vm3783_vm0, %v3784_v6  ;;  %v2613_v59 = vld [vmem:[%s5599_s0 + $0x328] sm:$0xff] }
  0x6b   :  { %3128 = vmatmul.mubr.msk.f32.gmra.mrb[42].mxu0 %vm80_vm4, %v46_v60  ;;  %3295 = vmatmul.mubr.msk.f32.gmra.mrb[42].mxu1 %vm80_vm4, %v2532_v61  ;;  %v2712_v60 = vld [vmem:[%s5599_s0 + $0x4b0] sm:$0xff]  ;;  %v4507_v61 = vld [vmem:[%s5600_s2] ss:$0 sm:$0xff] }
  0x6c   :  { %3130 = vmatprep.mubr.msk.f32.mxu0 %vm3783_vm0, %v3784_v6  ;;  %3297 = vmatprep.mubr.msk.f32.mxu1 %vm3783_vm0, %v3784_v6 }
  0x6f   :  { %3131 = vmatmul.mubr.msk.f32.gmra.mrb[44].mxu0 %vm80_vm4, %v47_v62  ;;  %3298 = vmatmul.mubr.msk.f32.gmra.mrb[44].mxu1 %vm80_vm4, %v2533_v63  ;;  %v2614_v62 = vld [vmem:[%s5599_s0 + $0x330] sm:$0xff]  ;;  %v2713_v63 = vld [vmem:[%s5599_s0 + $0x4b8] sm:$0xff] }
  0x70   :  { %3133 = vmatprep.mubr.msk.f32.mxu0 %vm3783_vm0, %v3784_v6  ;;  %3300 = vmatprep.mubr.msk.f32.mxu1 %vm3783_vm0, %v3784_v6 }
  0x73   :  { %3134 = vmatmul.mubr.msk.f32.gmra.mrb[46].mxu0 %vm80_vm4, %v48_v0  ;;  %3301 = vmatmul.mubr.msk.f32.gmra.mrb[46].mxu1 %vm80_vm4, %v2534_v1 }
  0x74   :  { %3136 = vmatprep.mubr.msk.f32.mxu0 %vm3783_vm0, %v3784_v6  ;;  %3303 = vmatprep.mubr.msk.f32.mxu1 %vm3783_vm0, %v3784_v6 }
  0x77   :  { %3137 = vmatmul.mubr.msk.f32.gmra.mrb[48].mxu0 %vm80_vm4, %v49_v2  ;;  %3304 = vmatmul.mubr.msk.f32.gmra.mrb[48].mxu1 %vm80_vm4, %v2535_v3 }
  0x78   :  { %3139 = vmatprep.mubr.msk.f32.mxu0 %vm3783_vm0, %v3784_v6  ;;  %3306 = vmatprep.mubr.msk.f32.mxu1 %vm3783_vm0, %v3784_v6 }
  0x7b   :  { %3140 = vmatmul.mubr.msk.f32.gmra.mrb[50].mxu0 %vm80_vm4, %v50_v4  ;;  %3307 = vmatmul.mubr.msk.f32.gmra.mrb[50].mxu1 %vm80_vm4, %v2536_v5 }
  0x7c   :  { %3142 = vmatprep.mubr.msk.f32.mxu0 %vm3783_vm0, %v3784_v6  ;;  %3309 = vmatprep.mubr.msk.f32.mxu1 %vm3783_vm0, %v3784_v6 }
  0x7f   :  { %3143 = vmatmul.mubr.msk.f32.gmra.mrb[52].mxu0 %vm80_vm4, %v51_v7  ;;  %3310 = vmatmul.mubr.msk.f32.gmra.mrb[52].mxu1 %vm80_vm4, %v2537_v8  ;;  %v2615_v7 = vld [vmem:[%s5599_s0 + $0x338] sm:$0xff]  ;;  %v2714_v8 = vld [vmem:[%s5599_s0 + $0x4c0] sm:$0xff] }
  0x80   :  { %3145 = vmatprep.mubr.msk.f32.mxu0 %vm3783_vm0, %v3784_v6  ;;  %3312 = vmatprep.mubr.msk.f32.mxu1 %vm3783_vm0, %v3784_v6 }
  0x83   :  { %3146 = vmatmul.mubr.msk.f32.gmra.mrb[54].mxu0 %vm80_vm4, %v52_v9  ;;  %3313 = vmatmul.mubr.msk.f32.gmra.mrb[54].mxu1 %vm80_vm4, %v2538_v10 }
  0x84   :  { %3148 = vmatprep.mubr.msk.f32.mxu0 %vm3783_vm0, %v3784_v6  ;;  %3315 = vmatprep.mubr.msk.f32.mxu1 %vm3783_vm0, %v3784_v6 }
  0x87   :  { %3149 = vmatmul.mubr.msk.f32.gmra.mrb[56].mxu0 %vm80_vm4, %v53_v11  ;;  %3316 = vmatmul.mubr.msk.f32.gmra.mrb[56].mxu1 %vm80_vm4, %v2539_v12 }
  0x88   :  { %3151 = vmatprep.mubr.msk.f32.mxu0 %vm3783_vm0, %v3784_v6  ;;  %3318 = vmatprep.mubr.msk.f32.mxu1 %vm3783_vm0, %v3784_v6 }
  0x8b   :  { %3152 = vmatmul.mubr.msk.f32.gmra.mrb[58].mxu0 %vm80_vm4, %v54_v13  ;;  %3319 = vmatmul.mubr.msk.f32.gmra.mrb[58].mxu1 %vm80_vm4, %v2540_v14 }
  0x8c   :  { %3154 = vmatprep.mubr.msk.f32.mxu0 %vm3783_vm0, %v3784_v6  ;;  %3321 = vmatprep.mubr.msk.f32.mxu1 %vm3783_vm0, %v3784_v6 }
  0x8f   :  { %3155 = vmatmul.mubr.msk.f32.gmra.mrb[60].mxu0 %vm80_vm4, %v55_v15  ;;  %3322 = vmatmul.mubr.msk.f32.gmra.mrb[60].mxu1 %vm80_vm4, %v2541_v16 }
  0x90   :  { %3157 = vmatprep.mubr.msk.f32.mxu0 %vm3783_vm0, %v3784_v6  ;;  %3324 = vmatprep.mubr.msk.f32.mxu1 %vm3783_vm0, %v3784_v6 }
  0x93   :  { %3158 = vmatmul.mubr.msk.f32.gmra.mrb[62].mxu0 %vm80_vm4, %v56_v17  ;;  %3325 = vmatmul.mubr.msk.f32.gmra.mrb[62].mxu1 %vm80_vm4, %v2542_v18  ;;  %v2616_v18 = vld [vmem:[%s5599_s0 + $0x340] sm:$0xff] }
  0x94   :  { %3160 = vmatprep.mubr.msk.f32.mxu0 %vm3783_vm0, %v3784_v6  ;;  %3327 = vmatprep.mubr.msk.f32.mxu1 %vm3783_vm0, %v3784_v6 }
  0x97   :  { %3161 = vmatmul.mubr.msk.f32.gmra.mrb[64].mxu0 %vm80_vm4, %v57_v19  ;;  %3328 = vmatmul.mubr.msk.f32.gmra.mrb[64].mxu1 %vm80_vm4, %v2543_v20  ;;  %v2715_v19 = vld [vmem:[%s5599_s0 + $0x4c8] sm:$0xff] }
  0x98   :  { %3163 = vmatprep.mubr.msk.f32.mxu0 %vm3783_vm0, %v3784_v6  ;;  %3330 = vmatprep.mubr.msk.f32.mxu1 %vm3783_vm0, %v3784_v6 }
  0x9b   :  { %3164 = vmatmul.mubr.msk.f32.gmra.mrb[66].mxu0 %vm80_vm4, %v58_v21  ;;  %3331 = vmatmul.mubr.msk.f32.gmra.mrb[66].mxu1 %vm80_vm4, %v2544_v22 }
  0x9c   :  { %3166 = vmatprep.mubr.msk.f32.mxu0 %vm3783_vm0, %v3784_v6  ;;  %3333 = vmatprep.mubr.msk.f32.mxu1 %vm3783_vm0, %v3784_v6 }
  0x9f   :  { %3167 = vmatmul.mubr.msk.f32.gmra.mrb[68].mxu0 %vm80_vm4, %v59_v23  ;;  %3334 = vmatmul.mubr.msk.f32.gmra.mrb[68].mxu1 %vm80_vm4, %v2545_v24 }
  0xa0   :  { %3169 = vmatprep.mubr.msk.f32.mxu0 %vm3783_vm0, %v3784_v6  ;;  %3336 = vmatprep.mubr.msk.f32.mxu1 %vm3783_vm0, %v3784_v6 }
  0xa3   :  { %3170 = vmatmul.mubr.msk.f32.gmra.mrb[70].mxu0 %vm80_vm4, %v60_v25  ;;  %3337 = vmatmul.mubr.msk.f32.gmra.mrb[70].mxu1 %vm80_vm4, %v2546_v26 }
  0xa4   :  { %3172 = vmatprep.mubr.msk.f32.mxu0 %vm3783_vm0, %v3784_v6  ;;  %3339 = vmatprep.mubr.msk.f32.mxu1 %vm3783_vm0, %v3784_v6 }
  0xa7   :  { %3173 = vmatmul.mubr.msk.f32.gmra.mrb[72].mxu0 %vm80_vm4, %v61_v27  ;;  %3340 = vmatmul.mubr.msk.f32.gmra.mrb[72].mxu1 %vm80_vm4, %v2547_v28 }
  0xa8   :  { %3175 = vmatprep.mubr.msk.f32.mxu0 %vm3783_vm0, %v3784_v6  ;;  %3342 = vmatprep.mubr.msk.f32.mxu1 %vm3783_vm0, %v3784_v6 }
  0xab   :  { %3176 = vmatmul.mubr.msk.f32.gmra.mrb[74].mxu0 %vm80_vm4, %v62_v29  ;;  %3343 = vmatmul.mubr.msk.f32.gmra.mrb[74].mxu1 %vm80_vm4, %v2548_v30  ;;  %v2617_v29 = vld [vmem:[%s5599_s0 + $0x348] sm:$0xff]  ;;  %v2716_v30 = vld [vmem:[%s5599_s0 + $0x4d0] sm:$0xff] }
  0xac   :  { %3178 = vmatprep.mubr.msk.f32.mxu0 %vm3783_vm0, %v3784_v6  ;;  %3345 = vmatprep.mubr.msk.f32.mxu1 %vm3783_vm0, %v3784_v6 }
  0xaf   :  { %3179 = vmatmul.mubr.msk.f32.gmra.mrb[76].mxu0 %vm80_vm4, %v63_v31  ;;  %3346 = vmatmul.mubr.msk.f32.gmra.mrb[76].mxu1 %vm80_vm4, %v2549_v32 }
  0xb0   :  { %3181 = vmatprep.mubr.msk.f32.mxu0 %vm3783_vm0, %v3784_v6  ;;  %3348 = vmatprep.mubr.msk.f32.mxu1 %vm3783_vm0, %v3784_v6 }
  0xb3   :  { %3182 = vmatmul.mubr.msk.f32.gmra.mrb[78].mxu0 %vm80_vm4, %v64_v33  ;;  %3349 = vmatmul.mubr.msk.f32.gmra.mrb[78].mxu1 %vm80_vm4, %v2550_v34 }
  0xb4   :  { %3184 = vmatprep.mubr.msk.f32.mxu0 %vm3783_vm0, %v3784_v6  ;;  %3351 = vmatprep.mubr.msk.f32.mxu1 %vm3783_vm0, %v3784_v6 }
  0xb7   :  { %3185 = vmatmul.mubr.msk.f32.gmra.mrb[80].mxu0 %vm80_vm4, %v65_v35  ;;  %3352 = vmatmul.mubr.msk.f32.gmra.mrb[80].mxu1 %vm80_vm4, %v2551_v36 }
  0xb8   :  { %3187 = vmatprep.mubr.msk.f32.mxu0 %vm3783_vm0, %v3784_v6  ;;  %3354 = vmatprep.mubr.msk.f32.mxu1 %vm3783_vm0, %v3784_v6 }
  0xbb   :  { %3188 = vmatmul.mubr.msk.f32.gmra.mrb[82].mxu0 %vm80_vm4, %v66_v37  ;;  %3355 = vmatmul.mubr.msk.f32.gmra.mrb[82].mxu1 %vm80_vm4, %v2552_v38 }
  0xbc   :  { %3190 = vmatprep.mubr.msk.f32.mxu0 %vm3783_vm0, %v3784_v6  ;;  %3357 = vmatprep.mubr.msk.f32.mxu1 %vm3783_vm0, %v3784_v6 }
  0xbf   :  { %3191 = vmatmul.mubr.msk.f32.gmra.mrb[84].mxu0 %vm80_vm4, %v67_v39  ;;  %3358 = vmatmul.mubr.msk.f32.gmra.mrb[84].mxu1 %vm80_vm4, %v2553_v40  ;;  %v2618_v40 = vld [vmem:[%s5599_s0 + $0x350] sm:$0xff] }
  0xc0   :  { %3193 = vmatprep.mubr.msk.f32.mxu0 %vm3783_vm0, %v3784_v6  ;;  %3360 = vmatprep.mubr.msk.f32.mxu1 %vm3783_vm0, %v3784_v6 }
  0xc3   :  { %3194 = vmatmul.mubr.msk.f32.gmra.mrb[86].mxu0 %vm80_vm4, %v68_v41  ;;  %3361 = vmatmul.mubr.msk.f32.gmra.mrb[86].mxu1 %vm80_vm4, %v2554_v42  ;;  %v2717_v41 = vld [vmem:[%s5599_s0 + $0x4d8] sm:$0xff] }
  0xc4   :  { %3196 = vmatprep.mubr.msk.f32.mxu0 %vm3783_vm0, %v3784_v6  ;;  %3363 = vmatprep.mubr.msk.f32.mxu1 %vm3783_vm0, %v3784_v6 }
  0xc7   :  { %3197 = vmatmul.mubr.msk.f32.gmra.mrb[88].mxu0 %vm80_vm4, %v69_v43  ;;  %3364 = vmatmul.mubr.msk.f32.gmra.mrb[88].mxu1 %vm80_vm4, %v2555_v44 }
  0xc8   :  { %3199 = vmatprep.mubr.msk.f32.mxu0 %vm3783_vm0, %v3784_v6  ;;  %3366 = vmatprep.mubr.msk.f32.mxu1 %vm3783_vm0, %v3784_v6 }
  0xcb   :  { %3200 = vmatmul.mubr.msk.f32.gmra.mrb[90].mxu0 %vm80_vm4, %v70_v45  ;;  %3367 = vmatmul.mubr.msk.f32.gmra.mrb[90].mxu1 %vm80_vm4, %v2556_v46 }
  0xcc   :  { %3202 = vmatprep.mubr.msk.f32.mxu0 %vm3783_vm0, %v3784_v6  ;;  %3369 = vmatprep.mubr.msk.f32.mxu1 %vm3783_vm0, %v3784_v6 }
  0xcf   :  { %3203 = vmatmul.mubr.msk.f32.gmra.mrb[92].mxu0 %vm80_vm4, %v71_v47  ;;  %3370 = vmatmul.mubr.msk.f32.gmra.mrb[92].mxu1 %vm80_vm4, %v2557_v48 }
  0xd0   :  { %3205 = vmatprep.mubr.msk.f32.mxu0 %vm3783_vm0, %v3784_v6  ;;  %3372 = vmatprep.mubr.msk.f32.mxu1 %vm3783_vm0, %v3784_v6 }
  0xd3   :  { %3206 = vmatmul.mubr.msk.f32.gmra.mrb[94].mxu0 %vm80_vm4, %v72_v49  ;;  %3373 = vmatmul.mubr.msk.f32.gmra.mrb[94].mxu1 %vm80_vm4, %v2558_v50 }
  0xd4   :  { %3208 = vmatprep.mubr.msk.f32.mxu0 %vm3783_vm0, %v3784_v6  ;;  %3375 = vmatprep.mubr.msk.f32.mxu1 %vm3783_vm0, %v3784_v6 }
  0xd7   :  { %3209 = vmatmul.mubr.msk.f32.gmra.mrb[96].mxu0 %vm80_vm4, %v73_v51  ;;  %3376 = vmatmul.mubr.msk.f32.gmra.mrb[96].mxu1 %vm80_vm4, %v2559_v52  ;;  %v2619_v51 = vld [vmem:[%s5599_s0 + $0x358] sm:$0xff]  ;;  %v2718_v52 = vld [vmem:[%s5599_s0 + $0x4e0] sm:$0xff] }
  0xd8   :  { %3398 = vmatprep.mubr.msk.f32.mxu0 %vm3783_vm0, %v3784_v6  ;;  %3565 = vmatprep.mubr.msk.f32.mxu1 %vm3783_vm0, %v3784_v6 }
  0xdb   :  { %3399 = vmatmul.mubr.msk.f32.vlgmr.msra.gmra.mrb[98].mxu0 %vm80_vm4, %v2610_v53  ;;  %3566 = vmatmul.mubr.msk.f32.vlgmr.msra.gmra.mrb[98].mxu1 %vm80_vm4, %v2709_v54 }
  0xdc   :  { %3401 = vmatprep.mubr.msk.f32.mxu0 %vm3783_vm0, %v3784_v6  ;;  %3568 = vmatprep.mubr.msk.f32.mxu1 %vm3783_vm0, %v3784_v6 }
  0xdf   :  { %3402 = vmatmul.mubr.msk.f32.gmra.mrb[100].mxu0 %vm80_vm4, %v2611_v55  ;;  %3569 = vmatmul.mubr.msk.f32.gmra.mrb[100].mxu1 %vm80_vm4, %v2710_v56 }
  0xe0   :  { %3404 = vmatprep.mubr.msk.f32.mxu0 %vm3783_vm0, %v3784_v6  ;;  %3571 = vmatprep.mubr.msk.f32.mxu1 %vm3783_vm0, %v3784_v6 }
  0xe3   :  { %3405 = vmatmul.mubr.msk.f32.gmra.mrb[102].mxu0 %vm80_vm4, %v2612_v57  ;;  %3572 = vmatmul.mubr.msk.f32.gmra.mrb[102].mxu1 %vm80_vm4, %v2711_v58 }
  0xe4   :  { %3407 = vmatprep.mubr.msk.f32.mxu0 %vm3783_vm0, %v3784_v6  ;;  %3574 = vmatprep.mubr.msk.f32.mxu1 %vm3783_vm0, %v3784_v6 }
  0xe7   :  { %3408 = vmatmul.mubr.msk.f32.gmra.mrb[104].mxu0 %vm80_vm4, %v2613_v59  ;;  %3575 = vmatmul.mubr.msk.f32.gmra.mrb[104].mxu1 %vm80_vm4, %v2712_v60 }
  0xe8   :  { %3410 = vmatprep.mubr.msk.f32.mxu0 %vm3783_vm0, %v3784_v6  ;;  %3577 = vmatprep.mubr.msk.f32.mxu1 %vm3783_vm0, %v3784_v6 }
  0xea   :  { %v298_v0 = vpop.f32.mrb[0].mxu0  ;;  %v854_v1 = vpop.f32.mrb[0].mxu1 }
  0xeb   :  { %v299_v2 = vadd.f32 %v4507_v61, %v298_v0  ;;  %v855_v3 = vadd.f32 %v4507_v61, %v854_v1  ;;  %v3066_v4 = vpop.f32.mrb[1].mxu0  ;;  %v3233_v5 = vpop.f32.mrb[1].mxu1  ;;  %3411 = vmatmul.mubr.msk.f32.gmra.mrb[106].mxu0 %vm80_vm4, %v2614_v62  ;;  %3578 = vmatmul.mubr.msk.f32.gmra.mrb[106].mxu1 %vm80_vm4, %v2713_v63  ;;  %v2620_v63 = vld [vmem:[%s5599_s0 + $0x360] sm:$0xff]  ;;  %v2719_v0 = vld [vmem:[%s5599_s0 + $0x4e8] sm:$0xff] }
  0xec   :  { %3413 = vmatprep.mubr.msk.f32.mxu0 %vm3783_vm0, %v3784_v6  ;;  %3580 = vmatprep.mubr.msk.f32.mxu1 %vm3783_vm0, %v3784_v6 }
  0xed   :  { %v542_v9 = vmax.f32 %v299_v2, 0.0  ;;  %v1098_v10 = vmax.f32 %v855_v3, 0.0 }
  0xee   :  { %v303_v11 = vpop.f32.mrb[2].mxu0  ;;  %v859_v12 = vpop.f32.mrb[2].mxu1 }
  0xef   :  { %v4533_v13 = vmax.f32 %v542_v9, %v1098_v10  ;;  %v304_v14 = vadd.f32 %v4507_v61, %v303_v11  ;;  %v860_v15 = vadd.f32 %v4507_v61, %v859_v12  ;;  %v3069_v16 = vpop.f32.mrb[3].mxu0  ;;  %v3236_v17 = vpop.f32.mrb[3].mxu1  ;;  %3414 = vmatmul.mubr.msk.f32.gmra.mrb[108].mxu0 %vm80_vm4, %v2615_v7  ;;  %3581 = vmatmul.mubr.msk.f32.gmra.mrb[108].mxu1 %vm80_vm4, %v2714_v8  ;;  %v2621_v11 = vld [vmem:[%s5599_s0 + $0x368] sm:$0xff]  ;;  %v2720_v12 = vld [vmem:[%s5599_s0 + $0x4f0] sm:$0xff] }
  0xf0   :  { %3416 = vmatprep.mubr.msk.f32.mxu0 %vm3783_vm0, %v3784_v6  ;;  %3583 = vmatprep.mubr.msk.f32.mxu1 %vm3783_vm0, %v3784_v6 }
  0xf1   :  { %v543_v20 = vmax.f32 %v304_v14, 0.0  ;;  %v1099_v21 = vmax.f32 %v860_v15, 0.0 }
  0xf2   :  { %v308_v22 = vpop.f32.mrb[4].mxu0  ;;  %v864_v23 = vpop.f32.mrb[4].mxu1 }
  0xf3   :  { %v4549_v24 = vmax.f32 %v543_v20, %v1099_v21  ;;  %v309_v25 = vadd.f32 %v4507_v61, %v308_v22  ;;  %v865_v26 = vadd.f32 %v4507_v61, %v864_v23  ;;  %v3072_v27 = vpop.f32.mrb[5].mxu0  ;;  %v3239_v28 = vpop.f32.mrb[5].mxu1  ;;  %3417 = vmatmul.mubr.msk.f32.gmra.mrb[110].mxu0 %vm80_vm4, %v2616_v18  ;;  %3584 = vmatmul.mubr.msk.f32.gmra.mrb[110].mxu1 %vm80_vm4, %v2715_v19  ;;  %v2622_v23 = vld [vmem:[%s5599_s0 + $0x370] sm:$0xff] }
  0xf4   :  { %3419 = vmatprep.mubr.msk.f32.mxu0 %vm3783_vm0, %v3784_v6  ;;  %3586 = vmatprep.mubr.msk.f32.mxu1 %vm3783_vm0, %v3784_v6 }
  0xf5   :  { %v544_v31 = vmax.f32 %v309_v25, 0.0  ;;  %v1100_v32 = vmax.f32 %v865_v26, 0.0  ;;  %v2721_v25 = vld [vmem:[%s5599_s0 + $0x4f8] sm:$0xff] }
  0xf6   :  { %v313_v33 = vpop.f32.mrb[6].mxu0  ;;  %v869_v34 = vpop.f32.mrb[6].mxu1 }
  0xf7   :  { %v4565_v35 = vmax.f32 %v544_v31, %v1100_v32  ;;  %v314_v36 = vadd.f32 %v4507_v61, %v313_v33  ;;  %v870_v37 = vadd.f32 %v4507_v61, %v869_v34  ;;  %v3075_v38 = vpop.f32.mrb[7].mxu0  ;;  %v3242_v39 = vpop.f32.mrb[7].mxu1  ;;  %3420 = vmatmul.mubr.msk.f32.gmra.mrb[112].mxu0 %vm80_vm4, %v2617_v29  ;;  %3587 = vmatmul.mubr.msk.f32.gmra.mrb[112].mxu1 %vm80_vm4, %v2716_v30 }
  0xf8   :  { %3422 = vmatprep.mubr.msk.f32.mxu0 %vm3783_vm0, %v3784_v6  ;;  %3589 = vmatprep.mubr.msk.f32.mxu1 %vm3783_vm0, %v3784_v6 }
  0xf9   :  { %v545_v42 = vmax.f32 %v314_v36, 0.0  ;;  %v1101_v43 = vmax.f32 %v870_v37, 0.0  ;;  %v2623_v36 = vld [vmem:[%s5599_s0 + $0x378] sm:$0xff]  ;;  %v2722_v37 = vld [vmem:[%s5599_s0 + $0x500] sm:$0xff] }
  0xfa   :  { %v318_v44 = vpop.f32.mrb[8].mxu0  ;;  %v874_v45 = vpop.f32.mrb[8].mxu1 }
  0xfb   :  { %v4581_v46 = vmax.f32 %v545_v42, %v1101_v43  ;;  %v319_v47 = vadd.f32 %v4507_v61, %v318_v44  ;;  %v875_v48 = vadd.f32 %v4507_v61, %v874_v45  ;;  %v3078_v49 = vpop.f32.mrb[9].mxu0  ;;  %v3245_v50 = vpop.f32.mrb[9].mxu1  ;;  %3423 = vmatmul.mubr.msk.f32.gmra.mrb[114].mxu0 %vm80_vm4, %v2618_v40  ;;  %3590 = vmatmul.mubr.msk.f32.gmra.mrb[114].mxu1 %vm80_vm4, %v2717_v41 }
  0xfc   :  { %3425 = vmatprep.mubr.msk.f32.mxu0 %vm3783_vm0, %v3784_v6  ;;  %3592 = vmatprep.mubr.msk.f32.mxu1 %vm3783_vm0, %v3784_v6  ;;  %v2723_v49 = vld [vmem:[%s5599_s0 + $0x508] sm:$0xff] }
  0xfd   :  { %v546_v53 = vmax.f32 %v319_v47, 0.0  ;;  %v1102_v54 = vmax.f32 %v875_v48, 0.0  ;;  %v2624_v48 = vld [vmem:[%s5599_s0 + $0x380] sm:$0xff] }
  0xfe   :  { %v323_v55 = vpop.f32.mrb[10].mxu0  ;;  %v879_v56 = vpop.f32.mrb[10].mxu1 }
  0xff   :  { %v4597_v57 = vmax.f32 %v546_v53, %v1102_v54  ;;  %v324_v58 = vadd.f32 %v4507_v61, %v323_v55  ;;  %v880_v59 = vadd.f32 %v4507_v61, %v879_v56  ;;  %v3081_v60 = vpop.f32.mrb[11].mxu0  ;;  %v3248_v62 = vpop.f32.mrb[11].mxu1  ;;  %3426 = vmatmul.mubr.msk.f32.gmra.mrb[116].mxu0 %vm80_vm4, %v2619_v51  ;;  %3593 = vmatmul.mubr.msk.f32.gmra.mrb[116].mxu1 %vm80_vm4, %v2718_v52 }
 0x100   :  { %3428 = vmatprep.mubr.msk.f32.mxu0 %vm3783_vm0, %v3784_v6  ;;  %3595 = vmatprep.mubr.msk.f32.mxu1 %vm3783_vm0, %v3784_v6  ;;  %v2625_v60 = vld [vmem:[%s5599_s0 + $0x388] sm:$0xff]  ;;  %v2724_v62 = vld [vmem:[%s5599_s0 + $0x510] sm:$0xff] }
 0x101   :  { %v547_v1 = vmax.f32 %v324_v58, 0.0  ;;  %v1103_v2 = vmax.f32 %v880_v59, 0.0 }
 0x102   :  { %v328_v3 = vpop.f32.mrb[12].mxu0  ;;  %v884_v4 = vpop.f32.mrb[12].mxu1 }
 0x103   :  { %v4613_v5 = vmax.f32 %v547_v1, %v1103_v2  ;;  %v329_v7 = vadd.f32 %v4507_v61, %v328_v3  ;;  %v885_v8 = vadd.f32 %v4507_v61, %v884_v4  ;;  %v3084_v9 = vpop.f32.mrb[13].mxu0  ;;  %v3251_v10 = vpop.f32.mrb[13].mxu1  ;;  %3429 = vmatmul.mubr.msk.f32.gmra.mrb[118].mxu0 %vm80_vm4, %v2620_v63  ;;  %3596 = vmatmul.mubr.msk.f32.gmra.mrb[118].mxu1 %vm80_vm4, %v2719_v0 }
 0x104   :  { %3431 = vmatprep.mubr.msk.f32.mxu0 %vm3783_vm0, %v3784_v6  ;;  %3598 = vmatprep.mubr.msk.f32.mxu1 %vm3783_vm0, %v3784_v6  ;;  %v2626_v10 = vld [vmem:[%s5599_s0 + $0x390] sm:$0xff] }
 0x105   :  { %v548_v14 = vmax.f32 %v329_v7, 0.0  ;;  %v1104_v15 = vmax.f32 %v885_v8, 0.0 }
 0x106   :  { %v333_v16 = vpop.f32.mrb[14].mxu0  ;;  %v889_v17 = vpop.f32.mrb[14].mxu1 }
 0x107   :  { %v4629_v18 = vmax.f32 %v548_v14, %v1104_v15  ;;  %v334_v19 = vadd.f32 %v4507_v61, %v333_v16  ;;  %v890_v20 = vadd.f32 %v4507_v61, %v889_v17  ;;  %v3087_v21 = vpop.f32.mrb[15].mxu0  ;;  %v3254_v22 = vpop.f32.mrb[15].mxu1  ;;  %3432 = vmatmul.mubr.msk.f32.gmra.mrb[120].mxu0 %vm80_vm4, %v2621_v11  ;;  %3599 = vmatmul.mubr.msk.f32.gmra.mrb[120].mxu1 %vm80_vm4, %v2720_v12  ;;  %v2725_v11 = vld [vmem:[%s5599_s0 + $0x518] sm:$0xff] }
 0x108   :  { %3434 = vmatprep.mubr.msk.f32.mxu0 %vm3783_vm0, %v3784_v6  ;;  %3601 = vmatprep.mubr.msk.f32.mxu1 %vm3783_vm0, %v3784_v6 }
 0x109   :  { %v549_v26 = vmax.f32 %v334_v19, 0.0  ;;  %v1105_v27 = vmax.f32 %v890_v20, 0.0 }
 0x10a   :  { %v338_v28 = vpop.f32.mrb[16].mxu0  ;;  %v894_v29 = vpop.f32.mrb[16].mxu1 }
 0x10b   :  { %v4645_v30 = vmax.f32 %v549_v26, %v1105_v27  ;;  %v339_v31 = vadd.f32 %v4507_v61, %v338_v28  ;;  %v895_v32 = vadd.f32 %v4507_v61, %v894_v29  ;;  %v3090_v33 = vpop.f32.mrb[17].mxu0  ;;  %v3257_v34 = vpop.f32.mrb[17].mxu1  ;;  %3435 = vmatmul.mubr.msk.f32.gmra.mrb[122].mxu0 %vm80_vm4, %v2622_v23  ;;  %3602 = vmatmul.mubr.msk.f32.gmra.mrb[122].mxu1 %vm80_vm4, %v2721_v25  ;;  %v2627_v23 = vld [vmem:[%s5599_s0 + $0x398] sm:$0xff]  ;;  %v2726_v25 = vld [vmem:[%s5599_s0 + $0x520] sm:$0xff] }
 0x10c   :  { %3437 = vmatprep.mubr.msk.f32.mxu0 %vm3783_vm0, %v3784_v6  ;;  %3604 = vmatprep.mubr.msk.f32.mxu1 %vm3783_vm0, %v3784_v6 }
 0x10d   :  { %v550_v38 = vmax.f32 %v339_v31, 0.0  ;;  %v1106_v39 = vmax.f32 %v895_v32, 0.0 }
 0x10e   :  { %v343_v40 = vpop.f32.mrb[18].mxu0  ;;  %v899_v41 = vpop.f32.mrb[18].mxu1 }
 0x10f   :  { %v4661_v42 = vmax.f32 %v550_v38, %v1106_v39  ;;  %v344_v43 = vadd.f32 %v4507_v61, %v343_v40  ;;  %v900_v44 = vadd.f32 %v4507_v61, %v899_v41  ;;  %v3093_v45 = vpop.f32.mrb[19].mxu0  ;;  %v3260_v47 = vpop.f32.mrb[19].mxu1  ;;  %3438 = vmatmul.mubr.msk.f32.gmra.mrb[124].mxu0 %vm80_vm4, %v2623_v36  ;;  %3605 = vmatmul.mubr.msk.f32.gmra.mrb[124].mxu1 %vm80_vm4, %v2722_v37  ;;  %v2628_v37 = vld [vmem:[%s5599_s0 + $0x3a0] sm:$0xff]  ;;  %v2727_v38 = vld [vmem:[%s5599_s0 + $0x528] sm:$0xff] }
 0x110   :  { %3440 = vmatprep.mubr.msk.f32.mxu0 %vm3783_vm0, %v3784_v6  ;;  %3607 = vmatprep.mubr.msk.f32.mxu1 %vm3783_vm0, %v3784_v6 }
 0x111   :  { %v551_v50 = vmax.f32 %v344_v43, 0.0  ;;  %v1107_v51 = vmax.f32 %v900_v44, 0.0 }
 0x112   :  { %v348_v52 = vpop.f32.mrb[20].mxu0  ;;  %v904_v53 = vpop.f32.mrb[20].mxu1 }
 0x113   :  { %v4677_v54 = vmax.f32 %v551_v50, %v1107_v51  ;;  %v349_v55 = vadd.f32 %v4507_v61, %v348_v52  ;;  %v905_v56 = vadd.f32 %v4507_v61, %v904_v53  ;;  %v3096_v58 = vpop.f32.mrb[21].mxu0  ;;  %v3263_v59 = vpop.f32.mrb[21].mxu1  ;;  %3441 = vmatmul.mubr.msk.f32.gmra.mrb[126].mxu0 %vm80_vm4, %v2624_v48  ;;  %3608 = vmatmul.mubr.msk.f32.gmra.mrb[126].mxu1 %vm80_vm4, %v2723_v49  ;;  %v2629_v50 = vld [vmem:[%s5599_s0 + $0x3a8] sm:$0xff]  ;;  %v2728_v51 = vld [vmem:[%s5599_s0 + $0x530] sm:$0xff] }
 0x114   :  { %3443 = vmatprep.mubr.msk.f32.mxu0 %vm3783_vm0, %v3784_v6  ;;  %3610 = vmatprep.mubr.msk.f32.mxu1 %vm3783_vm0, %v3784_v6 }
 0x115   :  { %v552_v63 = vmax.f32 %v349_v55, 0.0  ;;  %v1108_v0 = vmax.f32 %v905_v56, 0.0 }
 0x116   :  { %v353_v1 = vpop.f32.mrb[22].mxu0  ;;  %v909_v2 = vpop.f32.mrb[22].mxu1 }
 0x117   :  { %v4693_v3 = vmax.f32 %v552_v63, %v1108_v0  ;;  %v354_v4 = vadd.f32 %v4507_v61, %v353_v1  ;;  %v910_v7 = vadd.f32 %v4507_v61, %v909_v2  ;;  %v3099_v8 = vpop.f32.mrb[23].mxu0  ;;  %v3266_v9 = vpop.f32.mrb[23].mxu1  ;;  %3444 = vmatmul.mubr.msk.f32.gmra.mrb[128].mxu0 %vm80_vm4, %v2625_v60  ;;  %3611 = vmatmul.mubr.msk.f32.gmra.mrb[128].mxu1 %vm80_vm4, %v2724_v62  ;;  %v2630_v0 = vld [vmem:[%s5599_s0 + $0x3b0] sm:$0xff]  ;;  %v2729_v1 = vld [vmem:[%s5599_s0 + $0x538] sm:$0xff] }
 0x118   :  { %3446 = vmatprep.mubr.msk.f32.mxu0 %vm3783_vm0, %v3784_v6  ;;  %3613 = vmatprep.mubr.msk.f32.mxu1 %vm3783_vm0, %v3784_v6 }
 0x119   :  { %v553_v12 = vmax.f32 %v354_v4, 0.0  ;;  %v1109_v14 = vmax.f32 %v910_v7, 0.0 }
 0x11a   :  { %v358_v15 = vpop.f32.mrb[24].mxu0  ;;  %v914_v16 = vpop.f32.mrb[24].mxu1 }
 0x11b   :  { %v4709_v17 = vmax.f32 %v553_v12, %v1109_v14  ;;  %v359_v19 = vadd.f32 %v4507_v61, %v358_v15  ;;  %v915_v20 = vadd.f32 %v4507_v61, %v914_v16  ;;  %v3102_v21 = vpop.f32.mrb[25].mxu0  ;;  %v3269_v22 = vpop.f32.mrb[25].mxu1  ;;  %3447 = vmatmul.mubr.msk.f32.gmra.mrb[130].mxu0 %vm80_vm4, %v2626_v10  ;;  %3614 = vmatmul.mubr.msk.f32.gmra.mrb[130].mxu1 %vm80_vm4, %v2725_v11  ;;  %v2631_v15 = vld [vmem:[%s5599_s0 + $0x3b8] sm:$0xff]  ;;  %v2730_v16 = vld [vmem:[%s5599_s0 + $0x540] sm:$0xff] }
 0x11c   :  { %3449 = vmatprep.mubr.msk.f32.mxu0 %vm3783_vm0, %v3784_v6  ;;  %3616 = vmatprep.mubr.msk.f32.mxu1 %vm3783_vm0, %v3784_v6 }
 0x11d   :  { %v554_v26 = vmax.f32 %v359_v19, 0.0  ;;  %v1110_v27 = vmax.f32 %v915_v20, 0.0 }
 0x11e   :  { %v363_v28 = vpop.f32.mrb[26].mxu0  ;;  %v919_v29 = vpop.f32.mrb[26].mxu1 }
 0x11f   :  { %v4725_v31 = vmax.f32 %v554_v26, %v1110_v27  ;;  %v364_v32 = vadd.f32 %v4507_v61, %v363_v28  ;;  %v920_v33 = vadd.f32 %v4507_v61, %v919_v29  ;;  %v3105_v34 = vpop.f32.mrb[27].mxu0  ;;  %v3272_v36 = vpop.f32.mrb[27].mxu1  ;;  %3450 = vmatmul.mubr.msk.f32.gmra.mrb[132].mxu0 %vm80_vm4, %v2627_v23  ;;  %3617 = vmatmul.mubr.msk.f32.gmra.mrb[132].mxu1 %vm80_vm4, %v2726_v25  ;;  %v2632_v29 = vld [vmem:[%s5599_s0 + $0x3c0] sm:$0xff] }
 0x120   :  { %3452 = vmatprep.mubr.msk.f32.mxu0 %vm3783_vm0, %v3784_v6  ;;  %3619 = vmatprep.mubr.msk.f32.mxu1 %vm3783_vm0, %v3784_v6 }
 0x121   :  { %v555_v39 = vmax.f32 %v364_v32, 0.0  ;;  %v1111_v40 = vmax.f32 %v920_v33, 0.0  ;;  %v2731_v32 = vld [vmem:[%s5599_s0 + $0x548] sm:$0xff] }
 0x122   :  { %v368_v41 = vpop.f32.mrb[28].mxu0  ;;  %v924_v43 = vpop.f32.mrb[28].mxu1 }
 0x123   :  { %v4741_v44 = vmax.f32 %v555_v39, %v1111_v40  ;;  %v369_v45 = vadd.f32 %v4507_v61, %v368_v41  ;;  %v925_v47 = vadd.f32 %v4507_v61, %v924_v43  ;;  %v3108_v48 = vpop.f32.mrb[29].mxu0  ;;  %v3275_v49 = vpop.f32.mrb[29].mxu1  ;;  %3453 = vmatmul.mubr.msk.f32.gmra.mrb[134].mxu0 %vm80_vm4, %v2628_v37  ;;  %3620 = vmatmul.mubr.msk.f32.gmra.mrb[134].mxu1 %vm80_vm4, %v2727_v38 }
 0x124   :  { %3455 = vmatprep.mubr.msk.f32.mxu0 %vm3783_vm0, %v3784_v6  ;;  %3622 = vmatprep.mubr.msk.f32.mxu1 %vm3783_vm0, %v3784_v6 }
 0x125   :  { %v556_v52 = vmax.f32 %v369_v45, 0.0  ;;  %v1112_v53 = vmax.f32 %v925_v47, 0.0  ;;  %v2633_v45 = vld [vmem:[%s5599_s0 + $0x3c8] sm:$0xff]  ;;  %v2732_v47 = vld [vmem:[%s5599_s0 + $0x550] sm:$0xff] }
 0x126   :  { %v373_v55 = vpop.f32.mrb[30].mxu0  ;;  %v929_v56 = vpop.f32.mrb[30].mxu1 }
 0x127   :  { %v4757_v58 = vmax.f32 %v556_v52, %v1112_v53  ;;  %v374_v59 = vadd.f32 %v4507_v61, %v373_v55  ;;  %v930_v60 = vadd.f32 %v4507_v61, %v929_v56  ;;  %v3111_v62 = vpop.f32.mrb[31].mxu0  ;;  %v3278_v63 = vpop.f32.mrb[31].mxu1  ;;  %3456 = vmatmul.mubr.msk.f32.gmra.mrb[136].mxu0 %vm80_vm4, %v2629_v50  ;;  %3623 = vmatmul.mubr.msk.f32.gmra.mrb[136].mxu1 %vm80_vm4, %v2728_v51 }
 0x128   :  { %3458 = vmatprep.mubr.msk.f32.mxu0 %vm3783_vm0, %v3784_v6  ;;  %3625 = vmatprep.mubr.msk.f32.mxu1 %vm3783_vm0, %v3784_v6  ;;  %v2733_v62 = vld [vmem:[%s5599_s0 + $0x558] sm:$0xff] }
 0x129   :  { %v557_v2 = vmax.f32 %v374_v59, 0.0  ;;  %v1113_v4 = vmax.f32 %v930_v60, 0.0  ;;  %v2634_v60 = vld [vmem:[%s5599_s0 + $0x3d0] sm:$0xff] }
 0x12a   :  { %v378_v7 = vpop.f32.mrb[32].mxu0  ;;  %v934_v8 = vpop.f32.mrb[32].mxu1 }
 0x12b   :  { %v4773_v9 = vmax.f32 %v557_v2, %v1113_v4  ;;  %v379_v10 = vadd.f32 %v4507_v61, %v378_v7  ;;  %v935_v11 = vadd.f32 %v4507_v61, %v934_v8  ;;  %v3114_v12 = vpop.f32.mrb[33].mxu0  ;;  %v3281_v14 = vpop.f32.mrb[33].mxu1  ;;  %3459 = vmatmul.mubr.msk.f32.gmra.mrb[138].mxu0 %vm80_vm4, %v2630_v0  ;;  %3626 = vmatmul.mubr.msk.f32.gmra.mrb[138].mxu1 %vm80_vm4, %v2729_v1 }
 0x12c   :  { %3461 = vmatprep.mubr.msk.f32.mxu0 %vm3783_vm0, %v3784_v6  ;;  %3628 = vmatprep.mubr.msk.f32.mxu1 %vm3783_vm0, %v3784_v6  ;;  %v2635_v12 = vld [vmem:[%s5599_s0 + $0x3d8] sm:$0xff]  ;;  %v2734_v14 = vld [vmem:[%s5599_s0 + $0x560] sm:$0xff] }
 0x12d   :  { %v558_v19 = vmax.f32 %v379_v10, 0.0  ;;  %v1114_v20 = vmax.f32 %v935_v11, 0.0 }
 0x12e   :  { %v383_v21 = vpop.f32.mrb[34].mxu0  ;;  %v939_v22 = vpop.f32.mrb[34].mxu1 }
 0x12f   :  { %v4789_v23 = vmax.f32 %v558_v19, %v1114_v20  ;;  %v384_v25 = vadd.f32 %v4507_v61, %v383_v21  ;;  %v940_v26 = vadd.f32 %v4507_v61, %v939_v22  ;;  %v3117_v27 = vpop.f32.mrb[35].mxu0  ;;  %v3284_v28 = vpop.f32.mrb[35].mxu1  ;;  %3462 = vmatmul.mubr.msk.f32.gmra.mrb[140].mxu0 %vm80_vm4, %v2631_v15  ;;  %3629 = vmatmul.mubr.msk.f32.gmra.mrb[140].mxu1 %vm80_vm4, %v2730_v16 }
 0x130   :  { %3464 = vmatprep.mubr.msk.f32.mxu0 %vm3783_vm0, %v3784_v6  ;;  %3631 = vmatprep.mubr.msk.f32.mxu1 %vm3783_vm0, %v3784_v6  ;;  %v2636_v28 = vld [vmem:[%s5599_s0 + $0x3e0] sm:$0xff] }
 0x131   :  { %v559_v33 = vmax.f32 %v384_v25, 0.0  ;;  %v1115_v34 = vmax.f32 %v940_v26, 0.0 }
 0x132   :  { %v388_v36 = vpop.f32.mrb[36].mxu0  ;;  %v944_v37 = vpop.f32.mrb[36].mxu1 }
 0x133   :  { %v4805_v38 = vmax.f32 %v559_v33, %v1115_v34  ;;  %v389_v39 = vadd.f32 %v4507_v61, %v388_v36  ;;  %v945_v40 = vadd.f32 %v4507_v61, %v944_v37  ;;  %v3120_v41 = vpop.f32.mrb[37].mxu0  ;;  %v3287_v43 = vpop.f32.mrb[37].mxu1  ;;  %3465 = vmatmul.mubr.msk.f32.gmra.mrb[142].mxu0 %vm80_vm4, %v2632_v29  ;;  %3632 = vmatmul.mubr.msk.f32.gmra.mrb[142].mxu1 %vm80_vm4, %v2731_v32  ;;  %v2735_v29 = vld [vmem:[%s5599_s0 + $0x568] sm:$0xff] }
 0x134   :  { %3467 = vmatprep.mubr.msk.f32.mxu0 %vm3783_vm0, %v3784_v6  ;;  %3634 = vmatprep.mubr.msk.f32.mxu1 %vm3783_vm0, %v3784_v6 }
 0x135   :  { %v560_v48 = vmax.f32 %v389_v39, 0.0  ;;  %v1116_v49 = vmax.f32 %v945_v40, 0.0 }
 0x136   :  { %v393_v50 = vpop.f32.mrb[38].mxu0  ;;  %v949_v51 = vpop.f32.mrb[38].mxu1 }
 0x137   :  { %v4821_v52 = vmax.f32 %v560_v48, %v1116_v49  ;;  %v394_v53 = vadd.f32 %v4507_v61, %v393_v50  ;;  %v950_v55 = vadd.f32 %v4507_v61, %v949_v51  ;;  %v3123_v56 = vpop.f32.mrb[39].mxu0  ;;  %v3290_v59 = vpop.f32.mrb[39].mxu1  ;;  %3468 = vmatmul.mubr.msk.f32.gmra.mrb[144].mxu0 %vm80_vm4, %v2633_v45  ;;  %3635 = vmatmul.mubr.msk.f32.gmra.mrb[144].mxu1 %vm80_vm4, %v2732_v47  ;;  %v2637_v45 = vld [vmem:[%s5599_s0 + $0x3e8] sm:$0xff]  ;;  %v2736_v47 = vld [vmem:[%s5599_s0 + $0x570] sm:$0xff] }
 0x138   :  { %3470 = vmatprep.mubr.msk.f32.mxu0 %vm3783_vm0, %v3784_v6  ;;  %3637 = vmatprep.mubr.msk.f32.mxu1 %vm3783_vm0, %v3784_v6 }
 0x139   :  { %v561_v63 = vmax.f32 %v394_v53, 0.0  ;;  %v1117_v0 = vmax.f32 %v950_v55, 0.0 }
 0x13a   :  { %v398_v1 = vpop.f32.mrb[40].mxu0  ;;  %v954_v2 = vpop.f32.mrb[40].mxu1 }
 0x13b   :  { %v4837_v4 = vmax.f32 %v561_v63, %v1117_v0  ;;  %v399_v7 = vadd.f32 %v4507_v61, %v398_v1  ;;  %v955_v8 = vadd.f32 %v4507_v61, %v954_v2  ;;  %v3126_v10 = vpop.f32.mrb[41].mxu0  ;;  %v3293_v11 = vpop.f32.mrb[41].mxu1  ;;  %3471 = vmatmul.mubr.msk.f32.gmra.mrb[146].mxu0 %vm80_vm4, %v2634_v60  ;;  %3638 = vmatmul.mubr.msk.f32.gmra.mrb[146].mxu1 %vm80_vm4, %v2733_v62  ;;  %v2638_v62 = vld [vmem:[%s5599_s0 + $0x3f0] sm:$0xff]  ;;  %v2737_v63 = vld [vmem:[%s5599_s0 + $0x578] sm:$0xff] }
 0x13c   :  { %3473 = vmatprep.mubr.msk.f32.mxu0 %vm3783_vm0, %v3784_v6  ;;  %3640 = vmatprep.mubr.msk.f32.mxu1 %vm3783_vm0, %v3784_v6 }
 0x13d   :  { %v562_v15 = vmax.f32 %v399_v7, 0.0  ;;  %v1118_v16 = vmax.f32 %v955_v8, 0.0 }
 0x13e   :  { %v403_v19 = vpop.f32.mrb[42].mxu0  ;;  %v959_v20 = vpop.f32.mrb[42].mxu1 }
 0x13f   :  { %v4853_v21 = vmax.f32 %v562_v15, %v1118_v16  ;;  %v404_v22 = vadd.f32 %v4507_v61, %v403_v19  ;;  %v960_v25 = vadd.f32 %v4507_v61, %v959_v20  ;;  %v3129_v26 = vpop.f32.mrb[43].mxu0  ;;  %v3296_v27 = vpop.f32.mrb[43].mxu1  ;;  %3474 = vmatmul.mubr.msk.f32.gmra.mrb[148].mxu0 %vm80_vm4, %v2635_v12  ;;  %3641 = vmatmul.mubr.msk.f32.gmra.mrb[148].mxu1 %vm80_vm4, %v2734_v14  ;;  %v2639_v15 = vld [vmem:[%s5599_s0 + $0x3f8] sm:$0xff]  ;;  %v2738_v16 = vld [vmem:[%s5599_s0 + $0x580] sm:$0xff] }
 0x140   :  { %3476 = vmatprep.mubr.msk.f32.mxu0 %vm3783_vm0, %v3784_v6  ;;  %3643 = vmatprep.mubr.msk.f32.mxu1 %vm3783_vm0, %v3784_v6 }
 0x141   :  { %v563_v32 = vmax.f32 %v404_v22, 0.0  ;;  %v1119_v33 = vmax.f32 %v960_v25, 0.0 }
 0x142   :  { %v408_v34 = vpop.f32.mrb[44].mxu0  ;;  %v964_v36 = vpop.f32.mrb[44].mxu1 }
 0x143   :  { %v4869_v37 = vmax.f32 %v563_v32, %v1119_v33  ;;  %v409_v39 = vadd.f32 %v4507_v61, %v408_v34  ;;  %v965_v40 = vadd.f32 %v4507_v61, %v964_v36  ;;  %v3132_v41 = vpop.f32.mrb[45].mxu0  ;;  %v3299_v43 = vpop.f32.mrb[45].mxu1  ;;  %3477 = vmatmul.mubr.msk.f32.gmra.mrb[150].mxu0 %vm80_vm4, %v2636_v28  ;;  %3644 = vmatmul.mubr.msk.f32.gmra.mrb[150].mxu1 %vm80_vm4, %v2735_v29  ;;  %v2640_v33 = vld [vmem:[%s5599_s0 + $0x400] sm:$0xff]  ;;  %v2739_v34 = vld [vmem:[%s5599_s0 + $0x588] sm:$0xff] }
 0x144   :  { %3479 = vmatprep.mubr.msk.f32.mxu0 %vm3783_vm0, %v3784_v6  ;;  %3646 = vmatprep.mubr.msk.f32.mxu1 %vm3783_vm0, %v3784_v6 }
 0x145   :  { %v564_v48 = vmax.f32 %v409_v39, 0.0  ;;  %v1120_v49 = vmax.f32 %v965_v40, 0.0 }
 0x146   :  { %v413_v50 = vpop.f32.mrb[46].mxu0  ;;  %v969_v51 = vpop.f32.mrb[46].mxu1 }
 0x147   :  { %v4885_v53 = vmax.f32 %v564_v48, %v1120_v49  ;;  %v414_v55 = vadd.f32 %v4507_v61, %v413_v50  ;;  %v970_v56 = vadd.f32 %v4507_v61, %v969_v51  ;;  %v3135_v59 = vpop.f32.mrb[47].mxu0  ;;  %v3302_v60 = vpop.f32.mrb[47].mxu1  ;;  %3480 = vmatmul.mubr.msk.f32.gmra.mrb[152].mxu0 %vm80_vm4, %v2637_v45  ;;  %3647 = vmatmul.mubr.msk.f32.gmra.mrb[152].mxu1 %vm80_vm4, %v2736_v47  ;;  %v2641_v50 = vld [vmem:[%s5599_s0 + $0x408] sm:$0xff]  ;;  %v2740_v51 = vld [vmem:[%s5599_s0 + $0x590] sm:$0xff] }
 0x148   :  { %3482 = vmatprep.mubr.msk.f32.mxu0 %vm3783_vm0, %v3784_v6  ;;  %3649 = vmatprep.mubr.msk.f32.mxu1 %vm3783_vm0, %v3784_v6 }
 0x149   :  { %v565_v0 = vmax.f32 %v414_v55, 0.0  ;;  %v1121_v1 = vmax.f32 %v970_v56, 0.0 }
 0x14a   :  { %v418_v2 = vpop.f32.mrb[48].mxu0  ;;  %v974_v7 = vpop.f32.mrb[48].mxu1 }
 0x14b   :  { %v4901_v8 = vmax.f32 %v565_v0, %v1121_v1  ;;  %v419_v10 = vadd.f32 %v4507_v61, %v418_v2  ;;  %v975_v11 = vadd.f32 %v4507_v61, %v974_v7  ;;  %v3138_v12 = vpop.f32.mrb[49].mxu0  ;;  %v3305_v14 = vpop.f32.mrb[49].mxu1  ;;  %3483 = vmatmul.mubr.msk.f32.gmra.mrb[154].mxu0 %vm80_vm4, %v2638_v62  ;;  %3650 = vmatmul.mubr.msk.f32.gmra.mrb[154].mxu1 %vm80_vm4, %v2737_v63  ;;  %v2642_v7 = vld [vmem:[%s5599_s0 + $0x410] sm:$0xff] }
 0x14c   :  { %3485 = vmatprep.mubr.msk.f32.mxu0 %vm3783_vm0, %v3784_v6  ;;  %3652 = vmatprep.mubr.msk.f32.mxu1 %vm3783_vm0, %v3784_v6 }
 0x14d   :  { %v566_v19 = vmax.f32 %v419_v10, 0.0  ;;  %v1122_v20 = vmax.f32 %v975_v11, 0.0  ;;  %v2741_v10 = vld [vmem:[%s5599_s0 + $0x598] sm:$0xff] }
 0x14e   :  { %v423_v22 = vpop.f32.mrb[50].mxu0  ;;  %v979_v25 = vpop.f32.mrb[50].mxu1 }
 0x14f   :  { %v4917_v26 = vmax.f32 %v566_v19, %v1122_v20  ;;  %v424_v27 = vadd.f32 %v4507_v61, %v423_v22  ;;  %v980_v28 = vadd.f32 %v4507_v61, %v979_v25  ;;  %v3141_v29 = vpop.f32.mrb[51].mxu0  ;;  %v3308_v32 = vpop.f32.mrb[51].mxu1  ;;  %3486 = vmatmul.mubr.msk.f32.gmra.mrb[156].mxu0 %vm80_vm4, %v2639_v15  ;;  %3653 = vmatmul.mubr.msk.f32.gmra.mrb[156].mxu1 %vm80_vm4, %v2738_v16 }
 0x150   :  { %3488 = vmatprep.mubr.msk.f32.mxu0 %vm3783_vm0, %v3784_v6  ;;  %3655 = vmatprep.mubr.msk.f32.mxu1 %vm3783_vm0, %v3784_v6 }
 0x151   :  { %v567_v36 = vmax.f32 %v424_v27, 0.0  ;;  %v1123_v39 = vmax.f32 %v980_v28, 0.0  ;;  %v2643_v27 = vld [vmem:[%s5599_s0 + $0x418] sm:$0xff]  ;;  %v2742_v28 = vld [vmem:[%s5599_s0 + $0x5a0] sm:$0xff] }
 0x152   :  { %v428_v40 = vpop.f32.mrb[52].mxu0  ;;  %v984_v41 = vpop.f32.mrb[52].mxu1 }
 0x153   :  { %v4933_v43 = vmax.f32 %v567_v36, %v1123_v39  ;;  %v429_v45 = vadd.f32 %v4507_v61, %v428_v40  ;;  %v985_v47 = vadd.f32 %v4507_v61, %v984_v41  ;;  %v3144_v48 = vpop.f32.mrb[53].mxu0  ;;  %v3311_v49 = vpop.f32.mrb[53].mxu1  ;;  %3489 = vmatmul.mubr.msk.f32.gmra.mrb[158].mxu0 %vm80_vm4, %v2640_v33  ;;  %3656 = vmatmul.mubr.msk.f32.gmra.mrb[158].mxu1 %vm80_vm4, %v2739_v34 }
 0x154   :  { %3491 = vmatprep.mubr.msk.f32.mxu0 %vm3783_vm0, %v3784_v6  ;;  %3658 = vmatprep.mubr.msk.f32.mxu1 %vm3783_vm0, %v3784_v6  ;;  %v2743_v48 = vld [vmem:[%s5599_s0 + $0x5a8] sm:$0xff] }
 0x155   :  { %v568_v55 = vmax.f32 %v429_v45, 0.0  ;;  %v1124_v56 = vmax.f32 %v985_v47, 0.0  ;;  %v2644_v47 = vld [vmem:[%s5599_s0 + $0x420] sm:$0xff] }
 0x156   :  { %v433_v59 = vpop.f32.mrb[54].mxu0  ;;  %v989_v60 = vpop.f32.mrb[54].mxu1 }
 0x157   :  { %v4949_v62 = vmax.f32 %v568_v55, %v1124_v56  ;;  %v434_v63 = vadd.f32 %v4507_v61, %v433_v59  ;;  %v990_v0 = vadd.f32 %v4507_v61, %v989_v60  ;;  %v3147_v1 = vpop.f32.mrb[55].mxu0  ;;  %v3314_v2 = vpop.f32.mrb[55].mxu1  ;;  %3492 = vmatmul.mubr.msk.f32.gmra.mrb[160].mxu0 %vm80_vm4, %v2641_v50  ;;  %3659 = vmatmul.mubr.msk.f32.gmra.mrb[160].mxu1 %vm80_vm4, %v2740_v51 }
 0x158   :  { %3494 = vmatprep.mubr.msk.f32.mxu0 %vm3783_vm0, %v3784_v6  ;;  %3661 = vmatprep.mubr.msk.f32.mxu1 %vm3783_vm0, %v3784_v6  ;;  %v2645_v1 = vld [vmem:[%s5599_s0 + $0x428] sm:$0xff]  ;;  %v2744_v2 = vld [vmem:[%s5599_s0 + $0x5b0] sm:$0xff] }
 0x159   :  { %v569_v11 = vmax.f32 %v434_v63, 0.0  ;;  %v1125_v12 = vmax.f32 %v990_v0, 0.0 }
 0x15a   :  { %v438_v14 = vpop.f32.mrb[56].mxu0  ;;  %v994_v15 = vpop.f32.mrb[56].mxu1 }
 0x15b   :  { %v4965_v16 = vmax.f32 %v569_v11, %v1125_v12  ;;  %v439_v19 = vadd.f32 %v4507_v61, %v438_v14  ;;  %v995_v20 = vadd.f32 %v4507_v61, %v994_v15  ;;  %v3150_v22 = vpop.f32.mrb[57].mxu0  ;;  %v3317_v25 = vpop.f32.mrb[57].mxu1  ;;  %3495 = vmatmul.mubr.msk.f32.gmra.mrb[162].mxu0 %vm80_vm4, %v2642_v7  ;;  %3662 = vmatmul.mubr.msk.f32.gmra.mrb[162].mxu1 %vm80_vm4, %v2741_v10 }
 0x15c   :  { %3497 = vmatprep.mubr.msk.f32.mxu0 %vm3783_vm0, %v3784_v6  ;;  %3664 = vmatprep.mubr.msk.f32.mxu1 %vm3783_vm0, %v3784_v6  ;;  %v2646_v25 = vld [vmem:[%s5599_s0 + $0x430] sm:$0xff] }
 0x15d   :  { %v570_v29 = vmax.f32 %v439_v19, 0.0  ;;  %v1126_v32 = vmax.f32 %v995_v20, 0.0 }
 0x15e   :  { %v443_v33 = vpop.f32.mrb[58].mxu0  ;;  %v999_v34 = vpop.f32.mrb[58].mxu1 }
 0x15f   :  { %v4981_v36 = vmax.f32 %v570_v29, %v1126_v32  ;;  %v444_v39 = vadd.f32 %v4507_v61, %v443_v33  ;;  %v1000_v40 = vadd.f32 %v4507_v61, %v999_v34  ;;  %v3153_v41 = vpop.f32.mrb[59].mxu0  ;;  %v3320_v45 = vpop.f32.mrb[59].mxu1  ;;  %3498 = vmatmul.mubr.msk.f32.gmra.mrb[164].mxu0 %vm80_vm4, %v2643_v27  ;;  %3665 = vmatmul.mubr.msk.f32.gmra.mrb[164].mxu1 %vm80_vm4, %v2742_v28  ;;  %v2745_v27 = vld [vmem:[%s5599_s0 + $0x5b8] sm:$0xff] }
 0x160   :  { %3500 = vmatprep.mubr.msk.f32.mxu0 %vm3783_vm0, %v3784_v6  ;;  %3667 = vmatprep.mubr.msk.f32.mxu1 %vm3783_vm0, %v3784_v6 }
 0x161   :  { %v571_v49 = vmax.f32 %v444_v39, 0.0  ;;  %v1127_v50 = vmax.f32 %v1000_v40, 0.0 }
 0x162   :  { %v448_v51 = vpop.f32.mrb[60].mxu0  ;;  %v1004_v55 = vpop.f32.mrb[60].mxu1 }
 0x163   :  { %v4997_v56 = vmax.f32 %v571_v49, %v1127_v50  ;;  %v449_v59 = vadd.f32 %v4507_v61, %v448_v51  ;;  %v1005_v60 = vadd.f32 %v4507_v61, %v1004_v55  ;;  %v3156_v63 = vpop.f32.mrb[61].mxu0  ;;  %v3323_v0 = vpop.f32.mrb[61].mxu1  ;;  %3501 = vmatmul.mubr.msk.f32.gmra.mrb[166].mxu0 %vm80_vm4, %v2644_v47  ;;  %3668 = vmatmul.mubr.msk.f32.gmra.mrb[166].mxu1 %vm80_vm4, %v2743_v48  ;;  %v2647_v47 = vld [vmem:[%s5599_s0 + $0x438] sm:$0xff]  ;;  %v2746_v48 = vld [vmem:[%s5599_s0 + $0x5c0] sm:$0xff] }
 0x164   :  { %3503 = vmatprep.mubr.msk.f32.mxu0 %vm3783_vm0, %v3784_v6  ;;  %3670 = vmatprep.mubr.msk.f32.mxu1 %vm3783_vm0, %v3784_v6 }
 0x165   :  { %v572_v7 = vmax.f32 %v449_v59, 0.0  ;;  %v1128_v10 = vmax.f32 %v1005_v60, 0.0 }
 0x166   :  { %v453_v11 = vpop.f32.mrb[62].mxu0  ;;  %v1009_v12 = vpop.f32.mrb[62].mxu1 }
 0x167   :  { %v5013_v14 = vmax.f32 %v572_v7, %v1128_v10  ;;  %v454_v15 = vadd.f32 %v4507_v61, %v453_v11  ;;  %v1010_v19 = vadd.f32 %v4507_v61, %v1009_v12  ;;  %v3159_v20 = vpop.f32.mrb[63].mxu0  ;;  %v3326_v22 = vpop.f32.mrb[63].mxu1  ;;  %3504 = vmatmul.mubr.msk.f32.gmra.mrb[168].mxu0 %vm80_vm4, %v2645_v1  ;;  %3671 = vmatmul.mubr.msk.f32.gmra.mrb[168].mxu1 %vm80_vm4, %v2744_v2  ;;  %v2648_v2 = vld [vmem:[%s5599_s0 + $0x440] sm:$0xff] }
 0x168   :  { %3506 = vmatprep.mubr.msk.f32.mxu0 %vm3783_vm0, %v3784_v6  ;;  %3673 = vmatprep.mubr.msk.f32.mxu1 %vm3783_vm0, %v3784_v6 }
 0x169   :  { %v573_v28 = vmax.f32 %v454_v15, 0.0  ;;  %v1129_v29 = vmax.f32 %v1010_v19, 0.0  ;;  %v5066_v19 = vld [vmem:[%s5600_s2] ss:$0 sm:$0xff] }
 0x16a   :  { %v458_v32 = vpop.f32.mrb[64].mxu0  ;;  %v1014_v33 = vpop.f32.mrb[64].mxu1 }
 0x16b   :  { %v5029_v34 = vmax.f32 %v573_v28, %v1129_v29  ;;  %v459_v39 = vadd.f32 %v4507_v61, %v458_v32  ;;  %v1015_v40 = vadd.f32 %v4507_v61, %v1014_v33  ;;  %v3162_v41 = vpop.f32.mrb[65].mxu0  ;;  %v3329_v45 = vpop.f32.mrb[65].mxu1  ;;  %3507 = vmatmul.mubr.msk.f32.gmra.mrb[170].mxu0 %vm80_vm4, %v2646_v25  ;;  %3674 = vmatmul.mubr.msk.f32.gmra.mrb[170].mxu1 %vm80_vm4, %v2745_v27  ;;  %v2649_v28 = vld [vmem:[%s5599_s0 + $0x448] sm:$0xff]  ;;  %v2748_v29 = vld [vmem:[%s5599_s0 + $0x5d0] sm:$0xff] }
 0x16c   :  { %3509 = vmatprep.mubr.msk.f32.mxu0 %vm3783_vm0, %v3784_v6  ;;  %3676 = vmatprep.mubr.msk.f32.mxu1 %vm3783_vm0, %v3784_v6 }
 0x16d   :  { %v574_v49 = vmax.f32 %v459_v39, 0.0  ;;  %v1130_v50 = vmax.f32 %v1015_v40, 0.0 }
 0x16e   :  { %v463_v51 = vpop.f32.mrb[66].mxu0  ;;  %v1019_v55 = vpop.f32.mrb[66].mxu1 }
 0x16f   :  { %v5045_v59 = vmax.f32 %v574_v49, %v1130_v50  ;;  %v464_v60 = vadd.f32 %v4507_v61, %v463_v51  ;;  %v1020_v63 = vadd.f32 %v4507_v61, %v1019_v55  ;;  %v3165_v0 = vpop.f32.mrb[67].mxu0  ;;  %v3332_v1 = vpop.f32.mrb[67].mxu1  ;;  %3510 = vmatmul.mubr.msk.f32.gmra.mrb[172].mxu0 %vm80_vm4, %v2647_v47  ;;  %3677 = vmatmul.mubr.msk.f32.gmra.mrb[172].mxu1 %vm80_vm4, %v2746_v48  ;;  %v2747_v61 = vld [vmem:[%s5599_s0 + $0x5c8] sm:$0xff]  ;;  %v2650_v50 = vld [vmem:[%s5599_s0 + $0x450] sm:$0xff]  ;;  %v2749_v51 = vld [vmem:[%s5599_s0 + $0x5d8] sm:$0xff] }
 0x170   :  { %3512 = vmatprep.mubr.msk.f32.mxu0 %vm3783_vm0, %v3784_v6  ;;  %3679 = vmatprep.mubr.msk.f32.mxu1 %vm3783_vm0, %v3784_v6 }
 0x171   :  { %v575_v7 = vmax.f32 %v464_v60, 0.0  ;;  %v1131_v10 = vmax.f32 %v1020_v63, 0.0 }
 0x172   :  { %v468_v11 = vpop.f32.mrb[68].mxu0  ;;  %v1024_v12 = vpop.f32.mrb[68].mxu1 }
 0x173   :  { %v5061_v15 = vmax.f32 %v575_v7, %v1131_v10  ;;  %v469_v20 = vadd.f32 %v5066_v19, %v468_v11  ;;  %v1025_v22 = vadd.f32 %v5066_v19, %v1024_v12  ;;  %v3168_v25 = vpop.f32.mrb[69].mxu0  ;;  %v3335_v27 = vpop.f32.mrb[69].mxu1  ;;  %3513 = vmatmul.mubr.msk.f32.gmra.mrb[174].mxu0 %vm80_vm4, %v2648_v2  ;;  %3680 = vmatmul.mubr.msk.f32.gmra.mrb[174].mxu1 %vm80_vm4, %v2747_v61  ;;  %v2651_v11 = vld [vmem:[%s5599_s0 + $0x458] sm:$0xff]  ;;  %v2750_v12 = vld [vmem:[%s5599_s0 + $0x5e0] sm:$0xff] }
 0x174   :  { %3515 = vmatprep.mubr.msk.f32.mxu0 %vm3783_vm0, %v3784_v6  ;;  %3682 = vmatprep.mubr.msk.f32.mxu1 %vm3783_vm0, %v3784_v6 }
 0x175   :  { %v576_v32 = vmax.f32 %v469_v20, 0.0  ;;  %v1132_v33 = vmax.f32 %v1025_v22, 0.0 }
 0x176   :  { %v473_v39 = vpop.f32.mrb[70].mxu0  ;;  %v1029_v40 = vpop.f32.mrb[70].mxu1 }
 0x177   :  { %v5082_v41 = vmax.f32 %v576_v32, %v1132_v33  ;;  %v474_v45 = vadd.f32 %v5066_v19, %v473_v39  ;;  %v1030_v47 = vadd.f32 %v5066_v19, %v1029_v40  ;;  %v3171_v48 = vpop.f32.mrb[71].mxu0  ;;  %v3338_v49 = vpop.f32.mrb[71].mxu1  ;;  %3516 = vmatmul.mubr.msk.f32.gmra.mrb[176].mxu0 %vm80_vm4, %v2649_v28  ;;  %3683 = vmatmul.mubr.msk.f32.gmra.mrb[176].mxu1 %vm80_vm4, %v2748_v29  ;;  %v2652_v40 = vld [vmem:[%s5599_s0 + $0x460] sm:$0xff] }
 0x178   :  { %3518 = vmatprep.mubr.msk.f32.mxu0 %vm3783_vm0, %v3784_v6  ;;  %3685 = vmatprep.mubr.msk.f32.mxu1 %vm3783_vm0, %v3784_v6 }
 0x179   :  { %v577_v55 = vmax.f32 %v474_v45, 0.0  ;;  %v1133_v60 = vmax.f32 %v1030_v47, 0.0  ;;  %v2751_v45 = vld [vmem:[%s5599_s0 + $0x5e8] sm:$0xff] }
 0x17a   :  { %v478_v63 = vpop.f32.mrb[72].mxu0  ;;  %v1034_v0 = vpop.f32.mrb[72].mxu1 }
 0x17b   :  { %v5098_v1 = vmax.f32 %v577_v55, %v1133_v60  ;;  %v479_v2 = vadd.f32 %v5066_v19, %v478_v63  ;;  %v1035_v61 = vadd.f32 %v5066_v19, %v1034_v0  ;;  %v3174_v7 = vpop.f32.mrb[73].mxu0  ;;  %v3341_v10 = vpop.f32.mrb[73].mxu1  ;;  %3519 = vmatmul.mubr.msk.f32.gmra.mrb[178].mxu0 %vm80_vm4, %v2650_v50  ;;  %3686 = vmatmul.mubr.msk.f32.gmra.mrb[178].mxu1 %vm80_vm4, %v2749_v51 }
 0x17c   :  { %3521 = vmatprep.mubr.msk.f32.mxu0 %vm3783_vm0, %v3784_v6  ;;  %3688 = vmatprep.mubr.msk.f32.mxu1 %vm3783_vm0, %v3784_v6 }
 0x17d   :  { %v578_v20 = vmax.f32 %v479_v2, 0.0  ;;  %v1134_v22 = vmax.f32 %v1035_v61, 0.0  ;;  %v2653_v2 = vld [vmem:[%s5599_s0 + $0x468] sm:$0xff]  ;;  %v2752_v61 = vld [vmem:[%s5599_s0 + $0x5f0] sm:$0xff] }
 0x17e   :  { %v483_v25 = vpop.f32.mrb[74].mxu0  ;;  %v1039_v27 = vpop.f32.mrb[74].mxu1 }
 0x17f   :  { %v5114_v28 = vmax.f32 %v578_v20, %v1134_v22  ;;  %v484_v29 = vadd.f32 %v5066_v19, %v483_v25  ;;  %v1040_v32 = vadd.f32 %v5066_v19, %v1039_v27  ;;  %v3177_v33 = vpop.f32.mrb[75].mxu0  ;;  %v3344_v39 = vpop.f32.mrb[75].mxu1  ;;  %3522 = vmatmul.mubr.msk.f32.gmra.mrb[180].mxu0 %vm80_vm4, %v2651_v11  ;;  %3689 = vmatmul.mubr.msk.f32.gmra.mrb[180].mxu1 %vm80_vm4, %v2750_v12 }
 0x180   :  { %3524 = vmatprep.mubr.msk.f32.mxu0 %vm3783_vm0, %v3784_v6  ;;  %3691 = vmatprep.mubr.msk.f32.mxu1 %vm3783_vm0, %v3784_v6  ;;  %v2753_v33 = vld [vmem:[%s5599_s0 + $0x5f8] sm:$0xff] }
 0x181   :  { %v579_v47 = vmax.f32 %v484_v29, 0.0  ;;  %v1135_v48 = vmax.f32 %v1040_v32, 0.0  ;;  %v2654_v32 = vld [vmem:[%s5599_s0 + $0x470] sm:$0xff] }
 0x182   :  { %v488_v49 = vpop.f32.mrb[76].mxu0  ;;  %v1044_v50 = vpop.f32.mrb[76].mxu1 }
 0x183   :  { %v5130_v51 = vmax.f32 %v579_v47, %v1135_v48  ;;  %v489_v55 = vadd.f32 %v5066_v19, %v488_v49  ;;  %v1045_v60 = vadd.f32 %v5066_v19, %v1044_v50  ;;  %v3180_v63 = vpop.f32.mrb[77].mxu0  ;;  %v3347_v0 = vpop.f32.mrb[77].mxu1  ;;  %3525 = vmatmul.mubr.msk.f32.gmra.mrb[182].mxu0 %vm80_vm4, %v2652_v40  ;;  %3692 = vmatmul.mubr.msk.f32.gmra.mrb[182].mxu1 %vm80_vm4, %v2751_v45 }
 0x184   :  { %3527 = vmatprep.mubr.msk.f32.mxu0 %vm3783_vm0, %v3784_v6  ;;  %3694 = vmatprep.mubr.msk.f32.mxu1 %vm3783_vm0, %v3784_v6  ;;  %v2655_v63 = vld [vmem:[%s5599_s0 + $0x478] sm:$0xff]  ;;  %v2754_v0 = vld [vmem:[%s5599_s0 + $0x600] sm:$0xff] }
 0x185   :  { %v580_v7 = vmax.f32 %v489_v55, 0.0  ;;  %v1136_v10 = vmax.f32 %v1045_v60, 0.0 }
 0x186   :  { %v493_v11 = vpop.f32.mrb[78].mxu0  ;;  %v1049_v12 = vpop.f32.mrb[78].mxu1 }
 0x187   :  { %v5146_v20 = vmax.f32 %v580_v7, %v1136_v10  ;;  %v494_v22 = vadd.f32 %v5066_v19, %v493_v11  ;;  %v1050_v25 = vadd.f32 %v5066_v19, %v1049_v12  ;;  %v3183_v27 = vpop.f32.mrb[79].mxu0  ;;  %v3350_v29 = vpop.f32.mrb[79].mxu1  ;;  %3528 = vmatmul.mubr.msk.f32.gmra.mrb[184].mxu0 %vm80_vm4, %v2653_v2  ;;  %3695 = vmatmul.mubr.msk.f32.gmra.mrb[184].mxu1 %vm80_vm4, %v2752_v61 }
 0x188   :  { %3530 = vmatprep.mubr.msk.f32.mxu0 %vm3783_vm0, %v3784_v6  ;;  %3697 = vmatprep.mubr.msk.f32.mxu1 %vm3783_vm0, %v3784_v6  ;;  %v2656_v29 = vld [vmem:[%s5599_s0 + $0x480] sm:$0xff] }
 0x189   :  { %v581_v39 = vmax.f32 %v494_v22, 0.0  ;;  %v1137_v40 = vmax.f32 %v1050_v25, 0.0 }
 0x18a   :  { %v498_v45 = vpop.f32.mrb[80].mxu0  ;;  %v1054_v47 = vpop.f32.mrb[80].mxu1 }
 0x18b   :  { %v5162_v48 = vmax.f32 %v581_v39, %v1137_v40  ;;  %v499_v49 = vadd.f32 %v5066_v19, %v498_v45  ;;  %v1055_v50 = vadd.f32 %v5066_v19, %v1054_v47  ;;  %v3186_v55 = vpop.f32.mrb[81].mxu0  ;;  %v3353_v60 = vpop.f32.mrb[81].mxu1  ;;  %3531 = vmatmul.mubr.msk.f32.gmra.mrb[186].mxu0 %vm80_vm4, %v2654_v32  ;;  %3698 = vmatmul.mubr.msk.f32.gmra.mrb[186].mxu1 %vm80_vm4, %v2753_v33  ;;  %v2755_v32 = vld [vmem:[%s5599_s0 + $0x608] sm:$0xff] }
 0x18c   :  { %3533 = vmatprep.mubr.msk.f32.mxu0 %vm3783_vm0, %v3784_v6  ;;  %3700 = vmatprep.mubr.msk.f32.mxu1 %vm3783_vm0, %v3784_v6 }
 0x18d   :  { %v582_v2 = vmax.f32 %v499_v49, 0.0  ;;  %v1138_v61 = vmax.f32 %v1055_v50, 0.0 }
 0x18e   :  { %v503_v7 = vpop.f32.mrb[82].mxu0  ;;  %v1059_v10 = vpop.f32.mrb[82].mxu1 }
 0x18f   :  { %v5178_v11 = vmax.f32 %v582_v2, %v1138_v61  ;;  %v504_v12 = vadd.f32 %v5066_v19, %v503_v7  ;;  %v1060_v22 = vadd.f32 %v5066_v19, %v1059_v10  ;;  %v3189_v25 = vpop.f32.mrb[83].mxu0  ;;  %v3356_v27 = vpop.f32.mrb[83].mxu1  ;;  %3534 = vmatmul.mubr.msk.f32.gmra.mrb[188].mxu0 %vm80_vm4, %v2655_v63  ;;  %3701 = vmatmul.mubr.msk.f32.gmra.mrb[188].mxu1 %vm80_vm4, %v2754_v0  ;;  %v2657_v63 = vld [vmem:[%s5599_s0 + $0x488] sm:$0xff]  ;;  %v2756_v0 = vld [vmem:[%s5599_s0 + $0x610] sm:$0xff] }
 0x190   :  { %3536 = vmatprep.mubr.msk.f32.mxu0 %vm3783_vm0, %v3784_v6  ;;  %3703 = vmatprep.mubr.msk.f32.mxu1 %vm3783_vm0, %v3784_v6 }
 0x191   :  { %v583_v33 = vmax.f32 %v504_v12, 0.0  ;;  %v1139_v39 = vmax.f32 %v1060_v22, 0.0 }
 0x192   :  { %v508_v40 = vpop.f32.mrb[84].mxu0  ;;  %v1064_v45 = vpop.f32.mrb[84].mxu1 }
 0x193   :  { %v5194_v47 = vmax.f32 %v583_v33, %v1139_v39  ;;  %v509_v49 = vadd.f32 %v5066_v19, %v508_v40  ;;  %v1065_v50 = vadd.f32 %v5066_v19, %v1064_v45  ;;  %v3192_v55 = vpop.f32.mrb[85].mxu0  ;;  %v3359_v60 = vpop.f32.mrb[85].mxu1  ;;  %3537 = vmatmul.mubr.msk.f32.gmra.mrb[190].mxu0 %vm80_vm4, %v2656_v29  ;;  %3704 = vmatmul.mubr.msk.f32.gmra.mrb[190].mxu1 %vm80_vm4, %v2755_v32  ;;  %v2658_v32 = vld [vmem:[%s5599_s0 + $0x490] sm:$0xff]  ;;  %v2757_v33 = vld [vmem:[%s5599_s0 + $0x618] sm:$0xff] }
 0x194   :  { %3539 = vmatprep.mubr.msk.f32.mxu0 %vm3783_vm0, %v3784_v6  ;;  %3706 = vmatprep.mubr.msk.f32.mxu1 %vm3783_vm0, %v3784_v6 }
 0x195   :  { %v584_v2 = vmax.f32 %v509_v49, 0.0  ;;  %v1140_v61 = vmax.f32 %v1065_v50, 0.0 }
 0x196   :  { %v513_v7 = vpop.f32.mrb[86].mxu0  ;;  %v1069_v10 = vpop.f32.mrb[86].mxu1 }
 0x197   :  { %v5210_v12 = vmax.f32 %v584_v2, %v1140_v61  ;;  %v514_v22 = vadd.f32 %v5066_v19, %v513_v7  ;;  %v1070_v25 = vadd.f32 %v5066_v19, %v1069_v10  ;;  %v3195_v27 = vpop.f32.mrb[87].mxu0  ;;  %v3362_v29 = vpop.f32.mrb[87].mxu1  ;;  %3540 = vmatmul.mubr.msk.f32.gmra.mrb[192].mxu0 %vm80_vm4, %v2657_v63  ;;  %3707 = vmatmul.mubr.msk.f32.gmra.mrb[192].mxu1 %vm80_vm4, %v2756_v0 }
 0x198   :  { %3542 = vmatprep.mubr.msk.f32.mxu0 %vm3783_vm0, %v3784_v6  ;;  %3709 = vmatprep.mubr.msk.f32.mxu1 %vm3783_vm0, %v3784_v6 }
 0x199   :  { %v585_v39 = vmax.f32 %v514_v22, 0.0  ;;  %v1141_v40 = vmax.f32 %v1070_v25, 0.0 }
 0x19a   :  { %v518_v45 = vpop.f32.mrb[88].mxu0  ;;  %v1074_v49 = vpop.f32.mrb[88].mxu1 }
 0x19b   :  { %v5226_v50 = vmax.f32 %v585_v39, %v1141_v40  ;;  %v519_v55 = vadd.f32 %v5066_v19, %v518_v45  ;;  %v1075_v60 = vadd.f32 %v5066_v19, %v1074_v49  ;;  %v3198_v63 = vpop.f32.mrb[89].mxu0  ;;  %v3365_v6 = vpop.f32.mrb[89].mxu1  ;;  %3543 = vmatmul.mubr.msk.f32.gmra.mrb[194].mxu0 %vm80_vm4, %v2658_v32  ;;  %3710 = vmatmul.mubr.msk.f32.gmra.mrb[194].mxu1 %vm80_vm4, %v2757_v33 }
 0x19d   :  { %v586_v0 = vmax.f32 %v519_v55, 0.0  ;;  %v1142_v2 = vmax.f32 %v1075_v60, 0.0 }
 0x19e   :  { %v523_v61 = vpop.f32.mrb[90].mxu0  ;;  %v1079_v7 = vpop.f32.mrb[90].mxu1 }
 0x19f   :  { %v5232_v10 = vmax.f32 %v586_v0, %v1142_v2  ;;  %v524_v22 = vadd.f32 %v5066_v19, %v523_v61  ;;  %v1080_v25 = vadd.f32 %v5066_v19, %v1079_v7  ;;  %v3201_v27 = vpop.f32.mrb[91].mxu0  ;;  %v3368_v29 = vpop.f32.mrb[91].mxu1 }
 0x1a1   :  { %5604 = vst [vmem:[#allocation2_spill] sm:$0xff] %v5232_v10  ;;  %v587_v39 = vmax.f32 %v524_v22, 0.0  ;;  %v1143_v40 = vmax.f32 %v1080_v25, 0.0 }
 0x1a2   :  { %v528_v45 = vpop.f32.mrb[92].mxu0  ;;  %v1084_v49 = vpop.f32.mrb[92].mxu1 }
 0x1a3   :  { %v5236_v63 = vmax.f32 %v587_v39, %v1143_v40  ;;  %v529_v32 = vadd.f32 %v5066_v19, %v528_v45  ;;  %v1085_v33 = vadd.f32 %v5066_v19, %v1084_v49  ;;  %v3204_v55 = vpop.f32.mrb[93].mxu0  ;;  %v3371_v60 = vpop.f32.mrb[93].mxu1 }
 0x1a5   :  { %5605 = vst [vmem:[#allocation3_spill] sm:$0xff] %v5236_v63  ;;  %v588_v6 = vmax.f32 %v529_v32, 0.0  ;;  %v1144_v0 = vmax.f32 %v1085_v33, 0.0 }
 0x1a6   :  { %v533_v2 = vpop.f32.mrb[94].mxu0  ;;  %v1089_v61 = vpop.f32.mrb[94].mxu1 }
 0x1a7   :  { %v5240_v10 = vmax.f32 %v588_v6, %v1144_v0  ;;  %v534_v7 = vadd.f32 %v5066_v19, %v533_v2  ;;  %v1090_v22 = vadd.f32 %v5066_v19, %v1089_v61  ;;  %v3207_v25 = vpop.f32.mrb[95].mxu0  ;;  %v3374_v27 = vpop.f32.mrb[95].mxu1 }
 0x1a9   :  { %5606 = vst [vmem:[#allocation4_spill] sm:$0xff] %v5240_v10  ;;  %v589_v29 = vmax.f32 %v534_v7, 0.0  ;;  %v1145_v39 = vmax.f32 %v1090_v22, 0.0 }
 0x1aa   :  { %v538_v40 = vpop.f32.mrb[96].mxu0  ;;  %v1094_v45 = vpop.f32.mrb[96].mxu1 }
 0x1ab   :  { %v5244_v63 = vmax.f32 %v589_v29, %v1145_v39  ;;  %v539_v49 = vadd.f32 %v5066_v19, %v538_v40  ;;  %v1095_v32 = vadd.f32 %v5066_v19, %v1094_v45  ;;  %v3210_v33 = vpop.f32.mrb[97].mxu0  ;;  %v3377_v55 = vpop.f32.mrb[97].mxu1 }
 0x1ad   :  { %5607 = vst [vmem:[#allocation5_spill] sm:$0xff] %v5244_v63  ;;  %v590_v60 = vmax.f32 %v539_v49, 0.0  ;;  %v1146_v6 = vmax.f32 %v1095_v32, 0.0 }
 0x1ae   :  { %v1459_v0 = vpop.f32.mrb[98].mxu0  ;;  %v2015_v2 = vpop.f32.mrb[98].mxu1 }
 0x1af   :  { %v5248_v10 = vmax.f32 %v590_v60, %v1146_v6  ;;  %v1460_v61 = vadd.f32 %v5066_v19, %v1459_v0  ;;  %v2016_v7 = vadd.f32 %v5066_v19, %v2015_v2  ;;  %v3400_v22 = vpop.f32.mrb[99].mxu0  ;;  %v3567_v25 = vpop.f32.mrb[99].mxu1 }
 0x1b1   :  { %v1703_v27 = vmax.f32 %v1460_v61, 0.0  ;;  %v2259_v29 = vmax.f32 %v2016_v7, 0.0 }
 0x1b2   :  { %v1464_v39 = vpop.f32.mrb[100].mxu0  ;;  %v2020_v40 = vpop.f32.mrb[100].mxu1 }
 0x1b3   :  { %v2308_v63 = vmax.f32 %v1703_v27, %v2259_v29  ;;  %v1465_v45 = vadd.f32 %v5066_v19, %v1464_v39  ;;  %v2021_v49 = vadd.f32 %v5066_v19, %v2020_v40  ;;  %v3403_v32 = vpop.f32.mrb[101].mxu0  ;;  %v3570_v33 = vpop.f32.mrb[101].mxu1 }
 0x1b5   :  { %v2357_v55 = vmax.f32 %v4533_v13, %v2308_v63  ;;  %v1704_v60 = vmax.f32 %v1465_v45, 0.0  ;;  %v2260_v6 = vmax.f32 %v2021_v49, 0.0 }
 0x1b6   :  { %v1469_v0 = vpop.f32.mrb[102].mxu0  ;;  %v2025_v2 = vpop.f32.mrb[102].mxu1 }
 0x1b7   :  { %2407 = vst.msk [vmem:[%s5601_s3] sm:$0xff] %vm2406_vm5, %v2357_v55  ;;  %v2309_v61 = vmax.f32 %v1704_v60, %v2260_v6  ;;  %v1470_v7 = vadd.f32 %v5066_v19, %v1469_v0  ;;  %v2026_v22 = vadd.f32 %v5066_v19, %v2025_v2  ;;  %v3406_v25 = vpop.f32.mrb[103].mxu0  ;;  %v3573_v27 = vpop.f32.mrb[103].mxu1 }
 0x1b9   :  { %v2358_v29 = vmax.f32 %v4549_v24, %v2309_v61  ;;  %v1705_v39 = vmax.f32 %v1470_v7, 0.0  ;;  %v2261_v13 = vmax.f32 %v2026_v22, 0.0 }
 0x1ba   :  { %v1474_v63 = vpop.f32.mrb[104].mxu0  ;;  %v2030_v40 = vpop.f32.mrb[104].mxu1 }
 0x1bb   :  { %2408 = vst.msk [vmem:[%s5601_s3 + $0x8] sm:$0xff] %vm2406_vm5, %v2358_v29  ;;  %v2310_v45 = vmax.f32 %v1705_v39, %v2261_v13  ;;  %v1475_v49 = vadd.f32 %v5066_v19, %v1474_v63  ;;  %v2031_v32 = vadd.f32 %v5066_v19, %v2030_v40  ;;  %v3409_v33 = vpop.f32.mrb[105].mxu0  ;;  %v3576_v55 = vpop.f32.mrb[105].mxu1 }
 0x1bd   :  { %v2359_v60 = vmax.f32 %v4565_v35, %v2310_v45  ;;  %v1706_v6 = vmax.f32 %v1475_v49, 0.0  ;;  %v2262_v24 = vmax.f32 %v2031_v32, 0.0 }
 0x1be   :  { %v1479_v0 = vpop.f32.mrb[106].mxu0  ;;  %v2035_v2 = vpop.f32.mrb[106].mxu1 }
 0x1bf   :  { %2409 = vst.msk [vmem:[%s5601_s3 + $0x10] sm:$0xff] %vm2406_vm5, %v2359_v60  ;;  %v2311_v61 = vmax.f32 %v1706_v6, %v2262_v24  ;;  %v1480_v7 = vadd.f32 %v5066_v19, %v1479_v0  ;;  %v2036_v22 = vadd.f32 %v5066_v19, %v2035_v2  ;;  %v3412_v25 = vpop.f32.mrb[107].mxu0  ;;  %v3579_v27 = vpop.f32.mrb[107].mxu1 }
 0x1c1   :  { %v2360_v29 = vmax.f32 %v4581_v46, %v2311_v61  ;;  %v1707_v39 = vmax.f32 %v1480_v7, 0.0  ;;  %v2263_v35 = vmax.f32 %v2036_v22, 0.0 }
 0x1c2   :  { %v1484_v13 = vpop.f32.mrb[108].mxu0  ;;  %v2040_v63 = vpop.f32.mrb[108].mxu1 }
 0x1c3   :  { %2410 = vst.msk [vmem:[%s5601_s3 + $0x18] sm:$0xff] %vm2406_vm5, %v2360_v29  ;;  %v2312_v40 = vmax.f32 %v1707_v39, %v2263_v35  ;;  %v1485_v45 = vadd.f32 %v5066_v19, %v1484_v13  ;;  %v2041_v49 = vadd.f32 %v5066_v19, %v2040_v63  ;;  %v3415_v32 = vpop.f32.mrb[109].mxu0  ;;  %v3582_v33 = vpop.f32.mrb[109].mxu1 }
 0x1c5   :  { %v2361_v55 = vmax.f32 %v4597_v57, %v2312_v40  ;;  %v1708_v60 = vmax.f32 %v1485_v45, 0.0  ;;  %v2264_v46 = vmax.f32 %v2041_v49, 0.0 }
 0x1c6   :  { %v1489_v6 = vpop.f32.mrb[110].mxu0  ;;  %v2045_v24 = vpop.f32.mrb[110].mxu1 }
 0x1c7   :  { %2411 = vst.msk [vmem:[%s5601_s3 + $0x20] sm:$0xff] %vm2406_vm5, %v2361_v55  ;;  %v2313_v0 = vmax.f32 %v1708_v60, %v2264_v46  ;;  %v1490_v2 = vadd.f32 %v5066_v19, %v1489_v6  ;;  %v2046_v61 = vadd.f32 %v5066_v19, %v2045_v24  ;;  %v3418_v7 = vpop.f32.mrb[111].mxu0  ;;  %v3585_v22 = vpop.f32.mrb[111].mxu1 }
 0x1c9   :  { %v2362_v25 = vmax.f32 %v4613_v5, %v2313_v0  ;;  %v1709_v27 = vmax.f32 %v1490_v2, 0.0  ;;  %v2265_v57 = vmax.f32 %v2046_v61, 0.0 }
 0x1ca   :  { %v1494_v29 = vpop.f32.mrb[112].mxu0  ;;  %v2050_v39 = vpop.f32.mrb[112].mxu1 }
 0x1cb   :  { %2412 = vst.msk [vmem:[%s5601_s3 + $0x28] sm:$0xff] %vm2406_vm5, %v2362_v25  ;;  %v2314_v35 = vmax.f32 %v1709_v27, %v2265_v57  ;;  %v1495_v13 = vadd.f32 %v5066_v19, %v1494_v29  ;;  %v2051_v63 = vadd.f32 %v5066_v19, %v2050_v39  ;;  %v3421_v40 = vpop.f32.mrb[113].mxu0  ;;  %v3588_v45 = vpop.f32.mrb[113].mxu1 }
 0x1cd   :  { %v2363_v49 = vmax.f32 %v4629_v18, %v2314_v35  ;;  %v1710_v32 = vmax.f32 %v1495_v13, 0.0  ;;  %v2266_v5 = vmax.f32 %v2051_v63, 0.0 }
 0x1ce   :  { %v1499_v33 = vpop.f32.mrb[114].mxu0  ;;  %v2055_v55 = vpop.f32.mrb[114].mxu1 }
 0x1cf   :  { %2413 = vst.msk [vmem:[%s5601_s3 + $0x30] sm:$0xff] %vm2406_vm5, %v2363_v49  ;;  %v2315_v60 = vmax.f32 %v1710_v32, %v2266_v5  ;;  %v1500_v46 = vadd.f32 %v5066_v19, %v1499_v33  ;;  %v2056_v6 = vadd.f32 %v5066_v19, %v2055_v55  ;;  %v3424_v24 = vpop.f32.mrb[115].mxu0  ;;  %v3591_v0 = vpop.f32.mrb[115].mxu1 }
 0x1d1   :  { %v2364_v2 = vmax.f32 %v4645_v30, %v2315_v60  ;;  %v1711_v61 = vmax.f32 %v1500_v46, 0.0  ;;  %v2267_v18 = vmax.f32 %v2056_v6, 0.0 }
 0x1d2   :  { %v1504_v7 = vpop.f32.mrb[116].mxu0  ;;  %v2060_v22 = vpop.f32.mrb[116].mxu1 }
 0x1d3   :  { %2414 = vst.msk [vmem:[%s5601_s3 + $0x38] sm:$0xff] %vm2406_vm5, %v2364_v2  ;;  %v2316_v25 = vmax.f32 %v1711_v61, %v2267_v18  ;;  %v1505_v27 = vadd.f32 %v5066_v19, %v1504_v7  ;;  %v2061_v57 = vadd.f32 %v5066_v19, %v2060_v22  ;;  %v3427_v29 = vpop.f32.mrb[117].mxu0  ;;  %v3594_v39 = vpop.f32.mrb[117].mxu1 }
 0x1d5   :  { %v2365_v35 = vmax.f32 %v4661_v42, %v2316_v25  ;;  %v1712_v13 = vmax.f32 %v1505_v27, 0.0  ;;  %v2268_v30 = vmax.f32 %v2061_v57, 0.0 }
 0x1d6   :  { %v1509_v63 = vpop.f32.mrb[118].mxu0  ;;  %v2065_v40 = vpop.f32.mrb[118].mxu1 }
 0x1d7   :  { %2415 = vst.msk [vmem:[%s5601_s3 + $0x40] sm:$0xff] %vm2406_vm5, %v2365_v35  ;;  %v2317_v45 = vmax.f32 %v1712_v13, %v2268_v30  ;;  %v1510_v49 = vadd.f32 %v5066_v19, %v1509_v63  ;;  %v2066_v32 = vadd.f32 %v5066_v19, %v2065_v40  ;;  %v3430_v5 = vpop.f32.mrb[119].mxu0  ;;  %v3597_v33 = vpop.f32.mrb[119].mxu1 }
 0x1d9   :  { %v2366_v55 = vmax.f32 %v4677_v54, %v2317_v45  ;;  %v1713_v60 = vmax.f32 %v1510_v49, 0.0  ;;  %v2269_v42 = vmax.f32 %v2066_v32, 0.0 }
 0x1da   :  { %v1514_v46 = vpop.f32.mrb[120].mxu0  ;;  %v2070_v6 = vpop.f32.mrb[120].mxu1 }
 0x1db   :  { %2416 = vst.msk [vmem:[%s5601_s3 + $0x48] sm:$0xff] %vm2406_vm5, %v2366_v55  ;;  %v2318_v24 = vmax.f32 %v1713_v60, %v2269_v42  ;;  %v1515_v0 = vadd.f32 %v5066_v19, %v1514_v46  ;;  %v2071_v2 = vadd.f32 %v5066_v19, %v2070_v6  ;;  %v3433_v61 = vpop.f32.mrb[121].mxu0  ;;  %v3600_v18 = vpop.f32.mrb[121].mxu1 }
 0x1dd   :  { %v2367_v7 = vmax.f32 %v4693_v3, %v2318_v24  ;;  %v1714_v22 = vmax.f32 %v1515_v0, 0.0  ;;  %v2270_v54 = vmax.f32 %v2071_v2, 0.0 }
 0x1de   :  { %v1519_v25 = vpop.f32.mrb[122].mxu0  ;;  %v2075_v27 = vpop.f32.mrb[122].mxu1 }
 0x1df   :  { %2417 = vst.msk [vmem:[%s5601_s3 + $0x50] sm:$0xff] %vm2406_vm5, %v2367_v7  ;;  %v2319_v57 = vmax.f32 %v1714_v22, %v2270_v54  ;;  %v1520_v29 = vadd.f32 %v5066_v19, %v1519_v25  ;;  %v2076_v39 = vadd.f32 %v5066_v19, %v2075_v27  ;;  %v3436_v35 = vpop.f32.mrb[123].mxu0  ;;  %v3603_v13 = vpop.f32.mrb[123].mxu1 }
 0x1e1   :  { %v2368_v30 = vmax.f32 %v4709_v17, %v2319_v57  ;;  %v1715_v63 = vmax.f32 %v1520_v29, 0.0  ;;  %v2271_v3 = vmax.f32 %v2076_v39, 0.0 }
 0x1e2   :  { %v1524_v40 = vpop.f32.mrb[124].mxu0  ;;  %v2080_v45 = vpop.f32.mrb[124].mxu1 }
 0x1e3   :  { %2418 = vst.msk [vmem:[%s5601_s3 + $0x58] sm:$0xff] %vm2406_vm5, %v2368_v30  ;;  %v2320_v49 = vmax.f32 %v1715_v63, %v2271_v3  ;;  %v1525_v32 = vadd.f32 %v5066_v19, %v1524_v40  ;;  %v2081_v5 = vadd.f32 %v5066_v19, %v2080_v45  ;;  %v3439_v33 = vpop.f32.mrb[125].mxu0  ;;  %v3606_v55 = vpop.f32.mrb[125].mxu1 }
 0x1e5   :  { %v2369_v60 = vmax.f32 %v4725_v31, %v2320_v49  ;;  %v1716_v42 = vmax.f32 %v1525_v32, 0.0  ;;  %v2272_v17 = vmax.f32 %v2081_v5, 0.0 }
 0x1e6   :  { %v1529_v46 = vpop.f32.mrb[126].mxu0  ;;  %v2085_v6 = vpop.f32.mrb[126].mxu1 }
 0x1e7   :  { %2419 = vst.msk [vmem:[%s5601_s3 + $0x60] sm:$0xff] %vm2406_vm5, %v2369_v60  ;;  %v2321_v24 = vmax.f32 %v1716_v42, %v2272_v17  ;;  %v1530_v0 = vadd.f32 %v5066_v19, %v1529_v46  ;;  %v2086_v2 = vadd.f32 %v5066_v19, %v2085_v6  ;;  %v3442_v61 = vpop.f32.mrb[127].mxu0  ;;  %v3609_v18 = vpop.f32.mrb[127].mxu1 }
 0x1e9   :  { %v2370_v7 = vmax.f32 %v4741_v44, %v2321_v24  ;;  %v1717_v22 = vmax.f32 %v1530_v0, 0.0  ;;  %v2273_v31 = vmax.f32 %v2086_v2, 0.0 }
 0x1ea   :  { %v1534_v54 = vpop.f32.mrb[128].mxu0  ;;  %v2090_v25 = vpop.f32.mrb[128].mxu1 }
 0x1eb   :  { %2420 = vst.msk [vmem:[%s5601_s3 + $0x68] sm:$0xff] %vm2406_vm5, %v2370_v7  ;;  %v2322_v27 = vmax.f32 %v1717_v22, %v2273_v31  ;;  %v1535_v57 = vadd.f32 %v5066_v19, %v1534_v54  ;;  %v2091_v29 = vadd.f32 %v5066_v19, %v2090_v25  ;;  %v3445_v39 = vpop.f32.mrb[129].mxu0  ;;  %v3612_v35 = vpop.f32.mrb[129].mxu1 }
 0x1ed   :  { %v2371_v13 = vmax.f32 %v4757_v58, %v2322_v27  ;;  %v1718_v30 = vmax.f32 %v1535_v57, 0.0  ;;  %v2274_v44 = vmax.f32 %v2091_v29, 0.0 }
 0x1ee   :  { %v1539_v63 = vpop.f32.mrb[130].mxu0  ;;  %v2095_v3 = vpop.f32.mrb[130].mxu1 }
 0x1ef   :  { %2421 = vst.msk [vmem:[%s5601_s3 + $0x70] sm:$0xff] %vm2406_vm5, %v2371_v13  ;;  %v2323_v40 = vmax.f32 %v1718_v30, %v2274_v44  ;;  %v1540_v45 = vadd.f32 %v5066_v19, %v1539_v63  ;;  %v2096_v49 = vadd.f32 %v5066_v19, %v2095_v3  ;;  %v3448_v32 = vpop.f32.mrb[131].mxu0  ;;  %v3615_v5 = vpop.f32.mrb[131].mxu1 }
 0x1f1   :  { %v2372_v33 = vmax.f32 %v4773_v9, %v2323_v40  ;;  %v1719_v55 = vmax.f32 %v1540_v45, 0.0  ;;  %v2275_v58 = vmax.f32 %v2096_v49, 0.0 }
 0x1f2   :  { %v1544_v60 = vpop.f32.mrb[132].mxu0  ;;  %v2100_v42 = vpop.f32.mrb[132].mxu1 }
 0x1f3   :  { %2422 = vst.msk [vmem:[%s5601_s3 + $0x78] sm:$0xff] %vm2406_vm5, %v2372_v33  ;;  %v2324_v17 = vmax.f32 %v1719_v55, %v2275_v58  ;;  %v1545_v46 = vadd.f32 %v5066_v19, %v1544_v60  ;;  %v2101_v6 = vadd.f32 %v5066_v19, %v2100_v42  ;;  %v3451_v24 = vpop.f32.mrb[133].mxu0  ;;  %v3618_v0 = vpop.f32.mrb[133].mxu1 }
 0x1f5   :  { %v2373_v2 = vmax.f32 %v4789_v23, %v2324_v17  ;;  %v1720_v61 = vmax.f32 %v1545_v46, 0.0  ;;  %v2276_v9 = vmax.f32 %v2101_v6, 0.0 }
 0x1f6   :  { %v1549_v18 = vpop.f32.mrb[134].mxu0  ;;  %v2105_v7 = vpop.f32.mrb[134].mxu1 }
 0x1f7   :  { %2423 = vst.msk [vmem:[%s5601_s3 + $0x80] sm:$0xff] %vm2406_vm5, %v2373_v2  ;;  %v2325_v22 = vmax.f32 %v1720_v61, %v2276_v9  ;;  %v1550_v31 = vadd.f32 %v5066_v19, %v1549_v18  ;;  %v2106_v54 = vadd.f32 %v5066_v19, %v2105_v7  ;;  %v3454_v25 = vpop.f32.mrb[135].mxu0  ;;  %v3621_v27 = vpop.f32.mrb[135].mxu1 }
 0x1f9   :  { %v2374_v57 = vmax.f32 %v4805_v38, %v2325_v22  ;;  %v1721_v29 = vmax.f32 %v1550_v31, 0.0  ;;  %v2277_v23 = vmax.f32 %v2106_v54, 0.0 }
 0x1fa   :  { %v1554_v39 = vpop.f32.mrb[136].mxu0  ;;  %v2110_v35 = vpop.f32.mrb[136].mxu1 }
 0x1fb   :  { %2424 = vst.msk [vmem:[%s5601_s3 + $0x88] sm:$0xff] %vm2406_vm5, %v2374_v57  ;;  %v2326_v13 = vmax.f32 %v1721_v29, %v2277_v23  ;;  %v1555_v30 = vadd.f32 %v5066_v19, %v1554_v39  ;;  %v2111_v44 = vadd.f32 %v5066_v19, %v2110_v35  ;;  %v3457_v63 = vpop.f32.mrb[137].mxu0  ;;  %v3624_v3 = vpop.f32.mrb[137].mxu1 }
 0x1fd   :  { %v2375_v40 = vmax.f32 %v4821_v52, %v2326_v13  ;;  %v1722_v45 = vmax.f32 %v1555_v30, 0.0  ;;  %v2278_v38 = vmax.f32 %v2111_v44, 0.0 }
 0x1fe   :  { %v1559_v49 = vpop.f32.mrb[138].mxu0  ;;  %v2115_v32 = vpop.f32.mrb[138].mxu1 }
 0x1ff   :  { %2425 = vst.msk [vmem:[%s5601_s3 + $0x90] sm:$0xff] %vm2406_vm5, %v2375_v40  ;;  %v2327_v5 = vmax.f32 %v1722_v45, %v2278_v38  ;;  %v1560_v33 = vadd.f32 %v5066_v19, %v1559_v49  ;;  %v2116_v55 = vadd.f32 %v5066_v19, %v2115_v32  ;;  %v3460_v58 = vpop.f32.mrb[139].mxu0  ;;  %v3627_v60 = vpop.f32.mrb[139].mxu1 }
 0x201   :  { %v2376_v42 = vmax.f32 %v4837_v4, %v2327_v5  ;;  %v1723_v17 = vmax.f32 %v1560_v33, 0.0  ;;  %v2279_v52 = vmax.f32 %v2116_v55, 0.0 }
 0x202   :  { %v1564_v46 = vpop.f32.mrb[140].mxu0  ;;  %v2120_v6 = vpop.f32.mrb[140].mxu1 }
 0x203   :  { %2426 = vst.msk [vmem:[%s5601_s3 + $0x98] sm:$0xff] %vm2406_vm5, %v2376_v42  ;;  %v2328_v24 = vmax.f32 %v1723_v17, %v2279_v52  ;;  %v1565_v0 = vadd.f32 %v5066_v19, %v1564_v46  ;;  %v2121_v2 = vadd.f32 %v5066_v19, %v2120_v6  ;;  %v3463_v61 = vpop.f32.mrb[141].mxu0  ;;  %v3630_v9 = vpop.f32.mrb[141].mxu1 }
 0x205   :  { %v2377_v18 = vmax.f32 %v4853_v21, %v2328_v24  ;;  %v1724_v7 = vmax.f32 %v1565_v0, 0.0  ;;  %v2280_v4 = vmax.f32 %v2121_v2, 0.0 }
 0x206   :  { %v1569_v22 = vpop.f32.mrb[142].mxu0  ;;  %v2125_v31 = vpop.f32.mrb[142].mxu1 }
 0x207   :  { %2427 = vst.msk [vmem:[%s5601_s3 + $0xa0] sm:$0xff] %vm2406_vm5, %v2377_v18  ;;  %v2329_v54 = vmax.f32 %v1724_v7, %v2280_v4  ;;  %v1570_v25 = vadd.f32 %v5066_v19, %v1569_v22  ;;  %v2126_v27 = vadd.f32 %v5066_v19, %v2125_v31  ;;  %v3466_v57 = vpop.f32.mrb[143].mxu0  ;;  %v3633_v29 = vpop.f32.mrb[143].mxu1 }
 0x209   :  { %v2378_v23 = vmax.f32 %v4869_v37, %v2329_v54  ;;  %v1725_v39 = vmax.f32 %v1570_v25, 0.0  ;;  %v2281_v21 = vmax.f32 %v2126_v27, 0.0 }
 0x20a   :  { %v1574_v35 = vpop.f32.mrb[144].mxu0  ;;  %v2130_v13 = vpop.f32.mrb[144].mxu1 }
 0x20b   :  { %2428 = vst.msk [vmem:[%s5601_s3 + $0xa8] sm:$0xff] %vm2406_vm5, %v2378_v23  ;;  %v2330_v30 = vmax.f32 %v1725_v39, %v2281_v21  ;;  %v1575_v44 = vadd.f32 %v5066_v19, %v1574_v35  ;;  %v2131_v63 = vadd.f32 %v5066_v19, %v2130_v13  ;;  %v3469_v3 = vpop.f32.mrb[145].mxu0  ;;  %v3636_v40 = vpop.f32.mrb[145].mxu1 }
 0x20d   :  { %v2379_v45 = vmax.f32 %v4885_v53, %v2330_v30  ;;  %v1726_v38 = vmax.f32 %v1575_v44, 0.0  ;;  %v2282_v37 = vmax.f32 %v2131_v63, 0.0 }
 0x20e   :  { %v1579_v49 = vpop.f32.mrb[146].mxu0  ;;  %v2135_v32 = vpop.f32.mrb[146].mxu1 }
 0x20f   :  { %2429 = vst.msk [vmem:[%s5601_s3 + $0xb0] sm:$0xff] %vm2406_vm5, %v2379_v45  ;;  %v2331_v5 = vmax.f32 %v1726_v38, %v2282_v37  ;;  %v1580_v33 = vadd.f32 %v5066_v19, %v1579_v49  ;;  %v2136_v55 = vadd.f32 %v5066_v19, %v2135_v32  ;;  %v3472_v58 = vpop.f32.mrb[147].mxu0  ;;  %v3639_v60 = vpop.f32.mrb[147].mxu1 }
 0x211   :  { %v2380_v42 = vmax.f32 %v4901_v8, %v2331_v5  ;;  %v1727_v17 = vmax.f32 %v1580_v33, 0.0  ;;  %v2283_v53 = vmax.f32 %v2136_v55, 0.0 }
 0x212   :  { %v1584_v52 = vpop.f32.mrb[148].mxu0  ;;  %v2140_v46 = vpop.f32.mrb[148].mxu1 }
 0x213   :  { %2430 = vst.msk [vmem:[%s5601_s3 + $0xb8] sm:$0xff] %vm2406_vm5, %v2380_v42  ;;  %v2332_v6 = vmax.f32 %v1727_v17, %v2283_v53  ;;  %v1585_v24 = vadd.f32 %v5066_v19, %v1584_v52  ;;  %v2141_v0 = vadd.f32 %v5066_v19, %v2140_v46  ;;  %v3475_v2 = vpop.f32.mrb[149].mxu0  ;;  %v3642_v61 = vpop.f32.mrb[149].mxu1  ;;  %v5451_v17 = vld [vmem:[%s5600_s2] ss:$0 sm:$0xff] }
 0x215   :  { %v2381_v9 = vmax.f32 %v4917_v26, %v2332_v6  ;;  %v1728_v18 = vmax.f32 %v1585_v24, 0.0  ;;  %v2284_v8 = vmax.f32 %v2141_v0, 0.0 }
 0x216   :  { %v1589_v7 = vpop.f32.mrb[150].mxu0  ;;  %v2145_v4 = vpop.f32.mrb[150].mxu1 }
 0x217   :  { %2431 = vst.msk [vmem:[%s5601_s3 + $0xc0] sm:$0xff] %vm2406_vm5, %v2381_v9  ;;  %v2333_v22 = vmax.f32 %v1728_v18, %v2284_v8  ;;  %v1590_v31 = vadd.f32 %v5066_v19, %v1589_v7  ;;  %v2146_v54 = vadd.f32 %v5066_v19, %v2145_v4  ;;  %v3478_v25 = vpop.f32.mrb[151].mxu0  ;;  %v3645_v27 = vpop.f32.mrb[151].mxu1 }
 0x219   :  { %v2382_v57 = vmax.f32 %v4933_v43, %v2333_v22  ;;  %v1729_v29 = vmax.f32 %v1590_v31, 0.0  ;;  %v2285_v26 = vmax.f32 %v2146_v54, 0.0 }
 0x21a   :  { %v1594_v23 = vpop.f32.mrb[152].mxu0  ;;  %v2150_v39 = vpop.f32.mrb[152].mxu1 }
 0x21b   :  { %2432 = vst.msk [vmem:[%s5601_s3 + $0xc8] sm:$0xff] %vm2406_vm5, %v2382_v57  ;;  %v2334_v21 = vmax.f32 %v1729_v29, %v2285_v26  ;;  %v1595_v35 = vadd.f32 %v5066_v19, %v1594_v23  ;;  %v2151_v13 = vadd.f32 %v5066_v19, %v2150_v39  ;;  %v3481_v30 = vpop.f32.mrb[153].mxu0  ;;  %v3648_v44 = vpop.f32.mrb[153].mxu1 }
 0x21d   :  { %v2383_v63 = vmax.f32 %v4949_v62, %v2334_v21  ;;  %v1730_v3 = vmax.f32 %v1595_v35, 0.0  ;;  %v2286_v43 = vmax.f32 %v2151_v13, 0.0 }
 0x21e   :  { %v1599_v40 = vpop.f32.mrb[154].mxu0  ;;  %v2155_v45 = vpop.f32.mrb[154].mxu1 }
 0x21f   :  { %2433 = vst.msk [vmem:[%s5601_s3 + $0xd0] sm:$0xff] %vm2406_vm5, %v2383_v63  ;;  %v2335_v38 = vmax.f32 %v1730_v3, %v2286_v43  ;;  %v1600_v37 = vadd.f32 %v5066_v19, %v1599_v40  ;;  %v2156_v49 = vadd.f32 %v5066_v19, %v2155_v45  ;;  %v3484_v32 = vpop.f32.mrb[155].mxu0  ;;  %v3651_v5 = vpop.f32.mrb[155].mxu1 }
 0x221   :  { %v2384_v33 = vmax.f32 %v4965_v16, %v2335_v38  ;;  %v1731_v55 = vmax.f32 %v1600_v37, 0.0  ;;  %v2287_v62 = vmax.f32 %v2156_v49, 0.0 }
 0x222   :  { %v1604_v58 = vpop.f32.mrb[156].mxu0  ;;  %v2160_v60 = vpop.f32.mrb[156].mxu1 }
 0x223   :  { %2434 = vst.msk [vmem:[%s5601_s3 + $0xd8] sm:$0xff] %vm2406_vm5, %v2384_v33  ;;  %v2336_v42 = vmax.f32 %v1731_v55, %v2287_v62  ;;  %v1605_v19 = vadd.f32 %v5451_v17, %v1604_v58  ;;  %v2161_v53 = vadd.f32 %v5451_v17, %v2160_v60  ;;  %v3487_v16 = vpop.f32.mrb[157].mxu0  ;;  %v3654_v52 = vpop.f32.mrb[157].mxu1 }
 0x225   :  { %v2385_v46 = vmax.f32 %v4981_v36, %v2336_v42  ;;  %v1732_v6 = vmax.f32 %v1605_v19, 0.0  ;;  %v2288_v24 = vmax.f32 %v2161_v53, 0.0 }
 0x226   :  { %v1609_v0 = vpop.f32.mrb[158].mxu0  ;;  %v2165_v2 = vpop.f32.mrb[158].mxu1 }
 0x227   :  { %2435 = vst.msk [vmem:[%s5601_s3 + $0xe0] sm:$0xff] %vm2406_vm5, %v2385_v46  ;;  %v2337_v61 = vmax.f32 %v1732_v6, %v2288_v24  ;;  %v1610_v9 = vadd.f32 %v5451_v17, %v1609_v0  ;;  %v2166_v18 = vadd.f32 %v5451_v17, %v2165_v2  ;;  %v3490_v8 = vpop.f32.mrb[159].mxu0  ;;  %v3657_v7 = vpop.f32.mrb[159].mxu1 }
 0x229   :  { %v2386_v4 = vmax.f32 %v4997_v56, %v2337_v61  ;;  %v1733_v22 = vmax.f32 %v1610_v9, 0.0  ;;  %v2289_v36 = vmax.f32 %v2166_v18, 0.0 }
 0x22a   :  { %v1614_v31 = vpop.f32.mrb[160].mxu0  ;;  %v2170_v54 = vpop.f32.mrb[160].mxu1 }
 0x22b   :  { %2436 = vst.msk [vmem:[%s5601_s3 + $0xe8] sm:$0xff] %vm2406_vm5, %v2386_v4  ;;  %v2338_v25 = vmax.f32 %v1733_v22, %v2289_v36  ;;  %v1615_v27 = vadd.f32 %v5451_v17, %v1614_v31  ;;  %v2171_v57 = vadd.f32 %v5451_v17, %v2170_v54  ;;  %v3493_v29 = vpop.f32.mrb[161].mxu0  ;;  %v3660_v26 = vpop.f32.mrb[161].mxu1 }
 0x22d   :  { %v2387_v23 = vmax.f32 %v5013_v14, %v2338_v25  ;;  %v1734_v39 = vmax.f32 %v1615_v27, 0.0  ;;  %v2290_v56 = vmax.f32 %v2171_v57, 0.0 }
 0x22e   :  { %v1619_v21 = vpop.f32.mrb[162].mxu0  ;;  %v2175_v35 = vpop.f32.mrb[162].mxu1 }
 0x22f   :  { %2437 = vst.msk [vmem:[%s5601_s3 + $0xf0] sm:$0xff] %vm2406_vm5, %v2387_v23  ;;  %v2339_v13 = vmax.f32 %v1734_v39, %v2290_v56  ;;  %v1620_v30 = vadd.f32 %v5451_v17, %v1619_v21  ;;  %v2176_v44 = vadd.f32 %v5451_v17, %v2175_v35  ;;  %v3496_v63 = vpop.f32.mrb[163].mxu0  ;;  %v3663_v3 = vpop.f32.mrb[163].mxu1 }
 0x231   :  { %v2388_v43 = vmax.f32 %v5029_v34, %v2339_v13  ;;  %v1735_v40 = vmax.f32 %v1620_v30, 0.0  ;;  %v2291_v14 = vmax.f32 %v2176_v44, 0.0 }
 0x232   :  { %v1624_v45 = vpop.f32.mrb[164].mxu0  ;;  %v2180_v38 = vpop.f32.mrb[164].mxu1 }
 0x233   :  { %2438 = vst.msk [vmem:[%s5601_s3 + $0xf8] sm:$0xff] %vm2406_vm5, %v2388_v43  ;;  %v2340_v37 = vmax.f32 %v1735_v40, %v2291_v14  ;;  %v1625_v49 = vadd.f32 %v5451_v17, %v1624_v45  ;;  %v2181_v32 = vadd.f32 %v5451_v17, %v2180_v38  ;;  %v3499_v5 = vpop.f32.mrb[165].mxu0  ;;  %v3666_v33 = vpop.f32.mrb[165].mxu1 }
 0x235   :  { %v2389_v55 = vmax.f32 %v5045_v59, %v2340_v37  ;;  %v1736_v62 = vmax.f32 %v1625_v49, 0.0  ;;  %v2292_v34 = vmax.f32 %v2181_v32, 0.0 }
 0x236   :  { %v1629_v58 = vpop.f32.mrb[166].mxu0  ;;  %v2185_v60 = vpop.f32.mrb[166].mxu1 }
 0x237   :  { %2439 = vst.msk [vmem:[%s5601_s3 + $0x100] sm:$0xff] %vm2406_vm5, %v2389_v55  ;;  %v2341_v42 = vmax.f32 %v1736_v62, %v2292_v34  ;;  %v1630_v19 = vadd.f32 %v5451_v17, %v1629_v58  ;;  %v2186_v53 = vadd.f32 %v5451_v17, %v2185_v60  ;;  %v3502_v16 = vpop.f32.mrb[167].mxu0  ;;  %v3669_v52 = vpop.f32.mrb[167].mxu1 }
 0x239   :  { %v2390_v46 = vmax.f32 %v5061_v15, %v2341_v42  ;;  %v1737_v6 = vmax.f32 %v1630_v19, 0.0  ;;  %v2293_v59 = vmax.f32 %v2186_v53, 0.0 }
 0x23a   :  { %v1634_v24 = vpop.f32.mrb[168].mxu0  ;;  %v2190_v0 = vpop.f32.mrb[168].mxu1 }
 0x23b   :  { %2440 = vst.msk [vmem:[%s5601_s3 + $0x108] sm:$0xff] %vm2406_vm5, %v2390_v46  ;;  %v2342_v2 = vmax.f32 %v1737_v6, %v2293_v59  ;;  %v1635_v61 = vadd.f32 %v5451_v17, %v1634_v24  ;;  %v2191_v9 = vadd.f32 %v5451_v17, %v2190_v0  ;;  %v3505_v18 = vpop.f32.mrb[169].mxu0  ;;  %v3672_v8 = vpop.f32.mrb[169].mxu1 }
 0x23d   :  { %v2391_v7 = vmax.f32 %v5082_v41, %v2342_v2  ;;  %v1738_v4 = vmax.f32 %v1635_v61, 0.0  ;;  %v2294_v15 = vmax.f32 %v2191_v9, 0.0 }
 0x23e   :  { %v1639_v22 = vpop.f32.mrb[170].mxu0  ;;  %v2195_v36 = vpop.f32.mrb[170].mxu1 }
 0x23f   :  { %2441 = vst.msk [vmem:[%s5601_s3 + $0x110] sm:$0xff] %vm2406_vm5, %v2391_v7  ;;  %v2343_v31 = vmax.f32 %v1738_v4, %v2294_v15  ;;  %v1640_v54 = vadd.f32 %v5451_v17, %v1639_v22  ;;  %v2196_v25 = vadd.f32 %v5451_v17, %v2195_v36  ;;  %v3508_v27 = vpop.f32.mrb[171].mxu0  ;;  %v3675_v57 = vpop.f32.mrb[171].mxu1 }
 0x241   :  { %v2392_v29 = vmax.f32 %v5098_v1, %v2343_v31  ;;  %v1739_v26 = vmax.f32 %v1640_v54, 0.0  ;;  %v2295_v41 = vmax.f32 %v2196_v25, 0.0 }
 0x242   :  { %v1644_v23 = vpop.f32.mrb[172].mxu0  ;;  %v2200_v39 = vpop.f32.mrb[172].mxu1 }
 0x243   :  { %2442 = vst.msk [vmem:[%s5601_s3 + $0x118] sm:$0xff] %vm2406_vm5, %v2392_v29  ;;  %v2344_v56 = vmax.f32 %v1739_v26, %v2295_v41  ;;  %v1645_v21 = vadd.f32 %v5451_v17, %v1644_v23  ;;  %v2201_v35 = vadd.f32 %v5451_v17, %v2200_v39  ;;  %v3511_v13 = vpop.f32.mrb[173].mxu0  ;;  %v3678_v30 = vpop.f32.mrb[173].mxu1 }
 0x245   :  { %v2393_v44 = vmax.f32 %v5114_v28, %v2344_v56  ;;  %v1740_v63 = vmax.f32 %v1645_v21, 0.0  ;;  %v2296_v1 = vmax.f32 %v2201_v35, 0.0 }
 0x246   :  { %v1649_v3 = vpop.f32.mrb[174].mxu0  ;;  %v2205_v43 = vpop.f32.mrb[174].mxu1 }
 0x247   :  { %2443 = vst.msk [vmem:[%s5601_s3 + $0x120] sm:$0xff] %vm2406_vm5, %v2393_v44  ;;  %v2345_v40 = vmax.f32 %v1740_v63, %v2296_v1  ;;  %v1650_v14 = vadd.f32 %v5451_v17, %v1649_v3  ;;  %v2206_v45 = vadd.f32 %v5451_v17, %v2205_v43  ;;  %v3514_v38 = vpop.f32.mrb[175].mxu0  ;;  %v3681_v37 = vpop.f32.mrb[175].mxu1 }
 0x249   :  { %v2394_v49 = vmax.f32 %v5130_v51, %v2345_v40  ;;  %v1741_v32 = vmax.f32 %v1650_v14, 0.0  ;;  %v2297_v28 = vmax.f32 %v2206_v45, 0.0 }
 0x24a   :  { %v1654_v5 = vpop.f32.mrb[176].mxu0  ;;  %v2210_v33 = vpop.f32.mrb[176].mxu1 }
 0x24b   :  { %2444 = vst.msk [vmem:[%s5601_s3 + $0x128] sm:$0xff] %vm2406_vm5, %v2394_v49  ;;  %v2346_v55 = vmax.f32 %v1741_v32, %v2297_v28  ;;  %v1655_v62 = vadd.f32 %v5451_v17, %v1654_v5  ;;  %v2211_v34 = vadd.f32 %v5451_v17, %v2210_v33  ;;  %v3517_v58 = vpop.f32.mrb[177].mxu0  ;;  %v3684_v60 = vpop.f32.mrb[177].mxu1 }
 0x24c   :  { %v5608_v60 = vld [vmem:[#allocation2_spill] sm:$0xff] }
 0x24d   :  { %v2395_v42 = vmax.f32 %v5146_v20, %v2346_v55  ;;  %v1742_v19 = vmax.f32 %v1655_v62, 0.0  ;;  %v2298_v51 = vmax.f32 %v2211_v34, 0.0 }
 0x24e   :  { %v1659_v53 = vpop.f32.mrb[178].mxu0  ;;  %v2215_v16 = vpop.f32.mrb[178].mxu1 }
 0x24f   :  { %2445 = vst.msk [vmem:[%s5601_s3 + $0x130] sm:$0xff] %vm2406_vm5, %v2395_v42  ;;  %v2347_v52 = vmax.f32 %v1742_v19, %v2298_v51  ;;  %v1660_v46 = vadd.f32 %v5451_v17, %v1659_v53  ;;  %v2216_v6 = vadd.f32 %v5451_v17, %v2215_v16  ;;  %v3520_v59 = vpop.f32.mrb[179].mxu0  ;;  %v3687_v24 = vpop.f32.mrb[179].mxu1 }
 0x250   :  { %v5609_v24 = vld [vmem:[#allocation3_spill] sm:$0xff] }
 0x251   :  { %v2396_v0 = vmax.f32 %v5162_v48, %v2347_v52  ;;  %v1743_v2 = vmax.f32 %v1660_v46, 0.0  ;;  %v2299_v20 = vmax.f32 %v2216_v6, 0.0 }
 0x252   :  { %v1664_v61 = vpop.f32.mrb[180].mxu0  ;;  %v2220_v9 = vpop.f32.mrb[180].mxu1 }
 0x253   :  { %2446 = vst.msk [vmem:[%s5601_s3 + $0x138] sm:$0xff] %vm2406_vm5, %v2396_v0  ;;  %v2348_v18 = vmax.f32 %v1743_v2, %v2299_v20  ;;  %v1665_v8 = vadd.f32 %v5451_v17, %v1664_v61  ;;  %v2221_v7 = vadd.f32 %v5451_v17, %v2220_v9  ;;  %v3523_v4 = vpop.f32.mrb[181].mxu0  ;;  %v3690_v15 = vpop.f32.mrb[181].mxu1 }
 0x255   :  { %v2397_v22 = vmax.f32 %v5178_v11, %v2348_v18  ;;  %v1744_v36 = vmax.f32 %v1665_v8, 0.0  ;;  %v2300_v48 = vmax.f32 %v2221_v7, 0.0 }
 0x256   :  { %v1669_v31 = vpop.f32.mrb[182].mxu0  ;;  %v2225_v54 = vpop.f32.mrb[182].mxu1 }
 0x257   :  { %2447 = vst.msk [vmem:[%s5601_s3 + $0x140] sm:$0xff] %vm2406_vm5, %v2397_v22  ;;  %v2349_v25 = vmax.f32 %v1744_v36, %v2300_v48  ;;  %v1670_v27 = vadd.f32 %v5451_v17, %v1669_v31  ;;  %v2226_v57 = vadd.f32 %v5451_v17, %v2225_v54  ;;  %v3526_v29 = vpop.f32.mrb[183].mxu0  ;;  %v3693_v26 = vpop.f32.mrb[183].mxu1  ;;  %v5610_v22 = vld [vmem:[#allocation4_spill] sm:$0xff] }
 0x259   :  { %v2398_v41 = vmax.f32 %v5194_v47, %v2349_v25  ;;  %v1745_v23 = vmax.f32 %v1670_v27, 0.0  ;;  %v2301_v11 = vmax.f32 %v2226_v57, 0.0 }
 0x25a   :  { %v1674_v39 = vpop.f32.mrb[184].mxu0  ;;  %v2230_v56 = vpop.f32.mrb[184].mxu1 }
 0x25b   :  { %2448 = vst.msk [vmem:[%s5601_s3 + $0x148] sm:$0xff] %vm2406_vm5, %v2398_v41  ;;  %v2350_v21 = vmax.f32 %v1745_v23, %v2301_v11  ;;  %v1675_v35 = vadd.f32 %v5451_v17, %v1674_v39  ;;  %v2231_v13 = vadd.f32 %v5451_v17, %v2230_v56  ;;  %v3529_v30 = vpop.f32.mrb[185].mxu0  ;;  %v3696_v44 = vpop.f32.mrb[185].mxu1  ;;  %v5611_v23 = vld [vmem:[#allocation5_spill] sm:$0xff] }
 0x25d   :  { %v2399_v63 = vmax.f32 %v5210_v12, %v2350_v21  ;;  %v1746_v1 = vmax.f32 %v1675_v35, 0.0  ;;  %v2302_v47 = vmax.f32 %v2231_v13, 0.0 }
 0x25e   :  { %v1679_v3 = vpop.f32.mrb[186].mxu0  ;;  %v2235_v43 = vpop.f32.mrb[186].mxu1 }
 0x25f   :  { %2449 = vst.msk [vmem:[%s5601_s3 + $0x150] sm:$0xff] %vm2406_vm5, %v2399_v63  ;;  %v2351_v40 = vmax.f32 %v1746_v1, %v2302_v47  ;;  %v1680_v14 = vadd.f32 %v5451_v17, %v1679_v3  ;;  %v2236_v45 = vadd.f32 %v5451_v17, %v2235_v43  ;;  %v3532_v38 = vpop.f32.mrb[187].mxu0  ;;  %v3699_v37 = vpop.f32.mrb[187].mxu1 }
 0x261   :  { %v2400_v49 = vmax.f32 %v5226_v50, %v2351_v40  ;;  %v1747_v32 = vmax.f32 %v1680_v14, 0.0  ;;  %v2303_v12 = vmax.f32 %v2236_v45, 0.0 }
 0x262   :  { %v1684_v28 = vpop.f32.mrb[188].mxu0  ;;  %v2240_v5 = vpop.f32.mrb[188].mxu1 }
 0x263   :  { %2450 = vst.msk [vmem:[%s5601_s3 + $0x158] sm:$0xff] %vm2406_vm5, %v2400_v49  ;;  %v2352_v33 = vmax.f32 %v1747_v32, %v2303_v12  ;;  %v1685_v55 = vadd.f32 %v5451_v17, %v1684_v28  ;;  %v2241_v62 = vadd.f32 %v5451_v17, %v2240_v5  ;;  %v3535_v34 = vpop.f32.mrb[189].mxu0  ;;  %v3702_v58 = vpop.f32.mrb[189].mxu1 }
 0x265   :  { %v2401_v42 = vmax.f32 %v5608_v60, %v2352_v33  ;;  %v1748_v19 = vmax.f32 %v1685_v55, 0.0  ;;  %v2304_v50 = vmax.f32 %v2241_v62, 0.0 }
 0x266   :  { %v1689_v51 = vpop.f32.mrb[190].mxu0  ;;  %v2245_v53 = vpop.f32.mrb[190].mxu1 }
 0x267   :  { %2451 = vst.msk [vmem:[%s5601_s3 + $0x160] sm:$0xff] %vm2406_vm5, %v2401_v42  ;;  %v2353_v16 = vmax.f32 %v1748_v19, %v2304_v50  ;;  %v1690_v52 = vadd.f32 %v5451_v17, %v1689_v51  ;;  %v2246_v46 = vadd.f32 %v5451_v17, %v2245_v53  ;;  %v3538_v6 = vpop.f32.mrb[191].mxu0  ;;  %v3705_v59 = vpop.f32.mrb[191].mxu1 }
 0x269   :  { %v2402_v0 = vmax.f32 %v5609_v24, %v2353_v16  ;;  %v1749_v2 = vmax.f32 %v1690_v52, 0.0  ;;  %v2305_v20 = vmax.f32 %v2246_v46, 0.0 }
 0x26a   :  { %v1694_v61 = vpop.f32.mrb[192].mxu0  ;;  %v2250_v9 = vpop.f32.mrb[192].mxu1 }
 0x26b   :  { %2452 = vst.msk [vmem:[%s5601_s3 + $0x168] sm:$0xff] %vm2406_vm5, %v2402_v0  ;;  %v2354_v18 = vmax.f32 %v1749_v2, %v2305_v20  ;;  %v1695_v8 = vadd.f32 %v5451_v17, %v1694_v61  ;;  %v2251_v7 = vadd.f32 %v5451_v17, %v2250_v9  ;;  %v3541_v4 = vpop.f32.mrb[193].mxu0  ;;  %v3708_v15 = vpop.f32.mrb[193].mxu1 }
 0x26d   :  { %v2403_v36 = vmax.f32 %v5610_v22, %v2354_v18  ;;  %v1750_v48 = vmax.f32 %v1695_v8, 0.0  ;;  %v2306_v31 = vmax.f32 %v2251_v7, 0.0 }
 0x26e   :  { %v1699_v54 = vpop.f32.mrb[194].mxu0  ;;  %v2255_v25 = vpop.f32.mrb[194].mxu1 }
 0x26f   :  { %2453 = vst.msk [vmem:[%s5601_s3 + $0x170] sm:$0xff] %vm2406_vm5, %v2403_v36  ;;  %v2355_v27 = vmax.f32 %v1750_v48, %v2306_v31  ;;  %v1700_v57 = vadd.f32 %v5451_v17, %v1699_v54  ;;  %v2256_v29 = vadd.f32 %v5451_v17, %v2255_v25  ;;  %v3544_v26 = vpop.f32.mrb[195].mxu0  ;;  %v3711_v41 = vpop.f32.mrb[195].mxu1 }
 0x271   :  { %v2404_v11 = vmax.f32 %v5611_v23, %v2355_v27  ;;  %v1751_v39 = vmax.f32 %v1700_v57, 0.0  ;;  %v2307_v56 = vmax.f32 %v2256_v29, 0.0 }
 0x273   :  { %2454 = vst.msk [vmem:[%s5601_s3 + $0x178] sm:$0xff] %vm2406_vm5, %v2404_v11  ;;  %v2356_v21 = vmax.f32 %v1751_v39, %v2307_v56 }
 0x275   :  { %v2405_v35 = vmax.f32 %v5248_v10, %v2356_v21 }
 0x277   :  { %2455 = vst.msk [vmem:[%s5601_s3 + $0x180] sm:$0xff] %vm2406_vm5, %v2405_v35 }

// kernel: mynet_forward.4
= control target key start
LH: loop header
LB: loop body
LE: loop exit
PB: predicated region body
PF: predicated region fallthrough
CT: control target
= control target key end

     0   :  { %v835_v0 = vmov 0.0|0.0   ;;  %vm54_vm0 = vcmask 179200   ;;  %v836_v30 = vmov 0.0   ;;  %vm76_vm1 = vcmask 1045504   ;;  %s1295_s1 = inlined_call_operand.vmem [shape: f32[150,16], index: 1, kind: input, shape index: {}]   ;;  %s1296_s0 = inlined_call_operand.vmem [shape: f32[4,50,150], index: 0, kind: input, shape index: {}]   ;;  %s1297_s2 = inlined_call_operand.vmem [shape: f32[1,16], index: 2, kind: input, shape index: {}]   ;;  %s1298_s3 = inlined_call_operand.vmem [shape: f32[50,16], index: 3, kind: output, shape index: {}]  }
   0x1   :  { %725 = vmatprep.subr.bf16.mxu0 %v835_v0  ;;  %752 = vmatprep.subr.bf16.mxu1 %v835_v0  ;;  %v14_v1 = vld [vmem:[%s1295_s1] sm:$0xff]  ;;  %v15_v2 = vld [vmem:[%s1295_s1 + $0x8] sm:$0xff]  ;;  %v16_v3 = vld [vmem:[%s1295_s1 + $0x10] sm:$0xff]  ;;  %vm637_vm2 = vcmask 130048   ;;  %vm644_vm3 = vcmask 123904  }
   0x2   :  { %v868_v4 = vpack.c.bf16 %v15_v2, %v14_v1  ;;  %v17_v5 = vld [vmem:[%s1295_s1 + $0x18] sm:$0xff]  ;;  %v18_v7 = vld [vmem:[%s1295_s1 + $0x20] sm:$0xff]  ;;  %v19_v8 = vld [vmem:[%s1295_s1 + $0x28] sm:$0xff] }
   0x3   :  { %v875_v6 = vpack.c.bf16 %v17_v5, %v16_v3  ;;  %v35_v9 = vld [vmem:[%s1296_s0 + $0x8] sm:$0xff]  ;;  %v660_v10 = vld [vmem:[%s1296_s0 + $0x78] sm:$0xff]  ;;  %v893_v11 = vpack.c.bf16 %v19_v8, %v18_v7  ;;  %v20_v12 = vld [vmem:[%s1295_s1 + $0x30] sm:$0xff] }
   0x4   :  { %727 = vmatpush1.bf16.msra.mxu0 %v868_v4  ;;  %754 = vmatpush1.bf16.msra.mxu1 %v868_v4  ;;  %v21_v13 = vld [vmem:[%s1295_s1 + $0x38] sm:$0xff]  ;;  %v22_v15 = vld [vmem:[%s1295_s1 + $0x40] sm:$0xff]  ;;  %v23_v16 = vld [vmem:[%s1295_s1 + $0x48] sm:$0xff] }
   0x5   :  { %728 = vmatprep.subr.bf16.mxu0 %v835_v0  ;;  %755 = vmatprep.subr.bf16.mxu1 %v835_v0  ;;  %v907_v14 = vpack.c.bf16 %v21_v13, %v20_v12  ;;  %v919_v17 = vpack.c.bf16 %v23_v16, %v22_v15  ;;  %v24_v18 = vld [vmem:[%s1295_s1 + $0x50] sm:$0xff]  ;;  %v25_v19 = vld [vmem:[%s1295_s1 + $0x58] sm:$0xff]  ;;  %v26_v21 = vld [vmem:[%s1295_s1 + $0x60] sm:$0xff] }
   0x6   :  { %652 = vmatprep.mubr.msk.f32.mxu0 %vm54_vm0, %v35_v9  ;;  %674 = vmatprep.mubr.msk.f32.mxu1 %vm54_vm0, %v660_v10  ;;  %v931_v20 = vpack.c.bf16 %v25_v19, %v24_v18  ;;  %v27_v22 = vld [vmem:[%s1295_s1 + $0x68] sm:$0xff]  ;;  %v28_v24 = vld [vmem:[%s1295_s1 + $0x70] sm:$0xff]  ;;  %v29_v25 = vld [vmem:[%s1295_s1 + $0x78] sm:$0xff] }
   0x7   :  { %v943_v23 = vpack.c.bf16 %v27_v22, %v26_v21  ;;  %v955_v26 = vpack.c.bf16 %v29_v25, %v28_v24  ;;  %v30_v27 = vld [vmem:[%s1295_s1 + $0x80] sm:$0xff]  ;;  %v31_v28 = vld [vmem:[%s1295_s1 + $0x88] sm:$0xff]  ;;  %v978_v31 = vld [vmem:[%s1295_s1 + $0x90] sm:$0x3f] }
   0x8   :  { %730 = vmatpush1.bf16.msra.mxu0 %v875_v6  ;;  %757 = vmatpush1.bf16.msra.mxu1 %v875_v6  ;;  %v967_v29 = vpack.c.bf16 %v31_v28, %v30_v27  ;;  %v34_v32 = vld [vmem:[%s1296_s0] sm:$0xff]  ;;  %v659_v33 = vld [vmem:[%s1296_s0 + $0x70] sm:$0xff]  ;;  %v37_v34 = vld [vmem:[%s1296_s0 + $0x18] sm:$0xff] }
   0x9   :  { %731 = vmatprep.subr.bf16.mxu0 %v835_v0  ;;  %758 = vmatprep.subr.bf16.mxu1 %v835_v0  ;;  %v662_v35 = vld [vmem:[%s1296_s0 + $0x88] sm:$0xff]  ;;  %v36_v36 = vld [vmem:[%s1296_s0 + $0x10] sm:$0xff]  ;;  %v661_v37 = vld [vmem:[%s1296_s0 + $0x80] sm:$0xff] }
   0xa   :  { %v39_v38 = vld [vmem:[%s1296_s0 + $0x28] sm:$0xff]  ;;  %v664_v39 = vld [vmem:[%s1296_s0 + $0x98] sm:$0xff]  ;;  %v38_v40 = vld [vmem:[%s1296_s0 + $0x20] sm:$0xff] }
   0xb   :  { %v663_v41 = vld [vmem:[%s1296_s0 + $0x90] sm:$0xff]  ;;  %v41_v42 = vld [vmem:[%s1296_s0 + $0x38] sm:$0xff]  ;;  %v666_v43 = vld [vmem:[%s1296_s0 + $0xa8] sm:$0xff] }
   0xc   :  { %733 = vmatpush1.bf16.msra.mxu0 %v893_v11  ;;  %760 = vmatpush1.bf16.msra.mxu1 %v893_v11  ;;  %v40_v44 = vld [vmem:[%s1296_s0 + $0x30] sm:$0xff]  ;;  %v665_v45 = vld [vmem:[%s1296_s0 + $0xa0] sm:$0xff]  ;;  %v43_v46 = vld [vmem:[%s1296_s0 + $0x48] sm:$0xff] }
   0xd   :  { %734 = vmatprep.subr.bf16.mxu0 %v835_v0  ;;  %761 = vmatprep.subr.bf16.mxu1 %v835_v0  ;;  %v668_v47 = vld [vmem:[%s1296_s0 + $0xb8] sm:$0xff]  ;;  %v42_v48 = vld [vmem:[%s1296_s0 + $0x40] sm:$0xff]  ;;  %v667_v49 = vld [vmem:[%s1296_s0 + $0xb0] sm:$0xff] }
   0xe   :  { %v45_v50 = vld [vmem:[%s1296_s0 + $0x58] sm:$0xff]  ;;  %v670_v51 = vld [vmem:[%s1296_s0 + $0xc8] sm:$0xff]  ;;  %v44_v52 = vld [vmem:[%s1296_s0 + $0x50] sm:$0xff] }
   0xf   :  { %v669_v53 = vld [vmem:[%s1296_s0 + $0xc0] sm:$0xff]  ;;  %v47_v54 = vld [vmem:[%s1296_s0 + $0x68] sm:$0x3]  ;;  %v672_v55 = vld [vmem:[%s1296_s0 + $0xd8] sm:$0x3] }
  0x10   :  { %736 = vmatpush1.bf16.msra.mxu0 %v907_v14  ;;  %763 = vmatpush1.bf16.msra.mxu1 %v907_v14  ;;  %v46_v56 = vld [vmem:[%s1296_s0 + $0x60] sm:$0x3]  ;;  %v671_v57 = vld [vmem:[%s1296_s0 + $0xd0] sm:$0x3]  ;;  %v682_v58 = vld [vmem:[%s1296_s0 + $0xe8] sm:$0xff] }
  0x11   :  { %737 = vmatprep.subr.bf16.mxu0 %v835_v0  ;;  %764 = vmatprep.subr.bf16.mxu1 %v835_v0  ;;  %v704_v59 = vld [vmem:[%s1296_s0 + $0x158] sm:$0xff]  ;;  %v681_v60 = vld [vmem:[%s1296_s0 + $0xe0] sm:$0xff]  ;;  %v703_v61 = vld [vmem:[%s1296_s0 + $0x150] sm:$0xff] }
  0x12   :  { %v684_v62 = vld [vmem:[%s1296_s0 + $0xf8] sm:$0xff]  ;;  %v706_v63 = vld [vmem:[%s1296_s0 + $0x168] sm:$0xff]  ;;  %v705_v1 = vld [vmem:[%s1296_s0 + $0x160] sm:$0xff] }
  0x13   :  { %v686_v2 = vld [vmem:[%s1296_s0 + $0x108] sm:$0xff]  ;;  %v708_v3 = vld [vmem:[%s1296_s0 + $0x178] sm:$0xff]  ;;  %v707_v5 = vld [vmem:[%s1296_s0 + $0x170] sm:$0xff] }
  0x14   :  { %739 = vmatpush1.bf16.msra.mxu0 %v919_v17  ;;  %766 = vmatpush1.bf16.msra.mxu1 %v919_v17  ;;  %v710_v7 = vld [vmem:[%s1296_s0 + $0x188] sm:$0xff]  ;;  %v687_v8 = vld [vmem:[%s1296_s0 + $0x110] sm:$0xff]  ;;  %v709_v9 = vld [vmem:[%s1296_s0 + $0x180] sm:$0xff] }
  0x15   :  { %740 = vmatprep.subr.bf16.mxu0 %v835_v0  ;;  %767 = vmatprep.subr.bf16.mxu1 %v835_v0  ;;  %v690_v10 = vld [vmem:[%s1296_s0 + $0x128] sm:$0xff]  ;;  %v689_v12 = vld [vmem:[%s1296_s0 + $0x120] sm:$0xff]  ;;  %v711_v13 = vld [vmem:[%s1296_s0 + $0x190] sm:$0xff] }
  0x16   :  { %v714_v15 = vld [vmem:[%s1296_s0 + $0x1a8] sm:$0xff]  ;;  %v691_v16 = vld [vmem:[%s1296_s0 + $0x130] sm:$0xff]  ;;  %v716_v19 = vld [vmem:[%s1296_s0 + $0x1b8] sm:$0x3] }
  0x17   :  { %v694_v18 = vld [vmem:[%s1296_s0 + $0x148] sm:$0x3]  ;;  %v715_v21 = vld [vmem:[%s1296_s0 + $0x1b0] sm:$0x3]  ;;  %v1217_v22 = vld [vmem:[%s1297_s2] ss:$0 sm:$0xff] }
  0x18   :  { %742 = vmatpush1.bf16.msra.mxu0 %v931_v20  ;;  %769 = vmatpush1.bf16.msra.mxu1 %v931_v20 }
  0x19   :  { %743 = vmatprep.subr.bf16.mxu0 %v835_v0  ;;  %770 = vmatprep.subr.bf16.mxu1 %v835_v0 }
  0x1c   :  { %745 = vmatpush1.bf16.msra.mxu0 %v943_v23  ;;  %772 = vmatpush1.bf16.msra.mxu1 %v943_v23 }
  0x1d   :  { %746 = vmatprep.subr.bf16.mxu0 %v835_v0  ;;  %773 = vmatprep.subr.bf16.mxu1 %v835_v0 }
  0x20   :  { %748 = vmatpush1.bf16.msra.mxu0 %v955_v26  ;;  %775 = vmatpush1.bf16.msra.mxu1 %v955_v26 }
  0x21   :  { %749 = vmatprep.subr.bf16.mxu0 %v835_v0  ;;  %776 = vmatprep.subr.bf16.mxu1 %v835_v0 }
  0x24   :  { %751 = vmatpush1.bf16.msra.mxu0 %v967_v29  ;;  %778 = vmatpush1.bf16.msra.mxu1 %v967_v29 }
  0x25   :  { %116 = vmatprep.subr.mxu0 %v836_v30  ;;  %259 = vmatprep.subr.mxu1 %v836_v30 }
  0x28   :  { %651 = vmatpush1.msk.msra.mxu0 %vm76_vm1, %v978_v31  ;;  %673 = vmatpush1.msk.msra.mxu1 %vm76_vm1, %v978_v31 }
  0x29   :  { %145 = vmatmul.mubr.f32.vlgmr.msra.gmra.mrb[0].mxu0 %v34_v32  ;;  %288 = vmatmul.mubr.f32.vlgmr.msra.gmra.mrb[0].mxu1 %v659_v33 }
  0x2a   :  { %779 = vmatprep.subr.bf16.mxu0 %v835_v0  ;;  %806 = vmatprep.subr.bf16.mxu1 %v835_v0 }
  0x2b   :  { %781 = vmatpush1.bf16.msra.mxu0 %v868_v4  ;;  %808 = vmatpush1.bf16.msra.mxu1 %v868_v4  ;;  %v685_v4 = vld [vmem:[%s1296_s0 + $0x100] sm:$0xff] }
  0x2c   :  { %782 = vmatprep.subr.bf16.mxu0 %v835_v0  ;;  %809 = vmatprep.subr.bf16.mxu1 %v835_v0 }
  0x2d   :  { %653 = vmatprep.mubr.msk.f32.mxu0 %vm54_vm0, %v37_v34  ;;  %675 = vmatprep.mubr.msk.f32.mxu1 %vm54_vm0, %v662_v35 }
  0x2e   :  { %150 = vmatmul.mubr.f32.gmra.mrb[2].mxu0 %v36_v36  ;;  %293 = vmatmul.mubr.f32.gmra.mrb[2].mxu1 %v661_v37 }
  0x2f   :  { %784 = vmatpush1.bf16.msra.mxu0 %v875_v6  ;;  %811 = vmatpush1.bf16.msra.mxu1 %v875_v6  ;;  %v688_v6 = vld [vmem:[%s1296_s0 + $0x118] sm:$0xff] }
  0x30   :  { %785 = vmatprep.subr.bf16.mxu0 %v835_v0  ;;  %812 = vmatprep.subr.bf16.mxu1 %v835_v0 }
  0x31   :  { %654 = vmatprep.mubr.msk.f32.mxu0 %vm54_vm0, %v39_v38  ;;  %676 = vmatprep.mubr.msk.f32.mxu1 %vm54_vm0, %v664_v39 }
  0x32   :  { %155 = vmatmul.mubr.f32.gmra.mrb[4].mxu0 %v38_v40  ;;  %298 = vmatmul.mubr.f32.gmra.mrb[4].mxu1 %v663_v41 }
  0x33   :  { %787 = vmatpush1.bf16.msra.mxu0 %v893_v11  ;;  %814 = vmatpush1.bf16.msra.mxu1 %v893_v11  ;;  %v712_v11 = vld [vmem:[%s1296_s0 + $0x198] sm:$0xff] }
  0x34   :  { %788 = vmatprep.subr.bf16.mxu0 %v835_v0  ;;  %815 = vmatprep.subr.bf16.mxu1 %v835_v0 }
  0x35   :  { %655 = vmatprep.mubr.msk.f32.mxu0 %vm54_vm0, %v41_v42  ;;  %677 = vmatprep.mubr.msk.f32.mxu1 %vm54_vm0, %v666_v43 }
  0x36   :  { %160 = vmatmul.mubr.f32.gmra.mrb[6].mxu0 %v40_v44  ;;  %303 = vmatmul.mubr.f32.gmra.mrb[6].mxu1 %v665_v45 }
  0x37   :  { %790 = vmatpush1.bf16.msra.mxu0 %v907_v14  ;;  %817 = vmatpush1.bf16.msra.mxu1 %v907_v14  ;;  %v692_v14 = vld [vmem:[%s1296_s0 + $0x138] sm:$0xff] }
  0x38   :  { %791 = vmatprep.subr.bf16.mxu0 %v835_v0  ;;  %818 = vmatprep.subr.bf16.mxu1 %v835_v0 }
  0x39   :  { %656 = vmatprep.mubr.msk.f32.mxu0 %vm54_vm0, %v43_v46  ;;  %678 = vmatprep.mubr.msk.f32.mxu1 %vm54_vm0, %v668_v47 }
  0x3a   :  { %165 = vmatmul.mubr.f32.gmra.mrb[8].mxu0 %v42_v48  ;;  %308 = vmatmul.mubr.f32.gmra.mrb[8].mxu1 %v667_v49 }
  0x3b   :  { %793 = vmatpush1.bf16.msra.mxu0 %v919_v17  ;;  %820 = vmatpush1.bf16.msra.mxu1 %v919_v17  ;;  %v713_v17 = vld [vmem:[%s1296_s0 + $0x1a0] sm:$0xff] }
  0x3c   :  { %794 = vmatprep.subr.bf16.mxu0 %v835_v0  ;;  %821 = vmatprep.subr.bf16.mxu1 %v835_v0 }
  0x3d   :  { %657 = vmatprep.mubr.msk.f32.mxu0 %vm54_vm0, %v45_v50  ;;  %679 = vmatprep.mubr.msk.f32.mxu1 %vm54_vm0, %v670_v51 }
  0x3e   :  { %170 = vmatmul.mubr.f32.gmra.mrb[10].mxu0 %v44_v52  ;;  %313 = vmatmul.mubr.f32.gmra.mrb[10].mxu1 %v669_v53 }
  0x3f   :  { %796 = vmatpush1.bf16.msra.mxu0 %v931_v20  ;;  %823 = vmatpush1.bf16.msra.mxu1 %v931_v20  ;;  %v693_v20 = vld [vmem:[%s1296_s0 + $0x140] sm:$0x3] }
  0x40   :  { %797 = vmatprep.subr.bf16.mxu0 %v835_v0  ;;  %824 = vmatprep.subr.bf16.mxu1 %v835_v0 }
  0x41   :  { %658 = vmatprep.mubr.msk.f32.mxu0 %vm54_vm0, %v47_v54  ;;  %680 = vmatprep.mubr.msk.f32.mxu1 %vm54_vm0, %v672_v55 }
  0x42   :  { %175 = vmatmul.mubr.f32.gmra.mrb[12].mxu0 %v46_v56  ;;  %318 = vmatmul.mubr.f32.gmra.mrb[12].mxu1 %v671_v57 }
  0x43   :  { %799 = vmatpush1.bf16.msra.mxu0 %v943_v23  ;;  %826 = vmatpush1.bf16.msra.mxu1 %v943_v23 }
  0x44   :  { %800 = vmatprep.subr.bf16.mxu0 %v835_v0  ;;  %827 = vmatprep.subr.bf16.mxu1 %v835_v0 }
  0x45   :  { %696 = vmatprep.mubr.msk.f32.mxu0 %vm54_vm0, %v682_v58  ;;  %718 = vmatprep.mubr.msk.f32.mxu1 %vm54_vm0, %v704_v59 }
  0x47   :  { %802 = vmatpush1.bf16.msra.mxu0 %v955_v26  ;;  %829 = vmatpush1.bf16.msra.mxu1 %v955_v26 }
  0x48   :  { %803 = vmatprep.subr.bf16.mxu0 %v835_v0  ;;  %830 = vmatprep.subr.bf16.mxu1 %v835_v0  ;;  %v683_v0 = vld [vmem:[%s1296_s0 + $0xf0] sm:$0xff] }
  0x4b   :  { %805 = vmatpush1.bf16.msra.mxu0 %v967_v29  ;;  %832 = vmatpush1.bf16.msra.mxu1 %v967_v29 }
  0x4c   :  { %409 = vmatprep.subr.mxu0 %v836_v30  ;;  %552 = vmatprep.subr.mxu1 %v836_v30 }
  0x4f   :  { %695 = vmatpush1.msk.msra.mxu0 %vm76_vm1, %v978_v31  ;;  %717 = vmatpush1.msk.msra.mxu1 %vm76_vm1, %v978_v31 }
  0x50   :  { %438 = vmatmul.mubr.f32.vlgmr.msra.gmra.mrb[14].mxu0 %v681_v60  ;;  %581 = vmatmul.mubr.f32.vlgmr.msra.gmra.mrb[14].mxu1 %v703_v61 }
  0x51   :  { %697 = vmatprep.mubr.msk.f32.mxu0 %vm54_vm0, %v684_v62  ;;  %719 = vmatprep.mubr.msk.f32.mxu1 %vm54_vm0, %v706_v63 }
  0x54   :  { %443 = vmatmul.mubr.f32.gmra.mrb[16].mxu0 %v683_v0  ;;  %586 = vmatmul.mubr.f32.gmra.mrb[16].mxu1 %v705_v1 }
  0x55   :  { %698 = vmatprep.mubr.msk.f32.mxu0 %vm54_vm0, %v686_v2  ;;  %720 = vmatprep.mubr.msk.f32.mxu1 %vm54_vm0, %v708_v3 }
  0x58   :  { %448 = vmatmul.mubr.f32.gmra.mrb[18].mxu0 %v685_v4  ;;  %591 = vmatmul.mubr.f32.gmra.mrb[18].mxu1 %v707_v5 }
  0x59   :  { %699 = vmatprep.mubr.msk.f32.mxu0 %vm54_vm0, %v688_v6  ;;  %721 = vmatprep.mubr.msk.f32.mxu1 %vm54_vm0, %v710_v7 }
  0x5c   :  { %453 = vmatmul.mubr.f32.gmra.mrb[20].mxu0 %v687_v8  ;;  %596 = vmatmul.mubr.f32.gmra.mrb[20].mxu1 %v709_v9 }
  0x5d   :  { %700 = vmatprep.mubr.msk.f32.mxu0 %vm54_vm0, %v690_v10  ;;  %722 = vmatprep.mubr.msk.f32.mxu1 %vm54_vm0, %v712_v11 }
  0x60   :  { %458 = vmatmul.mubr.f32.gmra.mrb[22].mxu0 %v689_v12  ;;  %601 = vmatmul.mubr.f32.gmra.mrb[22].mxu1 %v711_v13 }
  0x61   :  { %701 = vmatprep.mubr.msk.f32.mxu0 %vm54_vm0, %v692_v14  ;;  %723 = vmatprep.mubr.msk.f32.mxu1 %vm54_vm0, %v714_v15 }
  0x64   :  { %463 = vmatmul.mubr.f32.gmra.mrb[24].mxu0 %v691_v16  ;;  %606 = vmatmul.mubr.f32.gmra.mrb[24].mxu1 %v713_v17 }
  0x65   :  { %702 = vmatprep.mubr.msk.f32.mxu0 %vm54_vm0, %v694_v18  ;;  %724 = vmatprep.mubr.msk.f32.mxu1 %vm54_vm0, %v716_v19 }
  0x68   :  { %468 = vmatmul.mubr.f32.gmra.mrb[26].mxu0 %v693_v20  ;;  %611 = vmatmul.mubr.f32.gmra.mrb[26].mxu1 %v715_v21 }
  0xfc   :  { %v146_v23 = vpop.f32.mrb[0].mxu0  ;;  %v289_v24 = vpop.f32.mrb[0].mxu1 }
  0xfd   :  { %v147_v25 = vadd.f32 %v1217_v22, %v146_v23  ;;  %v290_v26 = vadd.f32 %v1217_v22, %v289_v24  ;;  %v148_v27 = vpop.f32.mrb[1].mxu0  ;;  %v291_v28 = vpop.f32.mrb[1].mxu1 }
  0xff   :  { %v180_v29 = vmax.f32 %v147_v25, 0.0  ;;  %v323_v30 = vmax.f32 %v290_v26, 0.0 }
 0x101   :  { %v1221_v31 = vmax.f32 %v180_v29, %v323_v30  ;;  %v151_v32 = vpop.f32.mrb[2].mxu0  ;;  %v294_v33 = vpop.f32.mrb[2].mxu1 }
 0x102   :  { %v152_v34 = vadd.f32 %v1217_v22, %v151_v32  ;;  %v295_v35 = vadd.f32 %v1217_v22, %v294_v33  ;;  %v153_v36 = vpop.f32.mrb[3].mxu0  ;;  %v296_v37 = vpop.f32.mrb[3].mxu1 }
 0x104   :  { %v181_v38 = vmax.f32 %v152_v34, 0.0  ;;  %v324_v39 = vmax.f32 %v295_v35, 0.0 }
 0x105   :  { %v156_v40 = vpop.f32.mrb[4].mxu0  ;;  %v299_v41 = vpop.f32.mrb[4].mxu1 }
 0x106   :  { %v1225_v42 = vmax.f32 %v181_v38, %v324_v39  ;;  %v157_v43 = vadd.f32 %v1217_v22, %v156_v40  ;;  %v300_v44 = vadd.f32 %v1217_v22, %v299_v41  ;;  %v158_v45 = vpop.f32.mrb[5].mxu0  ;;  %v301_v46 = vpop.f32.mrb[5].mxu1 }
 0x108   :  { %v182_v47 = vmax.f32 %v157_v43, 0.0  ;;  %v325_v48 = vmax.f32 %v300_v44, 0.0 }
 0x109   :  { %v161_v49 = vpop.f32.mrb[6].mxu0  ;;  %v304_v50 = vpop.f32.mrb[6].mxu1 }
 0x10a   :  { %v1229_v51 = vmax.f32 %v182_v47, %v325_v48  ;;  %v162_v52 = vadd.f32 %v1217_v22, %v161_v49  ;;  %v305_v53 = vadd.f32 %v1217_v22, %v304_v50  ;;  %v163_v54 = vpop.f32.mrb[7].mxu0  ;;  %v306_v55 = vpop.f32.mrb[7].mxu1 }
 0x10c   :  { %v183_v56 = vmax.f32 %v162_v52, 0.0  ;;  %v326_v57 = vmax.f32 %v305_v53, 0.0 }
 0x10d   :  { %v166_v58 = vpop.f32.mrb[8].mxu0  ;;  %v309_v59 = vpop.f32.mrb[8].mxu1 }
 0x10e   :  { %v1233_v60 = vmax.f32 %v183_v56, %v326_v57  ;;  %v167_v61 = vadd.f32 %v1217_v22, %v166_v58  ;;  %v310_v62 = vadd.f32 %v1217_v22, %v309_v59  ;;  %v168_v63 = vpop.f32.mrb[9].mxu0  ;;  %v311_v0 = vpop.f32.mrb[9].mxu1 }
 0x110   :  { %v184_v1 = vmax.f32 %v167_v61, 0.0  ;;  %v327_v2 = vmax.f32 %v310_v62, 0.0 }
 0x111   :  { %v171_v3 = vpop.f32.mrb[10].mxu0  ;;  %v314_v4 = vpop.f32.mrb[10].mxu1 }
 0x112   :  { %v1237_v5 = vmax.f32 %v184_v1, %v327_v2  ;;  %v172_v6 = vadd.f32 %v1217_v22, %v171_v3  ;;  %v315_v7 = vadd.f32 %v1217_v22, %v314_v4  ;;  %v173_v8 = vpop.f32.mrb[11].mxu0  ;;  %v316_v9 = vpop.f32.mrb[11].mxu1 }
 0x114   :  { %v185_v10 = vmax.f32 %v172_v6, 0.0  ;;  %v328_v11 = vmax.f32 %v315_v7, 0.0 }
 0x115   :  { %v176_v12 = vpop.f32.mrb[12].mxu0  ;;  %v319_v13 = vpop.f32.mrb[12].mxu1 }
 0x116   :  { %v1241_v14 = vmax.f32 %v185_v10, %v328_v11  ;;  %v177_v15 = vadd.f32 %v1217_v22, %v176_v12  ;;  %v320_v16 = vadd.f32 %v1217_v22, %v319_v13  ;;  %v178_v17 = vpop.f32.mrb[13].mxu0  ;;  %v321_v18 = vpop.f32.mrb[13].mxu1 }
 0x118   :  { %v186_v19 = vmax.f32 %v177_v15, 0.0  ;;  %v329_v20 = vmax.f32 %v320_v16, 0.0 }
 0x11a   :  { %v1245_v21 = vmax.f32 %v186_v19, %v329_v20 }
 0x123   :  { %v439_v23 = vpop.f32.mrb[14].mxu0  ;;  %v582_v24 = vpop.f32.mrb[14].mxu1 }
 0x124   :  { %v440_v25 = vadd.f32 %v1217_v22, %v439_v23  ;;  %v583_v26 = vadd.f32 %v1217_v22, %v582_v24  ;;  %v441_v27 = vpop.f32.mrb[15].mxu0  ;;  %v584_v28 = vpop.f32.mrb[15].mxu1 }
 0x126   :  { %v473_v29 = vmax.f32 %v440_v25, 0.0  ;;  %v616_v30 = vmax.f32 %v583_v26, 0.0 }
 0x127   :  { %v444_v32 = vpop.f32.mrb[16].mxu0  ;;  %v587_v33 = vpop.f32.mrb[16].mxu1 }
 0x128   :  { %v623_v34 = vmax.f32 %v473_v29, %v616_v30  ;;  %v445_v35 = vadd.f32 %v1217_v22, %v444_v32  ;;  %v588_v36 = vadd.f32 %v1217_v22, %v587_v33  ;;  %v446_v37 = vpop.f32.mrb[17].mxu0  ;;  %v589_v38 = vpop.f32.mrb[17].mxu1 }
 0x12a   :  { %v630_v39 = vmax.f32 %v1221_v31, %v623_v34  ;;  %v474_v40 = vmax.f32 %v445_v35, 0.0  ;;  %v617_v41 = vmax.f32 %v588_v36, 0.0 }
 0x12b   :  { %v449_v43 = vpop.f32.mrb[18].mxu0  ;;  %v592_v44 = vpop.f32.mrb[18].mxu1 }
 0x12c   :  { %638 = vst.msk [vmem:[%s1298_s3] sm:$0xff] %vm637_vm2, %v630_v39  ;;  %v624_v45 = vmax.f32 %v474_v40, %v617_v41  ;;  %v450_v46 = vadd.f32 %v1217_v22, %v449_v43  ;;  %v593_v47 = vadd.f32 %v1217_v22, %v592_v44  ;;  %v451_v48 = vpop.f32.mrb[19].mxu0  ;;  %v594_v49 = vpop.f32.mrb[19].mxu1 }
 0x12e   :  { %v631_v50 = vmax.f32 %v1225_v42, %v624_v45  ;;  %v475_v52 = vmax.f32 %v450_v46, 0.0  ;;  %v618_v31 = vmax.f32 %v593_v47, 0.0 }
 0x12f   :  { %v454_v53 = vpop.f32.mrb[20].mxu0  ;;  %v597_v54 = vpop.f32.mrb[20].mxu1 }
 0x130   :  { %639 = vst.msk [vmem:[%s1298_s3 + $0x8] sm:$0xff] %vm637_vm2, %v631_v50  ;;  %v625_v55 = vmax.f32 %v475_v52, %v618_v31  ;;  %v455_v56 = vadd.f32 %v1217_v22, %v454_v53  ;;  %v598_v57 = vadd.f32 %v1217_v22, %v597_v54  ;;  %v456_v58 = vpop.f32.mrb[21].mxu0  ;;  %v599_v59 = vpop.f32.mrb[21].mxu1 }
 0x132   :  { %v632_v61 = vmax.f32 %v1229_v51, %v625_v55  ;;  %v476_v62 = vmax.f32 %v455_v56, 0.0  ;;  %v619_v42 = vmax.f32 %v598_v57, 0.0 }
 0x133   :  { %v459_v63 = vpop.f32.mrb[22].mxu0  ;;  %v602_v0 = vpop.f32.mrb[22].mxu1 }
 0x134   :  { %640 = vst.msk [vmem:[%s1298_s3 + $0x10] sm:$0xff] %vm637_vm2, %v632_v61  ;;  %v626_v1 = vmax.f32 %v476_v62, %v619_v42  ;;  %v460_v2 = vadd.f32 %v1217_v22, %v459_v63  ;;  %v603_v3 = vadd.f32 %v1217_v22, %v602_v0  ;;  %v461_v4 = vpop.f32.mrb[23].mxu0  ;;  %v604_v6 = vpop.f32.mrb[23].mxu1 }
 0x136   :  { %v633_v7 = vmax.f32 %v1233_v60, %v626_v1  ;;  %v477_v8 = vmax.f32 %v460_v2, 0.0  ;;  %v620_v51 = vmax.f32 %v603_v3, 0.0 }
 0x137   :  { %v464_v9 = vpop.f32.mrb[24].mxu0  ;;  %v607_v10 = vpop.f32.mrb[24].mxu1 }
 0x138   :  { %641 = vst.msk [vmem:[%s1298_s3 + $0x18] sm:$0xff] %vm637_vm2, %v633_v7  ;;  %v627_v11 = vmax.f32 %v477_v8, %v620_v51  ;;  %v465_v12 = vadd.f32 %v1217_v22, %v464_v9  ;;  %v608_v13 = vadd.f32 %v1217_v22, %v607_v10  ;;  %v466_v15 = vpop.f32.mrb[25].mxu0  ;;  %v609_v16 = vpop.f32.mrb[25].mxu1 }
 0x13a   :  { %v634_v17 = vmax.f32 %v1237_v5, %v627_v11  ;;  %v478_v18 = vmax.f32 %v465_v12, 0.0  ;;  %v621_v60 = vmax.f32 %v608_v13, 0.0 }
 0x13b   :  { %v469_v19 = vpop.f32.mrb[26].mxu0  ;;  %v612_v20 = vpop.f32.mrb[26].mxu1 }
 0x13c   :  { %642 = vst.msk [vmem:[%s1298_s3 + $0x20] sm:$0xff] %vm637_vm2, %v634_v17  ;;  %v628_v23 = vmax.f32 %v478_v18, %v621_v60  ;;  %v470_v24 = vadd.f32 %v1217_v22, %v469_v19  ;;  %v613_v25 = vadd.f32 %v1217_v22, %v612_v20  ;;  %v471_v26 = vpop.f32.mrb[27].mxu0  ;;  %v614_v27 = vpop.f32.mrb[27].mxu1 }
 0x13e   :  { %v635_v28 = vmax.f32 %v1241_v14, %v628_v23  ;;  %v479_v29 = vmax.f32 %v470_v24, 0.0  ;;  %v622_v5 = vmax.f32 %v613_v25, 0.0 }
 0x140   :  { %643 = vst.msk [vmem:[%s1298_s3 + $0x28] sm:$0xff] %vm637_vm2, %v635_v28  ;;  %v629_v30 = vmax.f32 %v479_v29, %v622_v5 }
 0x142   :  { %v636_v32 = vmax.f32 %v1245_v21, %v629_v30 }
 0x144   :  { %645 = vst.msk [vmem:[%s1298_s3 + $0x30] sm:$0x3] %vm644_vm3, %v636_v32 }

// kernel: mynet_forward.5
= control target key start
LH: loop header
LB: loop body
LE: loop exit
PB: predicated region body
PF: predicated region fallthrough
CT: control target
= control target key end

     0   :  { %v712_v4 = vmov 0.0|0.0   ;;  %v713_v26 = vmov 1983009808   ;;  %v90_v28 = vlaneseq  ;;  %vm106_vm0 = vcmask 130048   ;;  %s1030_s0 = inlined_call_operand.vmem [shape: f32[2,400], index: 0, kind: input, shape index: {}]   ;;  %s1031_s1 = inlined_call_operand.vmem [shape: f32[400,120], index: 1, kind: input, shape index: {}]   ;;  %s1032_s2 = inlined_call_operand.vmem [shape: f32[1,120], index: 2, kind: input, shape index: {}]   ;;  %s1033_s3 = inlined_call_operand.vmem [shape: f32[120,84], index: 3, kind: input, shape index: {}]   ;;  %s1034_s4 = inlined_call_operand.vmem [shape: f32[1,84], index: 4, kind: input, shape index: {}]   ;;  %s1035_s5 = inlined_call_operand.vmem [shape: f32[84,10], index: 5, kind: input, shape index: {}]   ;;  %s1036_s6 = inlined_call_operand.vmem [shape: f32[1,10], index: 6, kind: input, shape index: {}]   ;;  %s1037_s7 = inlined_call_operand.hbm [shape: f32[2,10], index: 7, kind: output, shape index: {}]  }
   0x1   :  { %v44_v0 = vld [vmem:[%s1031_s1 + $0x80] sm:$0xff]  ;;  %v45_v1 = vld [vmem:[%s1031_s1 + $0x88] sm:$0xff]  ;;  %619 = vmatprep.subr.bf16.mxu1 %v712_v4  ;;  %v46_v10 = vld [vmem:[%s1031_s1 + $0x90] sm:$0xff]  ;;  %v88_v27 = vunpack.c.l.s4 %v713_v26 }
   0x2   :  { %v28_v2 = vld [vmem:[%s1031_s1] sm:$0xff]  ;;  %v587_v3 = vpack.c.bf16 %v45_v1, %v44_v0  ;;  %v29_v5 = vld [vmem:[%s1031_s1 + $0x8] sm:$0xff]  ;;  %v47_v11 = vld [vmem:[%s1031_s1 + $0x98] sm:$0xff]  ;;  %v91_v39 = vshrl.u32 %v90_v28, 7 }
   0x3   :  { %v60_v6 = vld [vmem:[%s1031_s1 + $0x100] sm:$0xff]  ;;  %v61_v7 = vld [vmem:[%s1031_s1 + $0x108] sm:$0xff]  ;;  %v589_v8 = vpack.c.bf16 %v29_v5, %v28_v2  ;;  %v30_v12 = vld [vmem:[%s1031_s1 + $0x10] sm:$0xff]  ;;  %v591_v13 = vpack.c.bf16 %v47_v11, %v46_v10  ;;  %v89_v38 = vunpack.c.0.s8 %v88_v27 }
   0x4   :  { %v620_v9 = vpack.c.bf16 %v61_v7, %v60_v6  ;;  %588 = vmatprep.subr.bf16.mxu0 %v587_v3  ;;  %v31_v14 = vld [vmem:[%s1031_s1 + $0x18] sm:$0xff]  ;;  %v62_v15 = vld [vmem:[%s1031_s1 + $0x110] sm:$0xff]  ;;  %v48_v19 = vld [vmem:[%s1031_s1 + $0xa0] sm:$0xff] }
   0x5   :  { %v63_v16 = vld [vmem:[%s1031_s1 + $0x118] sm:$0xff]  ;;  %590 = vmatpush3.bf16.msra.mxu0 %v589_v8  ;;  %v593_v17 = vpack.c.bf16 %v31_v14, %v30_v12  ;;  %v49_v20 = vld [vmem:[%s1031_s1 + $0xa8] sm:$0xff]  ;;  %v32_v21 = vld [vmem:[%s1031_s1 + $0x20] sm:$0xff]  ;;  %v92_v49 = vsub.s32 %v89_v38, %v91_v39 }
   0x6   :  { %621 = vmatpush1.bf16.msra.mxu1 %v620_v9  ;;  %v623_v18 = vpack.c.bf16 %v63_v16, %v62_v15  ;;  %592 = vmatprep.subr.bf16.mxu0 %v591_v13  ;;  %v595_v22 = vpack.c.bf16 %v49_v20, %v48_v19  ;;  %v33_v23 = vld [vmem:[%s1031_s1 + $0x28] sm:$0xff]  ;;  %v64_v24 = vld [vmem:[%s1031_s1 + $0x120] sm:$0xff]  ;;  %v50_v29 = vld [vmem:[%s1031_s1 + $0xb0] sm:$0xff] }
   0x7   :  { %622 = vmatprep.subr.bf16.mxu1 %v712_v4  ;;  %v65_v25 = vld [vmem:[%s1031_s1 + $0x128] sm:$0xff]  ;;  %v51_v30 = vld [vmem:[%s1031_s1 + $0xb8] sm:$0xff]  ;;  %v597_v31 = vpack.c.bf16 %v33_v23, %v32_v21  ;;  %v34_v33 = vld [vmem:[%s1031_s1 + $0x30] sm:$0xff] }
   0x8   :  { %v626_v32 = vpack.c.bf16 %v65_v25, %v64_v24  ;;  %v599_v34 = vpack.c.bf16 %v51_v30, %v50_v29  ;;  %v35_v35 = vld [vmem:[%s1031_s1 + $0x38] sm:$0xff]  ;;  %v66_v36 = vld [vmem:[%s1031_s1 + $0x130] sm:$0xff]  ;;  %v52_v40 = vld [vmem:[%s1031_s1 + $0xc0] sm:$0xff] }
   0x9   :  { %594 = vmatpush3.bf16.msra.mxu0 %v593_v17  ;;  %v67_v37 = vld [vmem:[%s1031_s1 + $0x138] sm:$0xff]  ;;  %v53_v41 = vld [vmem:[%s1031_s1 + $0xc8] sm:$0xff]  ;;  %v601_v42 = vpack.c.bf16 %v35_v35, %v34_v33  ;;  %v36_v44 = vld [vmem:[%s1031_s1 + $0x40] sm:$0xff] }
   0xa   :  { %624 = vmatpush1.bf16.msra.mxu1 %v623_v18  ;;  %596 = vmatprep.subr.bf16.mxu0 %v595_v22  ;;  %v629_v43 = vpack.c.bf16 %v67_v37, %v66_v36  ;;  %v603_v45 = vpack.c.bf16 %v53_v41, %v52_v40  ;;  %v37_v46 = vld [vmem:[%s1031_s1 + $0x48] sm:$0xff]  ;;  %v68_v47 = vld [vmem:[%s1031_s1 + $0x140] sm:$0xff]  ;;  %v54_v50 = vld [vmem:[%s1031_s1 + $0xd0] sm:$0xff] }
   0xb   :  { %625 = vmatprep.subr.bf16.mxu1 %v712_v4  ;;  %v69_v48 = vld [vmem:[%s1031_s1 + $0x148] sm:$0xff]  ;;  %v55_v51 = vld [vmem:[%s1031_s1 + $0xd8] sm:$0xff]  ;;  %v605_v52 = vpack.c.bf16 %v37_v46, %v36_v44  ;;  %v38_v54 = vld [vmem:[%s1031_s1 + $0x50] sm:$0xff] }
   0xc   :  { %v632_v53 = vpack.c.bf16 %v69_v48, %v68_v47  ;;  %v27_v55 = vld [vmem:[%s1030_s0] sm:$0xff]  ;;  %v607_v56 = vpack.c.bf16 %v55_v51, %v54_v50  ;;  %v39_v57 = vld [vmem:[%s1031_s1 + $0x58] sm:$0xff]  ;;  %v70_v58 = vld [vmem:[%s1031_s1 + $0x150] sm:$0xff] }
   0xd   :  { %598 = vmatpush3.bf16.msra.mxu0 %v597_v31  ;;  %v71_v59 = vld [vmem:[%s1031_s1 + $0x158] sm:$0xff]  ;;  %v86_v60 = vcombine.high %v27_v55, %v27_v55  ;;  %v93_v61 = vrot.slane %v27_v55, %v92_v49  ;;  %v56_v62 = vld [vmem:[%s1031_s1 + $0xe0] sm:$0xff]  ;;  %v57_v63 = vld [vmem:[%s1031_s1 + $0xe8] sm:$0xff]  ;;  %v609_v2 = vpack.c.bf16 %v39_v57, %v38_v54 }
   0xe   :  { %627 = vmatpush1.bf16.msra.mxu1 %v626_v32  ;;  %600 = vmatprep.subr.bf16.mxu0 %v599_v34  ;;  %v635_v3 = vpack.c.bf16 %v71_v59, %v70_v58  ;;  %v40_v5 = vld [vmem:[%s1031_s1 + $0x60] sm:$0xff] }
   0xf   :  { %628 = vmatprep.subr.bf16.mxu1 %v712_v4  ;;  %v101_v0 = vcombine.high %v93_v61, %v93_v61  ;;  %v100_v1 = vrot.slane %v86_v60, %v92_v49 }
  0x11   :  { %602 = vmatpush3.bf16.msra.mxu0 %v601_v42 }
  0x12   :  { %630 = vmatpush1.bf16.msra.mxu1 %v629_v43  ;;  %604 = vmatprep.subr.bf16.mxu0 %v603_v45 }
  0x13   :  { %631 = vmatprep.subr.bf16.mxu1 %v712_v4 }
  0x15   :  { %606 = vmatpush3.bf16.msra.mxu0 %v605_v52 }
  0x16   :  { %633 = vmatpush1.bf16.msra.mxu1 %v632_v53 }
  0x17   :  { %12 = vsyncpa [#allocation3], 0  ;;  %608 = vmatprep.subr.bf16.mxu0 %v607_v56  ;;  %634 = vmatprep.subr.bf16.mxu1 %v712_v4  ;;  %v611_v6 = vpack.c.bf16 %v57_v63, %v56_v62  ;;  %v41_v7 = vld [vmem:[%s1031_s1 + $0x68] sm:$0xff]  ;;  %v72_v8 = vld [vmem:[%s1031_s1 + $0x160] sm:$0xff]  ;;  %v102_v10 = vcombine.high %v100_v1, %v100_v1  ;;  %v714_v46 = vmov 0.0   ;;  %vm715_vm1 = vmmov 0  }
  0x18   :  { %v73_v9 = vld [vmem:[%s1031_s1 + $0x168] sm:$0xff]  ;;  %v58_v11 = vld [vmem:[%s1031_s1 + $0xf0] sm:$0xff]  ;;  %v59_v12 = vld [vmem:[%s1031_s1 + $0xf8] sm:$0xff]  ;;  %173 = vmatprep.mubr.f32.mxu0 %v101_v0  ;;  %v613_v13 = vpack.c.bf16 %v41_v7, %v40_v5  ;;  %vm272_vm2 = vcmask 982016   ;;  %vm369_vm3 = vcmask 1043456   ;;  %vm365_vm4 = vcmask 687104  }
  0x19   :  { %460 = vmatprep.mubr.msk.f32.mxu1 %vm106_vm0, %v102_v10  ;;  %610 = vmatpush3.bf16.msra.mxu0 %v609_v2  ;;  %v638_v14 = vpack.c.bf16 %v73_v9, %v72_v8  ;;  %v42_v15 = vld [vmem:[%s1031_s1 + $0x70] sm:$0xff]  ;;  %v615_v16 = vpack.c.bf16 %v59_v12, %v58_v11  ;;  %v43_v17 = vld [vmem:[%s1031_s1 + $0x78] sm:$0xff]  ;;  %v76_v22 = vld [vmem:[%s1031_s1 + $0x180] sm:$0xff]  ;;  %vm443_vm5 = vcmask 74752  }
  0x1a   :  { %636 = vmatpush1.bf16.msra.mxu1 %v635_v3  ;;  %612 = vmatprep.subr.bf16.mxu0 %v611_v6  ;;  %v74_v18 = vld [vmem:[%s1031_s1 + $0x170] sm:$0xff]  ;;  %v75_v19 = vld [vmem:[%s1031_s1 + $0x178] sm:$0xff]  ;;  %v617_v20 = vpack.c.bf16 %v43_v17, %v42_v15  ;;  %v77_v23 = vld [vmem:[%s1031_s1 + $0x188] sm:$0xff]  ;;  %s716_s1 = smov [#allocation2]  }
  0x1b   :  { %637 = vmatprep.subr.bf16.mxu1 %v712_v4  ;;  %v641_v21 = vpack.c.bf16 %v75_v19, %v74_v18  ;;  %v250_v24 = vld [vmem:[%s1033_s3] sm:$0xff]  ;;  %v251_v25 = vld [vmem:[%s1033_s3 + $0x8] sm:$0xff]  ;;  %v644_v26 = vpack.c.bf16 %v77_v23, %v76_v22  ;;  %v252_v28 = vld [vmem:[%s1033_s3 + $0x10] sm:$0xff]  ;;  %s451_s15 = sshll.u32 %s716_s1, 4  ;;  %s452_s15 = int_to_ptr.vmem [resolvable:$true] %s451_s15 }
  0x1c   :  { %v647_v27 = vpack.c.bf16 %v251_v25, %v250_v24  ;;  %v253_v29 = vld [vmem:[%s1033_s3 + $0x18] sm:$0xff]  ;;  %v254_v31 = vld [vmem:[%s1033_s3 + $0x20] sm:$0xff]  ;;  %v255_v32 = vld [vmem:[%s1033_s3 + $0x28] sm:$0xff]  ;;  %p693_p1 = scmp.lt.s32.totalorder %s452_s15, %s452_s15 }
  0x1d   :  { %614 = vmatpush3.bf16.msra.mxu0 %v613_v13  ;;  %v650_v30 = vpack.c.bf16 %v253_v29, %v252_v28  ;;  %v653_v33 = vpack.c.bf16 %v255_v32, %v254_v31  ;;  %v256_v34 = vld [vmem:[%s1033_s3 + $0x30] sm:$0xff]  ;;  %v257_v35 = vld [vmem:[%s1033_s3 + $0x38] sm:$0xff]  ;;  %v258_v37 = vld [vmem:[%s1033_s3 + $0x40] sm:$0xff] }
  0x1e   :  { %639 = vmatpush1.bf16.msra.mxu1 %v638_v14  ;;  %616 = vmatprep.subr.bf16.mxu0 %v615_v16  ;;  %v656_v36 = vpack.c.bf16 %v257_v35, %v256_v34  ;;  %v259_v38 = vld [vmem:[%s1033_s3 + $0x48] sm:$0xff]  ;;  %v260_v40 = vld [vmem:[%s1033_s3 + $0x50] sm:$0xff]  ;;  %v261_v41 = vld [vmem:[%s1033_s3 + $0x58] sm:$0xff] }
  0x1f   :  { %640 = vmatprep.subr.bf16.mxu1 %v712_v4  ;;  %v659_v39 = vpack.c.bf16 %v259_v38, %v258_v37  ;;  %v662_v42 = vpack.c.bf16 %v261_v41, %v260_v40  ;;  %v262_v43 = vld [vmem:[%s1033_s3 + $0x60] sm:$0xff]  ;;  %v263_v44 = vld [vmem:[%s1033_s3 + $0x68] sm:$0xff]  ;;  %v264_v47 = vld [vmem:[%s1033_s3 + $0x70] sm:$0xff] }
  0x20   :  { %v665_v45 = vpack.c.bf16 %v263_v44, %v262_v43  ;;  %v347_v48 = vld [vmem:[%s1035_s5] sm:$0xff]  ;;  %v348_v49 = vld [vmem:[%s1035_s5 + $0x8] sm:$0xff]  ;;  %v349_v50 = vld [vmem:[%s1035_s5 + $0x10] sm:$0xff] }
  0x21   :  { %618 = vmatpush3.bf16.msra.mxu0 %v617_v20  ;;  %v668_v51 = vpack.c.bf16 %v348_v49, %v347_v48  ;;  %v350_v52 = vld [vmem:[%s1035_s5 + $0x18] sm:$0xff]  ;;  %v351_v54 = vld [vmem:[%s1035_s5 + $0x20] sm:$0xff]  ;;  %v352_v55 = vld [vmem:[%s1035_s5 + $0x28] sm:$0xff] }
  0x22   :  { %642 = vmatpush1.bf16.msra.mxu1 %v641_v21  ;;  %646 = vmatprep.subr.bf16.mxu0 %v712_v4  ;;  %v671_v53 = vpack.c.bf16 %v350_v52, %v349_v50  ;;  %v674_v56 = vpack.c.bf16 %v352_v55, %v351_v54  ;;  %v353_v57 = vld [vmem:[%s1035_s5 + $0x30] sm:$0xff]  ;;  %v354_v58 = vld [vmem:[%s1035_s5 + $0x38] sm:$0xff]  ;;  %v459_v62 = vld [vmem:[%s1032_s2] ss:$0 sm:$0xff] }
  0x23   :  { %643 = vmatprep.subr.bf16.mxu1 %v712_v4  ;;  %v677_v59 = vpack.c.bf16 %v354_v58, %v353_v57  ;;  %v355_v6 = vld [vmem:[%s1035_s5 + $0x40] sm:$0xff]  ;;  %v357_v8 = vld [vmem:[%s1035_s5 + $0x50] sm:$0xf] }
  0x24   :  { %174 = vmatmul.mubr.f32.vlgmr.msra.gmra.mrb[0].mxu0 %v93_v61  ;;  %v461_v9 = vld [vmem:[%s1034_s4] ss:$0 sm:$0xff] }
  0x25   :  { %648 = vmatpush3.bf16.msra.mxu0 %v647_v27  ;;  %559 = vmatprep.mubr.msk.f32.mxu0 %vm715_vm1, %v714_v46  ;;  %v463_v14 = vld [vmem:[%s1036_s6] ss:$0 sm:$0xff] }
  0x26   :  { %645 = vmatpush1.bf16.msra.mxu1 %v644_v26  ;;  %649 = vmatprep.subr.bf16.mxu0 %v712_v4 }
  0x27   :  { %667 = vmatprep.subr.bf16.mxu1 %v712_v4 }
  0x29   :  { %244 = vmatmul.mubr.f32.vlgmr.msra.gmra.mrb[0].mxu1 %v100_v1  ;;  %651 = vmatpush3.bf16.msra.mxu0 %v650_v30 }
  0x2a   :  { %652 = vmatprep.subr.bf16.mxu0 %v712_v4  ;;  %584 = vmatprep.mubr.msk.f32.mxu1 %vm715_vm1, %v714_v46 }
  0x2b   :  { %669 = vmatpush3.bf16.msra.mxu1 %v668_v51 }
  0x2c   :  { %670 = vmatprep.subr.bf16.mxu1 %v712_v4 }
  0x2d   :  { %654 = vmatpush3.bf16.msra.mxu0 %v653_v33 }
  0x2e   :  { %655 = vmatprep.subr.bf16.mxu0 %v712_v4 }
  0x2f   :  { %672 = vmatpush3.bf16.msra.mxu1 %v671_v53 }
  0x30   :  { %673 = vmatprep.subr.bf16.mxu1 %v712_v4 }
  0x31   :  { %657 = vmatpush3.bf16.msra.mxu0 %v656_v36 }
  0x32   :  { %658 = vmatprep.subr.bf16.mxu0 %v712_v4 }
  0x33   :  { %675 = vmatpush3.bf16.msra.mxu1 %v674_v56 }
  0x34   :  { %676 = vmatprep.subr.bf16.mxu1 %v712_v4 }
  0x35   :  { %660 = vmatpush3.bf16.msra.mxu0 %v659_v39 }
  0x36   :  { %661 = vmatprep.subr.bf16.mxu0 %v712_v4 }
  0x37   :  { %678 = vmatpush3.bf16.msra.mxu1 %v677_v59 }
  0x38   :  { %679 = vmatprep.subr.bf16.mxu1 %v712_v4 }
  0x39   :  { %663 = vmatpush3.bf16.msra.mxu0 %v662_v42 }
  0x3a   :  { %664 = vmatprep.subr.bf16.mxu0 %v712_v4  ;;  %v356_v4 = vld [vmem:[%s1035_s5 + $0x48] sm:$0xff]  ;;  %s688_s5 = scalar_lea.vmem %s452_s15, 32 }
  0x3b   :  { %v680_v7 = vpack.c.bf16 %v356_v4, %v355_v6  ;;  %p689_p0 = scmp.ne.s32.totalorder %s452_s15, %s688_s5  ;;  %p694_p2 = scmp.lt.s32.totalorder %s688_s5, %s688_s5 }
  0x3d   :  { %666 = vmatpush3.bf16.msra.mxu0 %v665_v45  ;;  %681 = vmatpush3.bf16.msra.mxu1 %v680_v7  ;;  %p695_p3 = por %p694_p2, %p693_p1 }
  0x3e   :  { %557 = vmatprep.subr.mxu0 %v714_v46  ;;  %582 = vmatprep.subr.mxu1 %v714_v46 }
  0x3f   :  { %p696_p4 = pnand %p695_p3, %p689_p0 }
  0x41   :  { %558 = vmatpush3.msra.mxu0 %v264_v47  ;;  %583 = vmatpush3.msk.msra.mxu1 %vm369_vm3, %v357_v8 }
  0xf7   :  { %v498_v60 = vpop.f32.mrb[0].mxu0 }
  0xf8   :  { %v499_v61 = vpop.f32.mrb[1].mxu0 }
  0xf9   :  { %v500_v63 = vadd.f32 %v499_v61, %v498_v60 }
  0xfb   :  { %v176_v0 = vadd.f32 %v500_v63, %v459_v62 }
  0xfc   :  { %v245_v1 = vpop.f32.mrb[0].mxu1 }
  0xfd   :  { %v247_v2 = vpop.f32.mrb[1].mxu1  ;;  %v246_v3 = vadd.f32 %v245_v1, %v176_v0 }
  0xff   :  { %v249_v5 = vmax.f32 %v246_v3, 0.0 }
 0x101   :  { %560 = vmatmul.mubr.msk.f32.vlgmr.msra.gmra.mrb[2].mxu0 %vm272_vm2, %v249_v5 }
 0x1d4   :  { %v342_v10 = vpop.f32.mrb[2].mxu0 }
 0x1d5   :  { %v343_v11 = vadd.f32 %v461_v9, %v342_v10  ;;  %v561_v12 = vpop.f32.mrb[3].mxu0 }
 0x1d7   :  { %v346_v13 = vmax.f32 %v343_v11, 0.0 }
 0x1d9   :  { %585 = vmatmul.mubr.msk.f32.vlgmr.msra.gmra.mrb[2].mxu1 %vm365_vm4, %v346_v13 }
 0x2ac   :  { %v439_v15 = vpop.f32.mrb[2].mxu1 }
 0x2ad   :  { %v440_v16 = vadd.f32 %v463_v14, %v439_v15  ;;  %v586_v17 = vpop.f32.mrb[3].mxu1 }
 0x2af   :  { %444 = vst.msk [vmem:[#allocation2] sm:$0x3] %vm443_vm5, %v440_v16 }
 0x2b0   :  { %699 = shalt.err (!%p696_p4)
}
 0x2b1   :  { %s700_s17 = scalar_lea.hbm %s1037_s7, 32 }
 0x2b2   :  { %p701_p5 = scmp.ne.s32.totalorder %s1037_s7, %s700_s17  ;;  %p704_p6 = scmp.lt.u32.totalorder %s700_s17, %s1037_s7 }
 0x2b4   :  { %p706_p7 = pnand %p704_p6, %p701_p5 }
 0x2b6   :  { %709 = shalt.err (!%p706_p7)
}
 0x2b7   :  { %454 = dma.vmem_to_hbm [thread:$0]  %s452_s15, 32, %s1037_s7, [#allocation3]  }
 0x2b8   :  { %710 = dma.done.wait [#allocation3], 32  }
 0x2b9   :  { %711 = vsyncadd [#allocation3], 4294967264 }
 0x2ba   :  { %458 = vsyncpa [#allocation3], 1 }

</bundles_post_ra>
